<compile_context>
chip_gen: v7x
topology: tpu7x:2x2x1
jax: 0.10.0
libtpu: 0.0.40
codegen_flags: <defaults>
</compile_context>

<pallas_src>
import functools
import math

import jax
import jax.numpy as jnp
from jax.experimental import pallas as pl
from jax.experimental.pallas import tpu as pltpu


def _encoder_kernel(x_nt_ref, x_tn_ref, xv_ref, cheb_cat_ref, theta_cat_ref,
                    t_wqkv_ref, t_wo_ref, s_wqkv_ref, s_wo_ref,
                    v_wqkv_ref, v_wo_ref,
                    t_out_ref, s_out_ref, v_out_ref,
                    *, B, V, N, T, K, n_heads, d_k, d_model):
    BV = B * V
    hdk = n_heads * d_k
    scale = 1.0 / math.sqrt(d_k)
    f32 = jnp.float32

    def mha_packed(xin, wqkv, wo):
        """Multi-head attention over the middle axis of xin = (bp, S, F).

        Returns a lane-dense (bp, S * d_model) slab so the store to the
        output ref is a full-width vector store.
        """
        bp, S, F = xin.shape
        xf = xin.reshape(bp * S, F)                       # leading-dim collapse only
        # Single fused QKV projection: (bp*S, F) @ (F, 3*hdk).
        qkv = jnp.dot(xf, wqkv, preferred_element_type=f32).reshape(bp, S, 3 * hdk)

        def heads_to_batch(off):
            # Per-head lane slices, stacked along the (major) batch axis.
            return jnp.concatenate(
                [qkv[:, :, off + h * d_k: off + (h + 1) * d_k]
                 for h in range(n_heads)], axis=0)        # (n_heads*bp, S, d_k)

        qh = heads_to_batch(0)
        kh = heads_to_batch(hdk)
        vh = heads_to_batch(2 * hdk)

        # One batched score + context einsum covering all heads and batches.
        s = jnp.einsum("bqd,bkd->bqk", qh, kh, preferred_element_type=f32) * scale
        s = s - jnp.max(s, axis=-1, keepdims=True)
        p = jnp.exp(s)
        p = p * pl.reciprocal(jnp.sum(p, axis=-1, keepdims=True), approx=False)
        ctx = jnp.einsum("bqk,bkd->bqd", p, vh, preferred_element_type=f32)

        # Heads back onto lanes (d_k + d_k -> hdk) and a single W_o matmul.
        ctx_full = jnp.concatenate(
            [ctx[h * bp:(h + 1) * bp] for h in range(n_heads)], axis=-1)   # (bp,S,hdk)
        out = jnp.dot(ctx_full.reshape(bp * S, hdk), wo,
                      preferred_element_type=f32)         # (bp*S, d_model)
        out3 = out.reshape(bp, S, d_model)                # leading-dim split only
        # Pack the sequence axis onto lanes -> (bp, S*d_model) (lane-dense).
        return jnp.concatenate([out3[:, si, :] for si in range(S)], axis=-1)

    # --- temporal attention (sequence = lag, features = nodes) --------------
    t_out_ref[...] = mha_packed(x_tn_ref[...], t_wqkv_ref[...], t_wo_ref[...])

    # --- spatial branch: Chebyshev GCN fused with node attention ------------
    # x_gc = relu( sum_k T_k(L~) @ X @ Theta_k ); never leaves VMEM.
    x_nt = x_nt_ref[...]                                            # (BV, N, T)
    z = jnp.dot(x_nt.reshape(BV * N, T), theta_cat_ref[...],
                preferred_element_type=f32).reshape(BV, N, K * T)   # Z_k lane blocks
    # Regroup the K lane blocks into row blocks: (BV, K*N, T).
    z_stack = jnp.concatenate(
        [z[:, :, kk * T:(kk + 1) * T] for kk in range(K)], axis=1)
    cheb_cat = cheb_cat_ref[...]                                    # (N, K*N)
    x_gc = jnp.stack(
        [jnp.dot(cheb_cat, z_stack[b], preferred_element_type=f32)
         for b in range(BV)], axis=0)                               # (BV, N, T)
    x_gc = jnp.maximum(x_gc, 0.0)
    s_out_ref[...] = mha_packed(x_gc, s_wqkv_ref[...], s_wo_ref[...])

    # --- variety attention (sequence = var_dim, features = lag*nodes) -------
    v_out_ref[...] = mha_packed(xv_ref[...], v_wqkv_ref[...], v_wo_ref[...])


# ----------------------------------------------------------------------------
# Encoder forward: one fused pallas_call (no grid) + tiny layout plumbing.
# ----------------------------------------------------------------------------
def encoder_forward(x, prep, *, d_k, n_heads, d_model):
    B, V, N, T = x.shape
    BV = B * V
    hdk = n_heads * d_k
    K = prep["theta_cat"].shape[1] // T

    # Encoder.forward: x = x.permute(0, 1, 3, 2) -> (B, V, T, N).
    x_perm = jnp.transpose(x, (0, 1, 3, 2))
    x_nt = x.reshape(BV, N, T)          # (nodes, lag) layout  (free bitcast reshape)
    x_tn = x_perm.reshape(BV, T, N)     # (lag, nodes) layout  (free bitcast reshape)
    xv = x_perm.reshape(B, V, T * N)    # variety view         (free bitcast reshape)

    kernel = functools.partial(_encoder_kernel, B=B, V=V, N=N, T=T, K=K,
                               n_heads=n_heads, d_k=d_k, d_model=d_model)

    in_arrays = (x_nt, x_tn, xv, prep["cheb_cat"], prep["theta_cat"],
                 prep["t_wqkv"], prep["t_wo"], prep["s_wqkv"], prep["s_wo"],
                 prep["v_wqkv"], prep["v_wo"])

    # Advisory cost hint for XLA's scheduler around the custom call.
    flops = (2 * BV * T * N * 3 * hdk            # temporal QKV
             + 2 * BV * N * T * 3 * hdk          # spatial QKV
             + 2 * B * V * (T * N) * 3 * hdk     # variety QKV
             + 2 * BV * N * T * (K * T)          # Theta contraction
             + 2 * BV * N * (K * N) * T)         # graph left-multiply
    for bp, S in ((BV, T), (BV, N), (B, V)):
        flops += 4 * n_heads * bp * S * S * d_k + 2 * bp * S * hdk * d_model
    transcendentals = n_heads * (BV * T * T + BV * N * N + B * V * V)
    out_elems = BV * T * d_model + BV * N * d_model + B * V * d_model
    bytes_accessed = 4 * (sum(int(a.size) for a in in_arrays) + out_elems)

    vmem_spec = pl.BlockSpec(memory_space=pltpu.MemorySpace.VMEM)
    t_flat, s_flat, v_flat = pl.pallas_call(
        kernel,
        out_shape=(
            jax.ShapeDtypeStruct((BV, T * d_model), jnp.float32),
            jax.ShapeDtypeStruct((BV, N * d_model), jnp.float32),
            jax.ShapeDtypeStruct((B, V * d_model), jnp.float32),
        ),
        in_specs=[vmem_spec] * len(in_arrays),
        out_specs=(vmem_spec, vmem_spec, vmem_spec),
        cost_estimate=pl.CostEstimate(flops=flops,
                                      transcendentals=transcendentals,
                                      bytes_accessed=bytes_accessed),
    )(*in_arrays)

    temporal_att = t_flat.reshape(B, V, T, d_model)
    spatial_att = s_flat.reshape(B, V, N, d_model)
    variety_att = v_flat.reshape(B, V, d_model)
    return temporal_att, spatial_att, variety_att


# ----------------------------------------------------------------------------
# Deterministic parameter / input construction + one-time weight prep.
# ----------------------------------------------------------------------------
def init_params(key, *, var_dim, num_nodes, lag, d_k, n_heads, d_model, K):
    hdk = n_heads * d_k

    def wgt(k, shape):
        return (0.1 * jax.random.normal(k, shape)).astype(jnp.float32)

    keys = jax.random.split(key, 13)
    return {
        "temporal": (wgt(keys[0], (num_nodes, hdk)), wgt(keys[1], (num_nodes, hdk)),
                     wgt(keys[2], (num_nodes, hdk)), wgt(keys[3], (hdk, d_model))),
        "spatial":  (wgt(keys[4], (lag, hdk)), wgt(keys[5], (lag, hdk)),
                     wgt(keys[6], (lag, hdk)), wgt(keys[7], (hdk, d_model))),
        "variety":  (wgt(keys[8], (lag * num_nodes, hdk)),
                     wgt(keys[9], (lag * num_nodes, hdk)),
                     wgt(keys[10], (lag * num_nodes, hdk)),
                     wgt(keys[11], (hdk, d_model))),
        "theta":    wgt(keys[12], (K, lag, lag)),
    }


def prepare_params(params, cheb_polynomials):
    """One-time param prep: QKV weight fusion + Theta / cheb lane concat.

    Hoisted out of encoder_forward so no per-call XLA ops run on constants.
    """
    def fuse(branch):
        wq, wk, wv, wo = branch
        return jnp.concatenate([wq, wk, wv], axis=1), wo   # (F, 3*hdk), (hdk, dm)

    t_wqkv, t_wo = fuse(params["temporal"])
    s_wqkv, s_wo = fuse(params["spatial"])
    v_wqkv, v_wo = fuse(params["variety"])
    theta = params["theta"]                                # (K, T, T)
    K, T, _ = theta.shape
    theta_cat = jnp.transpose(theta, (1, 0, 2)).reshape(T, K * T)       # [Th_0|..]
    N = cheb_polynomials.shape[-1]
    cheb_cat = jnp.transpose(cheb_polynomials, (1, 0, 2)).reshape(N, K * N)
    return {"t_wqkv": t_wqkv, "t_wo": t_wo,
            "s_wqkv": s_wqkv, "s_wo": s_wo,
            "v_wqkv": v_wqkv, "v_wo": v_wo,
            "theta_cat": theta_cat, "cheb_cat": cheb_cat}


def make_cheb_polynomials(num_nodes, K):
    # Ring-graph scaled Laplacian, Chebyshev recursion (lambda_max ~= 2).
    idx = jnp.arange(num_nodes)
    adj = (jnp.zeros((num_nodes, num_nodes))
           .at[idx, (idx + 1) % num_nodes].set(1.0)
           .at[idx, (idx - 1) % num_nodes].set(1.0))
    deg = jnp.sum(adj, axis=1)
    d_inv_sqrt = 1.0 / jnp.sqrt(deg)
    lap = jnp.eye(num_nodes) - (d_inv_sqrt[:, None] * adj) * d_inv_sqrt[None, :]
    l_tilde = lap - jnp.eye(num_nodes)  # 2L/lambda_max - I with lambda_max=2
    polys = [jnp.eye(num_nodes), l_tilde]
    for _ in range(2, K):
        polys.append(2.0 * l_tilde @ polys[-1] - polys[-2])
    return jnp.stack(polys[:K]).astype(jnp.float32)


if __name__ == "__main__":
    # Small shapes consistent with the module's constructor arguments.
    B, var_dim, num_nodes, lag = 2, 3, 16, 8
    hid_dim, d_k, d_model, n_heads = 32, 8, 16, 2   # hid_dim unused (see TODO)
    K_cheb = 3

    key = jax.random.PRNGKey(0)
    kx, kp = jax.random.split(key)
    x = jax.random.normal(kx, (B, var_dim, num_nodes, lag), dtype=jnp.float32)
    cheb_polynomials = make_cheb_polynomials(num_nodes, K_cheb)
    params = init_params(kp, var_dim=var_dim, num_nodes=num_nodes, lag=lag,
                         d_k=d_k, n_heads=n_heads, d_model=d_model, K=K_cheb)
    prep = prepare_params(params, cheb_polynomials)   # one-time, outside the jit

    fwd = jax.jit(functools.partial(encoder_forward, d_k=d_k,
                                    n_heads=n_heads, d_model=d_model))
    temporal_att, spatial_att, variety_att = fwd(x, prep)

    jax.block_until_ready((temporal_att, spatial_att, variety_att))
    assert temporal_att.shape == (B, var_dim, lag, d_model)
    assert spatial_att.shape == (B, var_dim, num_nodes, d_model)
    assert variety_att.shape == (B, var_dim, d_model)
    print("KERNEL_OK")
</pallas_src>

<mosaic_0001>
module attributes {stable_mosaic.version = 11 : i64} {
  func.func @_encoder_kernel(%arg0: memref<6x16x8xf32, #tpu.memory_space<vmem>>, %arg1: memref<6x8x16xf32, #tpu.memory_space<vmem>>, %arg2: memref<2x3x128xf32, #tpu.memory_space<vmem>>, %arg3: memref<16x48xf32, #tpu.memory_space<vmem>>, %arg4: memref<8x24xf32, #tpu.memory_space<vmem>>, %arg5: memref<16x48xf32, #tpu.memory_space<vmem>>, %arg6: memref<16x16xf32, #tpu.memory_space<vmem>>, %arg7: memref<8x48xf32, #tpu.memory_space<vmem>>, %arg8: memref<16x16xf32, #tpu.memory_space<vmem>>, %arg9: memref<128x48xf32, #tpu.memory_space<vmem>>, %arg10: memref<16x16xf32, #tpu.memory_space<vmem>>, %arg11: memref<6x128xf32, #tpu.memory_space<vmem>>, %arg12: memref<6x256xf32, #tpu.memory_space<vmem>>, %arg13: memref<2x48xf32, #tpu.memory_space<vmem>>) attributes {dimension_semantics = [], scalar_prefetch = 0 : i64, scratch_operands = 0 : i64, tpu.core_type = #tpu.core_type<tc>} {
    %c0 = arith.constant 0 : index
    %c0_0 = arith.constant 0 : index
    %c0_1 = arith.constant 0 : index
    %0 = vector.load %arg1[%c0, %c0_0, %c0_1] : memref<6x8x16xf32, #tpu.memory_space<vmem>>, vector<6x8x16xf32>
    %c0_2 = arith.constant 0 : index
    %c0_3 = arith.constant 0 : index
    %1 = vector.load %arg5[%c0_2, %c0_3] : memref<16x48xf32, #tpu.memory_space<vmem>>, vector<16x48xf32>
    %c0_4 = arith.constant 0 : index
    %c0_5 = arith.constant 0 : index
    %2 = vector.load %arg6[%c0_4, %c0_5] : memref<16x16xf32, #tpu.memory_space<vmem>>, vector<16x16xf32>
    %3 = vector.shape_cast %0 : vector<6x8x16xf32> to vector<48x16xf32>
    %cst = arith.constant dense<0.000000e+00> : vector<48x48xf32>
    %4 = tpu.matmul %3, %1, %cst {dimension_numbers = #tpu.dot_dimension_numbers<[1], [0], [0], [1], [0, 0, 1, 1], [], []>} : vector<48x16xf32>, vector<16x48xf32>, vector<48x48xf32> -> vector<48x48xf32>
    %5 = vector.shape_cast %4 : vector<48x48xf32> to vector<6x8x48xf32>
    %6 = vector.extract_strided_slice %5 {offsets = [0, 0, 0], sizes = [6, 8, 8], strides = [1, 1, 1]} : vector<6x8x48xf32> to vector<6x8x8xf32>
    %7 = vector.extract_strided_slice %5 {offsets = [0, 0, 8], sizes = [6, 8, 8], strides = [1, 1, 1]} : vector<6x8x48xf32> to vector<6x8x8xf32>
    %8 = tpu.concatenate %6, %7 in 0 : vector<6x8x8xf32>, vector<6x8x8xf32> -> vector<12x8x8xf32>
    %9 = vector.extract_strided_slice %5 {offsets = [0, 0, 16], sizes = [6, 8, 8], strides = [1, 1, 1]} : vector<6x8x48xf32> to vector<6x8x8xf32>
    %10 = vector.extract_strided_slice %5 {offsets = [0, 0, 24], sizes = [6, 8, 8], strides = [1, 1, 1]} : vector<6x8x48xf32> to vector<6x8x8xf32>
    %11 = tpu.concatenate %9, %10 in 0 : vector<6x8x8xf32>, vector<6x8x8xf32> -> vector<12x8x8xf32>
    %12 = vector.extract_strided_slice %5 {offsets = [0, 0, 32], sizes = [6, 8, 8], strides = [1, 1, 1]} : vector<6x8x48xf32> to vector<6x8x8xf32>
    %13 = vector.extract_strided_slice %5 {offsets = [0, 0, 40], sizes = [6, 8, 8], strides = [1, 1, 1]} : vector<6x8x48xf32> to vector<6x8x8xf32>
    %14 = tpu.concatenate %12, %13 in 0 : vector<6x8x8xf32>, vector<6x8x8xf32> -> vector<12x8x8xf32>
    "tpu.trace_start"() <{level = 10 : i32, message = "bqd,bkd->bqk"}> : () -> ()
    %cst_6 = arith.constant dense<0.000000e+00> : vector<12x8x8xf32>
    %15 = tpu.matmul %8, %11, %cst_6 {dimension_numbers = #tpu.dot_dimension_numbers<[2], [2], [1], [1], [0, 0, 0, 1, 1, 1], [0], [0]>} : vector<12x8x8xf32>, vector<12x8x8xf32>, vector<12x8x8xf32> -> vector<12x8x8xf32>
    "tpu.trace_stop"() : () -> ()
    %cst_7 = arith.constant 0.353553385 : f32
    %16 = vector.broadcast %cst_7 : f32 to vector<12x8x8xf32>
    %17 = arith.mulf %15, %16 : vector<12x8x8xf32>
    %cst_8 = arith.constant dense<0xFF800000> : vector<12x8xf32>
    %18 = vector.multi_reduction <maximumf>, %17, %cst_8 [2] : vector<12x8x8xf32> to vector<12x8xf32>
    %19 = vector.shape_cast %18 : vector<12x8xf32> to vector<12x8x1xf32>
    %20 = vector.broadcast %19 : vector<12x8x1xf32> to vector<12x8x8xf32>
    %21 = arith.subf %17, %20 : vector<12x8x8xf32>
    %22 = math.exp %21 : vector<12x8x8xf32>
    %cst_9 = arith.constant dense<0.000000e+00> : vector<12x8xf32>
    %23 = vector.multi_reduction <add>, %22, %cst_9 [2] : vector<12x8x8xf32> to vector<12x8xf32>
    %24 = vector.shape_cast %23 : vector<12x8xf32> to vector<12x8x1xf32>
    %25 = tpu.reciprocal %24 : vector<12x8x1xf32> -> vector<12x8x1xf32>
    %26 = vector.broadcast %25 : vector<12x8x1xf32> to vector<12x8x8xf32>
    %27 = arith.mulf %22, %26 : vector<12x8x8xf32>
    "tpu.trace_start"() <{level = 10 : i32, message = "bqk,bkd->bqd"}> : () -> ()
    %cst_10 = arith.constant dense<0.000000e+00> : vector<12x8x8xf32>
    %28 = tpu.matmul %27, %14, %cst_10 {dimension_numbers = #tpu.dot_dimension_numbers<[2], [1], [1], [2], [0, 0, 0, 1, 1, 2], [0], [0]>} : vector<12x8x8xf32>, vector<12x8x8xf32>, vector<12x8x8xf32> -> vector<12x8x8xf32>
    "tpu.trace_stop"() : () -> ()
    %29 = vector.extract_strided_slice %28 {offsets = [0, 0, 0], sizes = [6, 8, 8], strides = [1, 1, 1]} : vector<12x8x8xf32> to vector<6x8x8xf32>
    %30 = vector.extract_strided_slice %28 {offsets = [6, 0, 0], sizes = [6, 8, 8], strides = [1, 1, 1]} : vector<12x8x8xf32> to vector<6x8x8xf32>
    %31 = tpu.concatenate %29, %30 in 2 : vector<6x8x8xf32>, vector<6x8x8xf32> -> vector<6x8x16xf32>
    %32 = vector.shape_cast %31 : vector<6x8x16xf32> to vector<48x16xf32>
    %cst_11 = arith.constant dense<0.000000e+00> : vector<48x16xf32>
    %33 = tpu.matmul %32, %2, %cst_11 {dimension_numbers = #tpu.dot_dimension_numbers<[1], [0], [0], [1], [0, 0, 1, 1], [], []>} : vector<48x16xf32>, vector<16x16xf32>, vector<48x16xf32> -> vector<48x16xf32>
    %34 = vector.shape_cast %33 : vector<48x16xf32> to vector<6x8x16xf32>
    %35 = vector.extract_strided_slice %34 {offsets = [0, 0, 0], sizes = [6, 1, 16], strides = [1, 1, 1]} : vector<6x8x16xf32> to vector<6x1x16xf32>
    %36 = vector.shape_cast %35 : vector<6x1x16xf32> to vector<6x16xf32>
    %37 = vector.extract_strided_slice %34 {offsets = [0, 1, 0], sizes = [6, 1, 16], strides = [1, 1, 1]} : vector<6x8x16xf32> to vector<6x1x16xf32>
    %38 = vector.shape_cast %37 : vector<6x1x16xf32> to vector<6x16xf32>
    %39 = vector.extract_strided_slice %34 {offsets = [0, 2, 0], sizes = [6, 1, 16], strides = [1, 1, 1]} : vector<6x8x16xf32> to vector<6x1x16xf32>
    %40 = vector.shape_cast %39 : vector<6x1x16xf32> to vector<6x16xf32>
    %41 = vector.extract_strided_slice %34 {offsets = [0, 3, 0], sizes = [6, 1, 16], strides = [1, 1, 1]} : vector<6x8x16xf32> to vector<6x1x16xf32>
    %42 = vector.shape_cast %41 : vector<6x1x16xf32> to vector<6x16xf32>
    %43 = vector.extract_strided_slice %34 {offsets = [0, 4, 0], sizes = [6, 1, 16], strides = [1, 1, 1]} : vector<6x8x16xf32> to vector<6x1x16xf32>
    %44 = vector.shape_cast %43 : vector<6x1x16xf32> to vector<6x16xf32>
    %45 = vector.extract_strided_slice %34 {offsets = [0, 5, 0], sizes = [6, 1, 16], strides = [1, 1, 1]} : vector<6x8x16xf32> to vector<6x1x16xf32>
    %46 = vector.shape_cast %45 : vector<6x1x16xf32> to vector<6x16xf32>
    %47 = vector.extract_strided_slice %34 {offsets = [0, 6, 0], sizes = [6, 1, 16], strides = [1, 1, 1]} : vector<6x8x16xf32> to vector<6x1x16xf32>
    %48 = vector.shape_cast %47 : vector<6x1x16xf32> to vector<6x16xf32>
    %49 = vector.extract_strided_slice %34 {offsets = [0, 7, 0], sizes = [6, 1, 16], strides = [1, 1, 1]} : vector<6x8x16xf32> to vector<6x1x16xf32>
    %50 = vector.shape_cast %49 : vector<6x1x16xf32> to vector<6x16xf32>
    %51 = tpu.concatenate %36, %38, %40, %42, %44, %46, %48, %50 in 1 : vector<6x16xf32>, vector<6x16xf32>, vector<6x16xf32>, vector<6x16xf32>, vector<6x16xf32>, vector<6x16xf32>, vector<6x16xf32>, vector<6x16xf32> -> vector<6x128xf32>
    %c0_12 = arith.constant 0 : index
    %c0_13 = arith.constant 0 : index
    %52 = vector.load %arg11[%c0_12, %c0_13] : memref<6x128xf32, #tpu.memory_space<vmem>>, vector<6x128xf32>
    tpu.vector_store %arg11[%c0_12, %c0_13], %51 {strides = array<i32>} : memref<6x128xf32, #tpu.memory_space<vmem>>, vector<6x128xf32>,
    %c0_14 = arith.constant 0 : index
    %c0_15 = arith.constant 0 : index
    %c0_16 = arith.constant 0 : index
    %53 = vector.load %arg0[%c0_14, %c0_15, %c0_16] : memref<6x16x8xf32, #tpu.memory_space<vmem>>, vector<6x16x8xf32>
    %54 = vector.shape_cast %53 : vector<6x16x8xf32> to vector<96x8xf32>
    %c0_17 = arith.constant 0 : index
    %c0_18 = arith.constant 0 : index
    %55 = vector.load %arg4[%c0_17, %c0_18] : memref<8x24xf32, #tpu.memory_space<vmem>>, vector<8x24xf32>
    %cst_19 = arith.constant dense<0.000000e+00> : vector<96x24xf32>
    %56 = tpu.matmul %54, %55, %cst_19 {dimension_numbers = #tpu.dot_dimension_numbers<[1], [0], [0], [1], [0, 0, 1, 1], [], []>} : vector<96x8xf32>, vector<8x24xf32>, vector<96x24xf32> -> vector<96x24xf32>
    %57 = vector.shape_cast %56 : vector<96x24xf32> to vector<6x16x24xf32>
    %58 = vector.extract_strided_slice %57 {offsets = [0, 0, 0], sizes = [6, 16, 8], strides = [1, 1, 1]} : vector<6x16x24xf32> to vector<6x16x8xf32>
    %59 = vector.extract_strided_slice %57 {offsets = [0, 0, 8], sizes = [6, 16, 8], strides = [1, 1, 1]} : vector<6x16x24xf32> to vector<6x16x8xf32>
    %60 = vector.extract_strided_slice %57 {offsets = [0, 0, 16], sizes = [6, 16, 8], strides = [1, 1, 1]} : vector<6x16x24xf32> to vector<6x16x8xf32>
    %61 = tpu.concatenate %58, %59, %60 in 1 : vector<6x16x8xf32>, vector<6x16x8xf32>, vector<6x16x8xf32> -> vector<6x48x8xf32>
    %c0_20 = arith.constant 0 : index
    %c0_21 = arith.constant 0 : index
    %62 = vector.load %arg3[%c0_20, %c0_21] : memref<16x48xf32, #tpu.memory_space<vmem>>, vector<16x48xf32>
    %63 = vector.extract_strided_slice %61 {offsets = [0, 0, 0], sizes = [1, 48, 8], strides = [1, 1, 1]} : vector<6x48x8xf32> to vector<1x48x8xf32>
    %64 = vector.shape_cast %63 : vector<1x48x8xf32> to vector<48x8xf32>
    %cst_22 = arith.constant dense<0.000000e+00> : vector<16x8xf32>
    %65 = tpu.matmul %62, %64, %cst_22 {dimension_numbers = #tpu.dot_dimension_numbers<[1], [0], [0], [1], [0, 0, 1, 1], [], []>} : vector<16x48xf32>, vector<48x8xf32>, vector<16x8xf32> -> vector<16x8xf32>
    %66 = vector.extract_strided_slice %61 {offsets = [1, 0, 0], sizes = [1, 48, 8], strides = [1, 1, 1]} : vector<6x48x8xf32> to vector<1x48x8xf32>
    %67 = vector.shape_cast %66 : vector<1x48x8xf32> to vector<48x8xf32>
    %cst_23 = arith.constant dense<0.000000e+00> : vector<16x8xf32>
    %68 = tpu.matmul %62, %67, %cst_23 {dimension_numbers = #tpu.dot_dimension_numbers<[1], [0], [0], [1], [0, 0, 1, 1], [], []>} : vector<16x48xf32>, vector<48x8xf32>, vector<16x8xf32> -> vector<16x8xf32>
    %69 = vector.extract_strided_slice %61 {offsets = [2, 0, 0], sizes = [1, 48, 8], strides = [1, 1, 1]} : vector<6x48x8xf32> to vector<1x48x8xf32>
    %70 = vector.shape_cast %69 : vector<1x48x8xf32> to vector<48x8xf32>
    %cst_24 = arith.constant dense<0.000000e+00> : vector<16x8xf32>
    %71 = tpu.matmul %62, %70, %cst_24 {dimension_numbers = #tpu.dot_dimension_numbers<[1], [0], [0], [1], [0, 0, 1, 1], [], []>} : vector<16x48xf32>, vector<48x8xf32>, vector<16x8xf32> -> vector<16x8xf32>
    %72 = vector.extract_strided_slice %61 {offsets = [3, 0, 0], sizes = [1, 48, 8], strides = [1, 1, 1]} : vector<6x48x8xf32> to vector<1x48x8xf32>
    %73 = vector.shape_cast %72 : vector<1x48x8xf32> to vector<48x8xf32>
    %cst_25 = arith.constant dense<0.000000e+00> : vector<16x8xf32>
    %74 = tpu.matmul %62, %73, %cst_25 {dimension_numbers = #tpu.dot_dimension_numbers<[1], [0], [0], [1], [0, 0, 1, 1], [], []>} : vector<16x48xf32>, vector<48x8xf32>, vector<16x8xf32> -> vector<16x8xf32>
    %75 = vector.extract_strided_slice %61 {offsets = [4, 0, 0], sizes = [1, 48, 8], strides = [1, 1, 1]} : vector<6x48x8xf32> to vector<1x48x8xf32>
    %76 = vector.shape_cast %75 : vector<1x48x8xf32> to vector<48x8xf32>
    %cst_26 = arith.constant dense<0.000000e+00> : vector<16x8xf32>
    %77 = tpu.matmul %62, %76, %cst_26 {dimension_numbers = #tpu.dot_dimension_numbers<[1], [0], [0], [1], [0, 0, 1, 1], [], []>} : vector<16x48xf32>, vector<48x8xf32>, vector<16x8xf32> -> vector<16x8xf32>
    %78 = vector.extract_strided_slice %61 {offsets = [5, 0, 0], sizes = [1, 48, 8], strides = [1, 1, 1]} : vector<6x48x8xf32> to vector<1x48x8xf32>
    %79 = vector.shape_cast %78 : vector<1x48x8xf32> to vector<48x8xf32>
    %cst_27 = arith.constant dense<0.000000e+00> : vector<16x8xf32>
    %80 = tpu.matmul %62, %79, %cst_27 {dimension_numbers = #tpu.dot_dimension_numbers<[1], [0], [0], [1], [0, 0, 1, 1], [], []>} : vector<16x48xf32>, vector<48x8xf32>, vector<16x8xf32> -> vector<16x8xf32>
    %81 = vector.shape_cast %65 : vector<16x8xf32> to vector<1x16x8xf32>
    %82 = vector.shape_cast %68 : vector<16x8xf32> to vector<1x16x8xf32>
    %83 = vector.shape_cast %71 : vector<16x8xf32> to vector<1x16x8xf32>
    %84 = vector.shape_cast %74 : vector<16x8xf32> to vector<1x16x8xf32>
    %85 = vector.shape_cast %77 : vector<16x8xf32> to vector<1x16x8xf32>
    %86 = vector.shape_cast %80 : vector<16x8xf32> to vector<1x16x8xf32>
    %87 = tpu.concatenate %81, %82, %83, %84, %85, %86 in 0 : vector<1x16x8xf32>, vector<1x16x8xf32>, vector<1x16x8xf32>, vector<1x16x8xf32>, vector<1x16x8xf32>, vector<1x16x8xf32> -> vector<6x16x8xf32>
    %cst_28 = arith.constant 0.000000e+00 : f32
    %88 = vector.broadcast %cst_28 : f32 to vector<6x16x8xf32>
    %89 = arith.maximumf %87, %88 : vector<6x16x8xf32>
    %c0_29 = arith.constant 0 : index
    %c0_30 = arith.constant 0 : index
    %90 = vector.load %arg7[%c0_29, %c0_30] : memref<8x48xf32, #tpu.memory_space<vmem>>, vector<8x48xf32>
    %c0_31 = arith.constant 0 : index
    %c0_32 = arith.constant 0 : index
    %91 = vector.load %arg8[%c0_31, %c0_32] : memref<16x16xf32, #tpu.memory_space<vmem>>, vector<16x16xf32>
    %92 = vector.shape_cast %89 : vector<6x16x8xf32> to vector<96x8xf32>
    %cst_33 = arith.constant dense<0.000000e+00> : vector<96x48xf32>
    %93 = tpu.matmul %92, %90, %cst_33 {dimension_numbers = #tpu.dot_dimension_numbers<[1], [0], [0], [1], [0, 0, 1, 1], [], []>} : vector<96x8xf32>, vector<8x48xf32>, vector<96x48xf32> -> vector<96x48xf32>
    %94 = vector.shape_cast %93 : vector<96x48xf32> to vector<6x16x48xf32>
    %95 = vector.extract_strided_slice %94 {offsets = [0, 0, 0], sizes = [6, 16, 8], strides = [1, 1, 1]} : vector<6x16x48xf32> to vector<6x16x8xf32>
    %96 = vector.extract_strided_slice %94 {offsets = [0, 0, 8], sizes = [6, 16, 8], strides = [1, 1, 1]} : vector<6x16x48xf32> to vector<6x16x8xf32>
    %97 = tpu.concatenate %95, %96 in 0 : vector<6x16x8xf32>, vector<6x16x8xf32> -> vector<12x16x8xf32>
    %98 = vector.extract_strided_slice %94 {offsets = [0, 0, 16], sizes = [6, 16, 8], strides = [1, 1, 1]} : vector<6x16x48xf32> to vector<6x16x8xf32>
    %99 = vector.extract_strided_slice %94 {offsets = [0, 0, 24], sizes = [6, 16, 8], strides = [1, 1, 1]} : vector<6x16x48xf32> to vector<6x16x8xf32>
    %100 = tpu.concatenate %98, %99 in 0 : vector<6x16x8xf32>, vector<6x16x8xf32> -> vector<12x16x8xf32>
    %101 = vector.extract_strided_slice %94 {offsets = [0, 0, 32], sizes = [6, 16, 8], strides = [1, 1, 1]} : vector<6x16x48xf32> to vector<6x16x8xf32>
    %102 = vector.extract_strided_slice %94 {offsets = [0, 0, 40], sizes = [6, 16, 8], strides = [1, 1, 1]} : vector<6x16x48xf32> to vector<6x16x8xf32>
    %103 = tpu.concatenate %101, %102 in 0 : vector<6x16x8xf32>, vector<6x16x8xf32> -> vector<12x16x8xf32>
    "tpu.trace_start"() <{level = 10 : i32, message = "bqd,bkd->bqk"}> : () -> ()
    %cst_34 = arith.constant dense<0.000000e+00> : vector<12x16x16xf32>
    %104 = tpu.matmul %97, %100, %cst_34 {dimension_numbers = #tpu.dot_dimension_numbers<[2], [2], [1], [1], [0, 0, 0, 1, 1, 1], [0], [0]>} : vector<12x16x8xf32>, vector<12x16x8xf32>, vector<12x16x16xf32> -> vector<12x16x16xf32>
    "tpu.trace_stop"() : () -> ()
    %cst_35 = arith.constant 0.353553385 : f32
    %105 = vector.broadcast %cst_35 : f32 to vector<12x16x16xf32>
    %106 = arith.mulf %104, %105 : vector<12x16x16xf32>
    %cst_36 = arith.constant dense<0xFF800000> : vector<12x16xf32>
    %107 = vector.multi_reduction <maximumf>, %106, %cst_36 [2] : vector<12x16x16xf32> to vector<12x16xf32>
    %108 = vector.shape_cast %107 : vector<12x16xf32> to vector<12x16x1xf32>
    %109 = vector.broadcast %108 : vector<12x16x1xf32> to vector<12x16x16xf32>
    %110 = arith.subf %106, %109 : vector<12x16x16xf32>
    %111 = math.exp %110 : vector<12x16x16xf32>
    %cst_37 = arith.constant dense<0.000000e+00> : vector<12x16xf32>
    %112 = vector.multi_reduction <add>, %111, %cst_37 [2] : vector<12x16x16xf32> to vector<12x16xf32>
    %113 = vector.shape_cast %112 : vector<12x16xf32> to vector<12x16x1xf32>
    %114 = tpu.reciprocal %113 : vector<12x16x1xf32> -> vector<12x16x1xf32>
    %115 = vector.broadcast %114 : vector<12x16x1xf32> to vector<12x16x16xf32>
    %116 = arith.mulf %111, %115 : vector<12x16x16xf32>
    "tpu.trace_start"() <{level = 10 : i32, message = "bqk,bkd->bqd"}> : () -> ()
    %cst_38 = arith.constant dense<0.000000e+00> : vector<12x16x8xf32>
    %117 = tpu.matmul %116, %103, %cst_38 {dimension_numbers = #tpu.dot_dimension_numbers<[2], [1], [1], [2], [0, 0, 0, 1, 1, 2], [0], [0]>} : vector<12x16x16xf32>, vector<12x16x8xf32>, vector<12x16x8xf32> -> vector<12x16x8xf32>
    "tpu.trace_stop"() : () -> ()
    %118 = vector.extract_strided_slice %117 {offsets = [0, 0, 0], sizes = [6, 16, 8], strides = [1, 1, 1]} : vector<12x16x8xf32> to vector<6x16x8xf32>
    %119 = vector.extract_strided_slice %117 {offsets = [6, 0, 0], sizes = [6, 16, 8], strides = [1, 1, 1]} : vector<12x16x8xf32> to vector<6x16x8xf32>
    %120 = tpu.concatenate %118, %119 in 2 : vector<6x16x8xf32>, vector<6x16x8xf32> -> vector<6x16x16xf32>
    %121 = vector.shape_cast %120 : vector<6x16x16xf32> to vector<96x16xf32>
    %cst_39 = arith.constant dense<0.000000e+00> : vector<96x16xf32>
    %122 = tpu.matmul %121, %91, %cst_39 {dimension_numbers = #tpu.dot_dimension_numbers<[1], [0], [0], [1], [0, 0, 1, 1], [], []>} : vector<96x16xf32>, vector<16x16xf32>, vector<96x16xf32> -> vector<96x16xf32>
    %123 = vector.shape_cast %122 : vector<96x16xf32> to vector<6x16x16xf32>
    %124 = vector.extract_strided_slice %123 {offsets = [0, 0, 0], sizes = [6, 1, 16], strides = [1, 1, 1]} : vector<6x16x16xf32> to vector<6x1x16xf32>
    %125 = vector.shape_cast %124 : vector<6x1x16xf32> to vector<6x16xf32>
    %126 = vector.extract_strided_slice %123 {offsets = [0, 1, 0], sizes = [6, 1, 16], strides = [1, 1, 1]} : vector<6x16x16xf32> to vector<6x1x16xf32>
    %127 = vector.shape_cast %126 : vector<6x1x16xf32> to vector<6x16xf32>
    %128 = vector.extract_strided_slice %123 {offsets = [0, 2, 0], sizes = [6, 1, 16], strides = [1, 1, 1]} : vector<6x16x16xf32> to vector<6x1x16xf32>
    %129 = vector.shape_cast %128 : vector<6x1x16xf32> to vector<6x16xf32>
    %130 = vector.extract_strided_slice %123 {offsets = [0, 3, 0], sizes = [6, 1, 16], strides = [1, 1, 1]} : vector<6x16x16xf32> to vector<6x1x16xf32>
    %131 = vector.shape_cast %130 : vector<6x1x16xf32> to vector<6x16xf32>
    %132 = vector.extract_strided_slice %123 {offsets = [0, 4, 0], sizes = [6, 1, 16], strides = [1, 1, 1]} : vector<6x16x16xf32> to vector<6x1x16xf32>
    %133 = vector.shape_cast %132 : vector<6x1x16xf32> to vector<6x16xf32>
    %134 = vector.extract_strided_slice %123 {offsets = [0, 5, 0], sizes = [6, 1, 16], strides = [1, 1, 1]} : vector<6x16x16xf32> to vector<6x1x16xf32>
    %135 = vector.shape_cast %134 : vector<6x1x16xf32> to vector<6x16xf32>
    %136 = vector.extract_strided_slice %123 {offsets = [0, 6, 0], sizes = [6, 1, 16], strides = [1, 1, 1]} : vector<6x16x16xf32> to vector<6x1x16xf32>
    %137 = vector.shape_cast %136 : vector<6x1x16xf32> to vector<6x16xf32>
    %138 = vector.extract_strided_slice %123 {offsets = [0, 7, 0], sizes = [6, 1, 16], strides = [1, 1, 1]} : vector<6x16x16xf32> to vector<6x1x16xf32>
    %139 = vector.shape_cast %138 : vector<6x1x16xf32> to vector<6x16xf32>
    %140 = vector.extract_strided_slice %123 {offsets = [0, 8, 0], sizes = [6, 1, 16], strides = [1, 1, 1]} : vector<6x16x16xf32> to vector<6x1x16xf32>
    %141 = vector.shape_cast %140 : vector<6x1x16xf32> to vector<6x16xf32>
    %142 = vector.extract_strided_slice %123 {offsets = [0, 9, 0], sizes = [6, 1, 16], strides = [1, 1, 1]} : vector<6x16x16xf32> to vector<6x1x16xf32>
    %143 = vector.shape_cast %142 : vector<6x1x16xf32> to vector<6x16xf32>
    %144 = vector.extract_strided_slice %123 {offsets = [0, 10, 0], sizes = [6, 1, 16], strides = [1, 1, 1]} : vector<6x16x16xf32> to vector<6x1x16xf32>
    %145 = vector.shape_cast %144 : vector<6x1x16xf32> to vector<6x16xf32>
    %146 = vector.extract_strided_slice %123 {offsets = [0, 11, 0], sizes = [6, 1, 16], strides = [1, 1, 1]} : vector<6x16x16xf32> to vector<6x1x16xf32>
    %147 = vector.shape_cast %146 : vector<6x1x16xf32> to vector<6x16xf32>
    %148 = vector.extract_strided_slice %123 {offsets = [0, 12, 0], sizes = [6, 1, 16], strides = [1, 1, 1]} : vector<6x16x16xf32> to vector<6x1x16xf32>
    %149 = vector.shape_cast %148 : vector<6x1x16xf32> to vector<6x16xf32>
    %150 = vector.extract_strided_slice %123 {offsets = [0, 13, 0], sizes = [6, 1, 16], strides = [1, 1, 1]} : vector<6x16x16xf32> to vector<6x1x16xf32>
    %151 = vector.shape_cast %150 : vector<6x1x16xf32> to vector<6x16xf32>
    %152 = vector.extract_strided_slice %123 {offsets = [0, 14, 0], sizes = [6, 1, 16], strides = [1, 1, 1]} : vector<6x16x16xf32> to vector<6x1x16xf32>
    %153 = vector.shape_cast %152 : vector<6x1x16xf32> to vector<6x16xf32>
    %154 = vector.extract_strided_slice %123 {offsets = [0, 15, 0], sizes = [6, 1, 16], strides = [1, 1, 1]} : vector<6x16x16xf32> to vector<6x1x16xf32>
    %155 = vector.shape_cast %154 : vector<6x1x16xf32> to vector<6x16xf32>
    %156 = tpu.concatenate %125, %127, %129, %131, %133, %135, %137, %139, %141, %143, %145, %147, %149, %151, %153, %155 in 1 : vector<6x16xf32>, vector<6x16xf32>, vector<6x16xf32>, vector<6x16xf32>, vector<6x16xf32>, vector<6x16xf32>, vector<6x16xf32>, vector<6x16xf32>, vector<6x16xf32>, vector<6x16xf32>, vector<6x16xf32>, vector<6x16xf32>, vector<6x16xf32>, vector<6x16xf32>, vector<6x16xf32>, vector<6x16xf32> -> vector<6x256xf32>
    %c0_40 = arith.constant 0 : index
    %c0_41 = arith.constant 0 : index
    %157 = vector.load %arg12[%c0_40, %c0_41] : memref<6x256xf32, #tpu.memory_space<vmem>>, vector<6x256xf32>
    tpu.vector_store %arg12[%c0_40, %c0_41], %156 {strides = array<i32>} : memref<6x256xf32, #tpu.memory_space<vmem>>, vector<6x256xf32>,
    %c0_42 = arith.constant 0 : index
    %c0_43 = arith.constant 0 : index
    %c0_44 = arith.constant 0 : index
    %158 = vector.load %arg2[%c0_42, %c0_43, %c0_44] : memref<2x3x128xf32, #tpu.memory_space<vmem>>, vector<2x3x128xf32>
    %c0_45 = arith.constant 0 : index
    %c0_46 = arith.constant 0 : index
    %159 = vector.load %arg9[%c0_45, %c0_46] : memref<128x48xf32, #tpu.memory_space<vmem>>, vector<128x48xf32>
    %c0_47 = arith.constant 0 : index
    %c0_48 = arith.constant 0 : index
    %160 = vector.load %arg10[%c0_47, %c0_48] : memref<16x16xf32, #tpu.memory_space<vmem>>, vector<16x16xf32>
    %161 = vector.shape_cast %158 : vector<2x3x128xf32> to vector<6x128xf32>
    %cst_49 = arith.constant dense<0.000000e+00> : vector<6x48xf32>
    %162 = tpu.matmul %161, %159, %cst_49 {dimension_numbers = #tpu.dot_dimension_numbers<[1], [0], [0], [1], [0, 0, 1, 1], [], []>} : vector<6x128xf32>, vector<128x48xf32>, vector<6x48xf32> -> vector<6x48xf32>
    %163 = vector.shape_cast %162 : vector<6x48xf32> to vector<2x3x48xf32>
    %164 = vector.extract_strided_slice %163 {offsets = [0, 0, 0], sizes = [2, 3, 8], strides = [1, 1, 1]} : vector<2x3x48xf32> to vector<2x3x8xf32>
    %165 = vector.extract_strided_slice %163 {offsets = [0, 0, 8], sizes = [2, 3, 8], strides = [1, 1, 1]} : vector<2x3x48xf32> to vector<2x3x8xf32>
    %166 = tpu.concatenate %164, %165 in 0 : vector<2x3x8xf32>, vector<2x3x8xf32> -> vector<4x3x8xf32>
    %167 = vector.extract_strided_slice %163 {offsets = [0, 0, 16], sizes = [2, 3, 8], strides = [1, 1, 1]} : vector<2x3x48xf32> to vector<2x3x8xf32>
    %168 = vector.extract_strided_slice %163 {offsets = [0, 0, 24], sizes = [2, 3, 8], strides = [1, 1, 1]} : vector<2x3x48xf32> to vector<2x3x8xf32>
    %169 = tpu.concatenate %167, %168 in 0 : vector<2x3x8xf32>, vector<2x3x8xf32> -> vector<4x3x8xf32>
    %170 = vector.extract_strided_slice %163 {offsets = [0, 0, 32], sizes = [2, 3, 8], strides = [1, 1, 1]} : vector<2x3x48xf32> to vector<2x3x8xf32>
    %171 = vector.extract_strided_slice %163 {offsets = [0, 0, 40], sizes = [2, 3, 8], strides = [1, 1, 1]} : vector<2x3x48xf32> to vector<2x3x8xf32>
    %172 = tpu.concatenate %170, %171 in 0 : vector<2x3x8xf32>, vector<2x3x8xf32> -> vector<4x3x8xf32>
    "tpu.trace_start"() <{level = 10 : i32, message = "bqd,bkd->bqk"}> : () -> ()
    %cst_50 = arith.constant dense<0.000000e+00> : vector<4x3x3xf32>
    %173 = tpu.matmul %166, %169, %cst_50 {dimension_numbers = #tpu.dot_dimension_numbers<[2], [2], [1], [1], [0, 0, 0, 1, 1, 1], [0], [0]>} : vector<4x3x8xf32>, vector<4x3x8xf32>, vector<4x3x3xf32> -> vector<4x3x3xf32>
    "tpu.trace_stop"() : () -> ()
    %cst_51 = arith.constant 0.353553385 : f32
    %174 = vector.broadcast %cst_51 : f32 to vector<4x3x3xf32>
    %175 = arith.mulf %173, %174 : vector<4x3x3xf32>
    %cst_52 = arith.constant dense<0xFF800000> : vector<4x3xf32>
    %176 = vector.multi_reduction <maximumf>, %175, %cst_52 [2] : vector<4x3x3xf32> to vector<4x3xf32>
    %177 = vector.shape_cast %176 : vector<4x3xf32> to vector<4x3x1xf32>
    %178 = vector.broadcast %177 : vector<4x3x1xf32> to vector<4x3x3xf32>
    %179 = arith.subf %175, %178 : vector<4x3x3xf32>
    %180 = math.exp %179 : vector<4x3x3xf32>
    %cst_53 = arith.constant dense<0.000000e+00> : vector<4x3xf32>
    %181 = vector.multi_reduction <add>, %180, %cst_53 [2] : vector<4x3x3xf32> to vector<4x3xf32>
    %182 = vector.shape_cast %181 : vector<4x3xf32> to vector<4x3x1xf32>
    %183 = tpu.reciprocal %182 : vector<4x3x1xf32> -> vector<4x3x1xf32>
    %184 = vector.broadcast %183 : vector<4x3x1xf32> to vector<4x3x3xf32>
    %185 = arith.mulf %180, %184 : vector<4x3x3xf32>
    "tpu.trace_start"() <{level = 10 : i32, message = "bqk,bkd->bqd"}> : () -> ()
    %cst_54 = arith.constant dense<0.000000e+00> : vector<4x3x8xf32>
    %186 = tpu.matmul %185, %172, %cst_54 {dimension_numbers = #tpu.dot_dimension_numbers<[2], [1], [1], [2], [0, 0, 0, 1, 1, 2], [0], [0]>} : vector<4x3x3xf32>, vector<4x3x8xf32>, vector<4x3x8xf32> -> vector<4x3x8xf32>
    "tpu.trace_stop"() : () -> ()
    %187 = vector.extract_strided_slice %186 {offsets = [0, 0, 0], sizes = [2, 3, 8], strides = [1, 1, 1]} : vector<4x3x8xf32> to vector<2x3x8xf32>
    %188 = vector.extract_strided_slice %186 {offsets = [2, 0, 0], sizes = [2, 3, 8], strides = [1, 1, 1]} : vector<4x3x8xf32> to vector<2x3x8xf32>
    %189 = tpu.concatenate %187, %188 in 2 : vector<2x3x8xf32>, vector<2x3x8xf32> -> vector<2x3x16xf32>
    %190 = vector.shape_cast %189 : vector<2x3x16xf32> to vector<6x16xf32>
    %cst_55 = arith.constant dense<0.000000e+00> : vector<6x16xf32>
    %191 = tpu.matmul %190, %160, %cst_55 {dimension_numbers = #tpu.dot_dimension_numbers<[1], [0], [0], [1], [0, 0, 1, 1], [], []>} : vector<6x16xf32>, vector<16x16xf32>, vector<6x16xf32> -> vector<6x16xf32>
    %192 = vector.shape_cast %191 : vector<6x16xf32> to vector<2x3x16xf32>
    %193 = vector.extract_strided_slice %192 {offsets = [0, 0, 0], sizes = [2, 1, 16], strides = [1, 1, 1]} : vector<2x3x16xf32> to vector<2x1x16xf32>
    %194 = vector.shape_cast %193 : vector<2x1x16xf32> to vector<2x16xf32>
    %195 = vector.extract_strided_slice %192 {offsets = [0, 1, 0], sizes = [2, 1, 16], strides = [1, 1, 1]} : vector<2x3x16xf32> to vector<2x1x16xf32>
    %196 = vector.shape_cast %195 : vector<2x1x16xf32> to vector<2x16xf32>
    %197 = vector.extract_strided_slice %192 {offsets = [0, 2, 0], sizes = [2, 1, 16], strides = [1, 1, 1]} : vector<2x3x16xf32> to vector<2x1x16xf32>
    %198 = vector.shape_cast %197 : vector<2x1x16xf32> to vector<2x16xf32>
    %199 = tpu.concatenate %194, %196, %198 in 1 : vector<2x16xf32>, vector<2x16xf32>, vector<2x16xf32> -> vector<2x48xf32>
    %c0_56 = arith.constant 0 : index
    %c0_57 = arith.constant 0 : index
    %200 = vector.load %arg13[%c0_56, %c0_57] : memref<2x48xf32, #tpu.memory_space<vmem>>, vector<2x48xf32>
    tpu.vector_store %arg13[%c0_56, %c0_57], %199 {strides = array<i32>} : memref<2x48xf32, #tpu.memory_space<vmem>>, vector<2x48xf32>,
    return
  }
}

</mosaic_0001>

<bundles_post_ra>
// kernel: encoder_forward.1
= control target key start
LH: loop header
LB: loop body
LE: loop exit
PB: predicated region body
PF: predicated region fallthrough
CT: control target
= control target key end

     0   :  { %vm51_vm0 = vcmask 130048   ;;  %v9068_v9 = vmov 0.0   ;;  %s9069_s23 = smov 120   ;;  %vm9070_vm1 = vmmov 0   ;;  %vm185_vm2 = vcmask 64512   ;;  %s9072_s24 = smov 96   ;;  %s10843_s5 = inlined_call_operand.vmem [shape: f32[16,48], index: 5, kind: input, shape index: {}]   ;;  %s10844_s1 = inlined_call_operand.vmem [shape: f32[6,8,16], index: 1, kind: input, shape index: {}]   ;;  %s10845_s4 = inlined_call_operand.vmem [shape: f32[8,24], index: 4, kind: input, shape index: {}]   ;;  %s10846_s0 = inlined_call_operand.vmem [shape: f32[6,16,8], index: 0, kind: input, shape index: {}]   ;;  %s10847_s6 = inlined_call_operand.vmem [shape: f32[16,16], index: 6, kind: input, shape index: {}]   ;;  %s10848_s3 = inlined_call_operand.vmem [shape: f32[16,48], index: 3, kind: input, shape index: {}]   ;;  %s10849_s7 = inlined_call_operand.vmem [shape: f32[8,48], index: 7, kind: input, shape index: {}]   ;;  %s10850_s9 = inlined_call_operand.vmem [shape: f32[128,48], index: 9, kind: input, shape index: {}]   ;;  %s10851_s2 = inlined_call_operand.vmem [shape: f32[2,3,128], index: 2, kind: input, shape index: {}]   ;;  %s10852_s8 = inlined_call_operand.vmem [shape: f32[16,16], index: 8, kind: input, shape index: {}]   ;;  %s10853_s10 = inlined_call_operand.vmem [shape: f32[16,16], index: 10, kind: input, shape index: {}]   ;;  %s10854_s12 = inlined_call_operand.vmem [shape: f32[6,256], index: 12, kind: output, shape index: {1}]   ;;  %s10855_s11 = inlined_call_operand.vmem [shape: f32[6,128], index: 11, kind: output, shape index: {0}]   ;;  %s10856_s13 = inlined_call_operand.vmem [shape: f32[2,48], index: 13, kind: output, shape index: {2}]  }
   0x1   :  { %v47_v0 = vld [vmem:[%s10843_s5] sm:$0xff]  ;;  %v48_v1 = vld [vmem:[%s10843_s5 + $0x8] sm:$0xff]  ;;  %v43_v5 = vld [vmem:[%s10844_s1 + $0x10] sm:$0xff]  ;;  %7949 = vmatprep.subr.mxu1 %v9068_v9  ;;  %7951 = vmatprep.mubr.msk.f32.mxu1 %vm9070_vm1, %v9068_v9  ;;  %vm2413_vm3 = vcmask 392192   ;;  %vm2302_vm4 = vcmask 1041409   ;;  %vm2305_vm5 = vcmask 1042434  }
   0x2   :  { %v41_v2 = vld [vmem:[%s10844_s1] sm:$0xff]  ;;  %v8484_v3 = vpack.c.bf16 %v48_v1, %v47_v0  ;;  %v42_v4 = vld [vmem:[%s10844_s1 + $0x8] sm:$0xff]  ;;  %v44_v6 = vld [vmem:[%s10844_s1 + $0x18] sm:$0xff]  ;;  %vm2308_vm6 = vcmask 1043459   ;;  %vm2311_vm7 = vcmask 1044484   ;;  %vm2314_vm8 = vcmask 1045509  }
   0x3   :  { %7940 = vmatprep.mubr.msk.f32.mxu0 %vm51_vm0, %v41_v2  ;;  %v45_v7 = vld [vmem:[%s10844_s1 + $0x20] sm:$0xff]  ;;  %v46_v8 = vld [vmem:[%s10844_s1 + $0x28] sm:$0xff]  ;;  %s9071_s1 = smov 112   ;;  %vm9796_vm9 = vmpackc.low %vm185_vm2, %vm185_vm2  ;;  %vm6824_vm10 = vcmask 18432   ;;  %vm6875_vm11 = vcmask 1042432   ;;  %vm6871_vm12 = vcmask 23552  }
   0x4   :  { %8485 = vmatprep.subr.bf16.mxu0 %v8484_v3  ;;  %s9080_s25 = smov 80   ;;  %vm2411_vm13 = vcmask 261120   ;;  %vm2415_vm14 = vcmask 523264   ;;  %vm2417_vm15 = vcmask 654336  }
   0x5   :  { %8487 = vmatpush3.bf16.msra.mxu0 %v8484_v3 }
   0x6   :  { %7964 = vmatprep.subr.mxu0 %v9068_v9 }
   0x8   :  { %7941 = vmatmul.mubr.msk.f32.vlgmr.msra.gmra.mrb[0].mxu0 %vm51_vm0, %v42_v4 }
   0x9   :  { %7943 = vmatprep.mubr.msk.f32.mxu0 %vm51_vm0, %v43_v5 }
   0xc   :  { %7944 = vmatmul.mubr.msk.f32.gmra.mrb[2].mxu0 %vm51_vm0, %v44_v6 }
   0xd   :  { %7946 = vmatprep.mubr.msk.f32.mxu0 %vm51_vm0, %v45_v7 }
  0x10   :  { %7947 = vmatmul.mubr.msk.f32.gmra.mrb[4].mxu0 %vm51_vm0, %v46_v8 }
  0x11   :  { %7966 = vmatprep.mubr.msk.f32.mxu0 %vm9070_vm1, %v9068_v9 }
  0xdb   :  { %v7942_v10 = vpop.f32.mrb[0].mxu0 }
  0xdc   :  { %173 = vrot.lane.b32.xlu0 %v7942_v10, %s9069_s23  ;;  %v9184_v11 = vpop.f32.mrb[1].mxu0 }
  0xdf   :  { %v7945_v12 = vpop.f32.mrb[2].mxu0 }
  0xe0   :  { %177 = vrot.lane.b32.xlu0 %v7945_v12, %s9069_s23  ;;  %v9191_v13 = vpop.f32.mrb[3].mxu0 }
  0xe3   :  { %v7948_v14 = vpop.f32.mrb[4].mxu0 }
  0xe4   :  { %175 = vrot.lane.b32.xlu0 %v9191_v13, %s9069_s23  ;;  %181 = vrot.lane.b32.xlu1 %v7948_v14, %s9069_s23  ;;  %v9196_v15 = vpop.f32.mrb[5].mxu0 }
  0xe8   :  { %183 = vrot.lane.b32.xlu0 %v9184_v11, %s9071_s1  ;;  %171 = vrot.lane.b32.xlu1 %v9184_v11, %s9069_s23 }
  0xec   :  { %412 = vrot.lane.b32.xlu0 %v7945_v12, %s9071_s1  ;;  %179 = vrot.lane.b32.xlu1 %v9196_v15, %s9069_s23 }
  0xf0   :  { %260 = vrot.lane.b32.xlu1 %v7942_v10, %s9071_s1 }
  0xf4   :  { %564 = vrot.lane.b32.xlu1 %v7948_v14, %s9071_s1 }
  0xf8   :  { %336 = vrot.lane.b32.xlu1 %v9191_v13, %s9071_s1 }
  0xfc   :  { %488 = vrot.lane.b32.xlu1 %v9196_v15, %s9071_s1 }
 0x14e   :  { %v9211_v16 = vpop.permute.xlu0 %173 }
 0x14f   :  { %716 = vrot.lane.b32.xlu0 %v9211_v16, %s9071_s1 }
 0x152   :  { %v9215_v17 = vpop.permute.xlu0 %177 }
 0x153   :  { %868 = vrot.lane.b32.xlu0 %v9215_v17, %s9071_s1 }
 0x156   :  { %v9219_v18 = vpop.permute.xlu0 %175  ;;  %v9221_v19 = vpop.permute.xlu1 %181 }
 0x157   :  { %1020 = vrot.lane.b32.xlu0 %v9221_v19, %s9071_s1 }
 0x15a   :  { %v184_v20 = vpop.permute.xlu0 %183  ;;  %v9225_v21 = vpop.permute.xlu1 %171 }
 0x15b   :  { %7950 = vmatpush3.xpose.msk.msra.mxu1 %vm185_vm2, %v184_v20  ;;  %792 = vrot.lane.b32.xlu0 %v9219_v18, %s9071_s1 }
 0x15c   :  { %640 = vrot.lane.b32.xlu1 %v9225_v21, %s9071_s1  ;;  %7954 = vmatprep.subr.mxu1 %v9068_v9 }
 0x15e   :  { %7952 = vmatmul.mubr.msk.f32.vlgmr.msra.gmra.mrb[0].mxu1 %vm185_vm2, %v9184_v11  ;;  %v413_v22 = vpop.permute.xlu0 %412  ;;  %v9235_v23 = vpop.permute.xlu1 %179 }
 0x15f   :  { %7965 = vmatpush3.xpose.msk.msra.mxu0 %vm185_vm2, %v413_v22  ;;  %1316 = vrot.lane.b32.xlu0 %v7942_v10, %s9072_s24 }
 0x160   :  { %944 = vrot.lane.b32.xlu1 %v9235_v23, %s9071_s1  ;;  %7956 = vmatprep.mubr.msk.f32.mxu1 %vm9070_vm1, %v9068_v9 }
 0x161   :  { %7974 = vmatprep.subr.mxu0 %v9068_v9 }
 0x162   :  { %7967 = vmatmul.mubr.msk.f32.vlgmr.msra.gmra.mrb[6].mxu0 %vm185_vm2, %v7945_v12  ;;  %v261_v24 = vpop.permute.xlu1 %260 }
 0x163   :  { %1620 = vrot.lane.b32.xlu0 %v7948_v14, %s9072_s24  ;;  %7955 = vmatpush3.xpose.msk.msra.mxu1 %vm185_vm2, %v261_v24 }
 0x164   :  { %1468 = vrot.lane.b32.xlu1 %v7945_v12, %s9072_s24  ;;  %7976 = vmatprep.mubr.msk.f32.mxu0 %vm9070_vm1, %v9068_v9 }
 0x165   :  { %7959 = vmatprep.subr.mxu1 %v9068_v9 }
 0x166   :  { %7957 = vmatmul.mubr.msk.f32.vlgmr.msra.gmra.mrb[2].mxu1 %vm185_vm2, %v7942_v10  ;;  %v565_v25 = vpop.permute.xlu1 %564 }
 0x167   :  { %7975 = vmatpush3.xpose.msk.msra.mxu0 %vm185_vm2, %v565_v25  ;;  %7961 = vmatprep.mubr.msk.f32.mxu1 %vm9070_vm1, %v9068_v9 }
 0x168   :  { %7984 = vmatprep.subr.mxu0 %v9068_v9 }
 0x16a   :  { %7977 = vmatmul.mubr.msk.f32.vlgmr.msra.gmra.mrb[8].mxu0 %vm185_vm2, %v7948_v14  ;;  %v337_v26 = vpop.permute.xlu1 %336 }
 0x16b   :  { %7960 = vmatpush3.xpose.msk.msra.mxu1 %vm185_vm2, %v337_v26  ;;  %7986 = vmatprep.mubr.msk.f32.mxu0 %vm9070_vm1, %v9068_v9 }
 0x16c   :  { %7969 = vmatprep.subr.mxu1 %v9068_v9 }
 0x16e   :  { %7962 = vmatmul.mubr.msk.f32.vlgmr.msra.gmra.mrb[4].mxu1 %vm185_vm2, %v9191_v13  ;;  %v489_v27 = vpop.permute.xlu1 %488 }
 0x16f   :  { %7970 = vmatpush3.xpose.msk.msra.mxu1 %vm185_vm2, %v489_v27  ;;  %7971 = vmatprep.mubr.msk.f32.mxu1 %vm9070_vm1, %v9068_v9 }
 0x170   :  { %7979 = vmatprep.subr.mxu1 %v9068_v9 }
 0x172   :  { %7972 = vmatmul.mubr.msk.f32.vlgmr.msra.gmra.mrb[6].mxu1 %vm185_vm2, %v9196_v15 }
 0x173   :  { %7981 = vmatprep.mubr.msk.f32.mxu1 %vm9070_vm1, %v9068_v9 }
 0x1c1   :  { %v717_v28 = vpop.permute.xlu0 %716 }
 0x1c2   :  { %7985 = vmatpush3.xpose.msk.msra.mxu0 %vm185_vm2, %v717_v28 }
 0x1c3   :  { %7994 = vmatprep.subr.mxu0 %v9068_v9 }
 0x1c5   :  { %v869_v29 = vpop.permute.xlu0 %868  ;;  %7987 = vmatmul.mubr.msk.f32.vlgmr.msra.gmra.mrb[10].mxu0 %vm185_vm2, %v9211_v16 }
 0x1c6   :  { %7995 = vmatpush3.xpose.msk.msra.mxu0 %vm185_vm2, %v869_v29  ;;  %7996 = vmatprep.mubr.msk.f32.mxu0 %vm9070_vm1, %v9068_v9 }
 0x1c7   :  { %8004 = vmatprep.subr.mxu0 %v9068_v9 }
 0x1c9   :  { %v1021_v30 = vpop.permute.xlu0 %1020  ;;  %7997 = vmatmul.mubr.msk.f32.vlgmr.msra.gmra.mrb[12].mxu0 %vm185_vm2, %v9215_v17 }
 0x1ca   :  { %8005 = vmatpush3.xpose.msk.msra.mxu0 %vm185_vm2, %v1021_v30  ;;  %8006 = vmatprep.mubr.msk.f32.mxu0 %vm9070_vm1, %v9068_v9 }
 0x1cb   :  { %8014 = vmatprep.subr.mxu0 %v9068_v9 }
 0x1cd   :  { %v793_v31 = vpop.permute.xlu0 %792  ;;  %8007 = vmatmul.mubr.msk.f32.vlgmr.msra.gmra.mrb[14].mxu0 %vm185_vm2, %v9221_v19 }
 0x1ce   :  { %v641_v32 = vpop.permute.xlu1 %640  ;;  %8016 = vmatprep.mubr.msk.f32.mxu0 %vm9070_vm1, %v9068_v9 }
 0x1cf   :  { %7980 = vmatpush3.xpose.msk.msra.mxu1 %vm185_vm2, %v641_v32 }
 0x1d0   :  { %7989 = vmatprep.subr.mxu1 %v9068_v9 }
 0x1d1   :  { %v1317_v33 = vpop.permute.xlu0 %1316 }
 0x1d2   :  { %7982 = vmatmul.mubr.msk.f32.vlgmr.msra.gmra.mrb[8].mxu1 %vm185_vm2, %v9225_v21  ;;  %8015 = vmatpush3.msra.mxu0 %v1317_v33  ;;  %v945_v34 = vpop.permute.xlu1 %944 }
 0x1d3   :  { %7990 = vmatpush3.xpose.msk.msra.mxu1 %vm185_vm2, %v793_v31  ;;  %7991 = vmatprep.mubr.msk.f32.mxu1 %vm9070_vm1, %v9068_v9 }
 0x1d4   :  { %7999 = vmatprep.subr.mxu1 %v9068_v9  ;;  %8024 = vmatprep.subr.mxu0 %v9068_v9 }
 0x1d5   :  { %v9356_v27 = vpop.permute.xlu0 %1620 }
 0x1d6   :  { %7992 = vmatmul.mubr.msk.f32.vlgmr.msra.gmra.mrb[10].mxu1 %vm185_vm2, %v9219_v18 }
 0x1d7   :  { %8000 = vmatpush3.xpose.msk.msra.mxu1 %vm185_vm2, %v945_v34  ;;  %8001 = vmatprep.mubr.msk.f32.mxu1 %vm9070_vm1, %v9068_v9 }
 0x1d8   :  { %8009 = vmatprep.subr.mxu1 %v9068_v9 }
 0x1da   :  { %8002 = vmatmul.mubr.msk.f32.vlgmr.msra.gmra.mrb[12].mxu1 %vm185_vm2, %v9235_v23 }
 0x1db   :  { %8011 = vmatprep.mubr.msk.f32.mxu1 %vm9070_vm1, %v9068_v9 }
 0x231   :  { %v256_v35 = vpop.f32.mrb[0].mxu1 }
 0x232   :  { %v9308_v36 = vmul.f32 0.35355338, %v256_v35  ;;  %v7953_v37 = vpop.f32.mrb[1].mxu1 }
 0x233   :  { %v9372_v37 = vpop.permute.xlu1 %1468 }
 0x234   :  { %v1108_v38 = vsel %vm185_vm2, %v9308_v36, -inf }
 0x235   :  { %1109 = vmax.xlane.f32.xlu0 %v1108_v38  ;;  %v484_v39 = vpop.f32.mrb[6].mxu0 }
 0x236   :  { %v9312_v40 = vmul.f32 0.35355338, %v484_v39  ;;  %v7968_v41 = vpop.f32.mrb[7].mxu0 }
 0x238   :  { %v1117_v42 = vsel %vm185_vm2, %v9312_v40, -inf }
 0x239   :  { %v332_v43 = vpop.f32.mrb[2].mxu1  ;;  %1118 = vmax.xlane.f32.xlu1 %v1117_v42 }
 0x23a   :  { %v1097_v44 = vmul.f32 0.35355338, %v332_v43  ;;  %v7958_v45 = vpop.f32.mrb[3].mxu1 }
 0x23c   :  { %v1111_v46 = vsel %vm185_vm2, %v1097_v44, -inf }
 0x23d   :  { %1112 = vmax.xlane.f32.xlu0 %v1111_v46  ;;  %v636_v47 = vpop.f32.mrb[8].mxu0 }
 0x23e   :  { %v1101_v48 = vmul.f32 0.35355338, %v636_v47  ;;  %v7978_v49 = vpop.f32.mrb[9].mxu0 }
 0x240   :  { %v1123_v50 = vsel %vm185_vm2, %v1101_v48, -inf }
 0x241   :  { %v408_v51 = vpop.f32.mrb[4].mxu1  ;;  %1124 = vmax.xlane.f32.xlu0 %v1123_v50 }
 0x242   :  { %v9318_v52 = vmul.f32 0.35355338, %v408_v51  ;;  %v7963_v53 = vpop.f32.mrb[5].mxu1 }
 0x244   :  { %v1114_v54 = vsel %vm185_vm2, %v9318_v52, -inf }
 0x245   :  { %v560_v55 = vpop.f32.mrb[6].mxu1  ;;  %1115 = vmax.xlane.f32.xlu0 %v1114_v54 }
 0x246   :  { %v9322_v56 = vmul.f32 0.35355338, %v560_v55  ;;  %v7973_v57 = vpop.f32.mrb[7].mxu1 }
 0x248   :  { %v1120_v58 = vsel %vm185_vm2, %v9322_v56, -inf }
 0x249   :  { %1121 = vmax.xlane.f32.xlu0 %v1120_v58 }
 0x298   :  { %v788_v59 = vpop.f32.mrb[10].mxu0 }
 0x299   :  { %v9326_v60 = vmul.f32 0.35355338, %v788_v59  ;;  %v7988_v61 = vpop.f32.mrb[11].mxu0 }
 0x29b   :  { %v1129_v62 = vsel %vm185_vm2, %v9326_v60, -inf }
 0x29c   :  { %1130 = vmax.xlane.f32.xlu1 %v1129_v62  ;;  %v940_v63 = vpop.f32.mrb[12].mxu0 }
 0x29d   :  { %v9330_v0 = vmul.f32 0.35355338, %v940_v63  ;;  %v7998_v1 = vpop.f32.mrb[13].mxu0 }
 0x29f   :  { %v1135_v2 = vsel %vm185_vm2, %v9330_v0, -inf }
 0x2a0   :  { %1136 = vmax.xlane.f32.xlu1 %v1135_v2  ;;  %v1092_v3 = vpop.f32.mrb[14].mxu0 }
 0x2a1   :  { %v8008_v4 = vpop.f32.mrb[15].mxu0  ;;  %v9340_v20 = vmul.f32 0.35355338, %v1092_v3 }
 0x2a3   :  { %v1141_v26 = vsel %vm185_vm2, %v9340_v20, -inf }
 0x2a5   :  { %v712_v5 = vpop.f32.mrb[8].mxu1 }
 0x2a6   :  { %v9334_v6 = vmul.f32 0.35355338, %v712_v5  ;;  %v7983_v7 = vpop.f32.mrb[9].mxu1 }
 0x2a8   :  { %v1126_v8 = vsel %vm185_vm2, %v9334_v6, -inf }
 0x2a9   :  { %v864_v10 = vpop.f32.mrb[10].mxu1  ;;  %1127 = vmax.xlane.f32.xlu0 %v1126_v8 }
 0x2aa   :  { %v9338_v12 = vmul.f32 0.35355338, %v864_v10  ;;  %v7993_v14 = vpop.f32.mrb[11].mxu1 }
 0x2ac   :  { %v1132_v22 = vsel %vm185_vm2, %v9338_v12, -inf }
 0x2ad   :  { %v1016_v24 = vpop.f32.mrb[12].mxu1  ;;  %1133 = vmax.xlane.f32.xlu1 %v1132_v22 }
 0x2ae   :  { %v8003_v25 = vpop.f32.mrb[13].mxu1  ;;  %v9358_v30 = vmul.f32 0.35355338, %v1016_v24 }
 0x2b1   :  { %1142 = vmax.xlane.f32.xlu1 %v1141_v26 }
 0x2bf   :  { %1772 = vrot.lane.b32.xlu0 %v9211_v16, %s9072_s24 }
 0x2c2   :  { %1240 = vrot.lane.b32.xlu1 %v9184_v11, %s9072_s24  ;;  %v1110_v28 = vpop.xlane.xlu0 %1109  ;;  %v1138_v11 = vsel %vm185_vm2, %v9358_v30, -inf }
 0x2c3   :  { %v1144_v38 = vsub.f32 %v9308_v36, %v1110_v28 }
 0x2c5   :  { %v1156_v41 = vmul.f32 1.442695, %v1144_v38 }
 0x2c6   :  { %1392 = vrot.lane.b32.xlu1 %v9191_v13, %s9072_s24  ;;  %v1119_v39 = vpop.xlane.xlu1 %1118 }
 0x2c7   :  { %v1147_v42 = vsub.f32 %v9312_v40, %v1119_v39 }
 0x2c9   :  { %v1162_v43 = vmul.f32 1.442695, %v1147_v42 }
 0x2ca   :  { %1544 = vrot.lane.b32.xlu1 %v9196_v15, %s9072_s24  ;;  %v1113_v29 = vpop.xlane.xlu0 %1112 }
 0x2cb   :  { %v1145_v31 = vsub.f32 %v1097_v44, %v1113_v29 }
 0x2cd   :  { %v1158_v32 = vmul.f32 1.442695, %v1145_v31 }
 0x2ce   :  { %1696 = vrot.lane.b32.xlu1 %v9225_v21, %s9072_s24  ;;  %v1125_v16 = vpop.xlane.xlu0 %1124 }
 0x2cf   :  { %v1149_v13 = vsub.f32 %v1101_v48, %v1125_v16  ;;  %8908 = vpow2.f32 %v1158_v32 }
 0x2d1   :  { %v1166_v33 = vmul.f32 1.442695, %v1149_v13 }
 0x2d2   :  { %v1116_v51 = vpop.xlane.xlu0 %1115 }
 0x2d3   :  { %8910 = vpow2.f32 %v1166_v33  ;;  %v1146_v53 = vsub.f32 %v9318_v52, %v1116_v51 }
 0x2d4   :  { %8912 = vpow2.f32 %v1156_v41 }
 0x2d5   :  { %8914 = vpow2.f32 %v1162_v43  ;;  %v1160_v58 = vmul.f32 1.442695, %v1146_v53 }
 0x2d6   :  { %v1122_v54 = vpop.xlane.xlu0 %1121 }
 0x2d7   :  { %v1148_v59 = vsub.f32 %v9322_v56, %v1122_v54 }
 0x2d9   :  { %v9362_v15 = vpop.eup %8908 }
 0x2da   :  { %v1183_v21 = vsel %vm185_vm2, %v9362_v15, 0.0 }
 0x2dd   :  { %v9366_v34 = vpop.eup %8910 }
 0x2de   :  { %1139 = vmax.xlane.f32.xlu0 %v1138_v11  ;;  %v1195_v35 = vsel %vm185_vm2, %v9366_v34, 0.0  ;;  %v9376_v44 = vpop.eup %8912 }
 0x2df   :  { %v9380_v45 = vpop.eup %8914 }
 0x2e0   :  { %v1189_v46 = vsel %vm185_vm2, %v9380_v45, 0.0 }
 0x2f2   :  { %1184 = vadd.xlane.f32.xlu1 %v1183_v21 }
 0x2f4   :  { %1924 = vrot.lane.b32.xlu0 %v9215_v17, %s9072_s24  ;;  %v1180_v17 = vsel %vm185_vm2, %v9376_v44, 0.0 }
 0x2f6   :  { %1196 = vadd.xlane.f32.xlu1 %v1195_v35 }
 0x313   :  { %1181 = vadd.xlane.f32.xlu0 %v1180_v17 }
 0x317   :  { %1190 = vadd.xlane.f32.xlu0 %v1189_v46 }
 0x329   :  { %v1131_v36 = vpop.xlane.xlu1 %1130 }
 0x32a   :  { %v1151_v47 = vsub.f32 %v9326_v60, %v1131_v36 }
 0x32c   :  { %v1170_v48 = vmul.f32 1.442695, %v1151_v47 }
 0x32d   :  { %2076 = vrot.lane.b32.xlu0 %v9221_v19, %s9072_s24  ;;  %v1137_v40 = vpop.xlane.xlu1 %1136 }
 0x32e   :  { %8916 = vpow2.f32 %v1170_v48  ;;  %v1153_v49 = vsub.f32 %v9330_v0, %v1137_v40  ;;  %v1164_v0 = vmul.f32 1.442695, %v1148_v59  ;;  %v2436_v40 = vld [vmem:[%s10845_s4] sm:$0xff] }
 0x330   :  { %v1174_v50 = vmul.f32 1.442695, %v1153_v49 }
 0x332   :  { %8918 = vpow2.f32 %v1174_v50 }
 0x333   :  { %8920 = vpow2.f32 %v1160_v58 }
 0x336   :  { %v1128_v19 = vpop.xlane.xlu0 %1127 }
 0x337   :  { %v1150_v1 = vsub.f32 %v9334_v6, %v1128_v19  ;;  %v2424_v19 = vld [vmem:[%s10846_s0] sm:$0xff] }
 0x338   :  { %v9389_v55 = vpop.eup %8916 }
 0x339   :  { %v1201_v57 = vsel %vm185_vm2, %v9389_v55, 0.0  ;;  %v1168_v4 = vmul.f32 1.442695, %v1150_v1 }
 0x33a   :  { %v1134_v60 = vpop.xlane.xlu1 %1133  ;;  %1202 = vadd.xlane.f32.xlu1 %v1201_v57  ;;  %v1773_v26 = vpop.permute.xlu0 %1772 }
 0x33b   :  { %v1152_v61 = vsub.f32 %v9338_v12, %v1134_v60 }
 0x33c   :  { %v9395_v62 = vpop.eup %8918 }
 0x33d   :  { %v1172_v63 = vmul.f32 1.442695, %v1152_v61  ;;  %v1207_v52 = vsel %vm185_vm2, %v9395_v62, 0.0  ;;  %v9402_v7 = vpop.eup %8920  ;;  %v2425_v61 = vld [vmem:[%s10846_s0 + $0x8] sm:$0xff] }
 0x33e   :  { %v1143_v2 = vpop.xlane.xlu1 %1142  ;;  %1208 = vadd.xlane.f32.xlu1 %v1207_v52  ;;  %v1186_v10 = vsel %vm185_vm2, %v9402_v7, 0.0 }
 0x33f   :  { %8922 = vpow2.f32 %v1172_v63  ;;  %v1155_v56 = vsub.f32 %v9340_v20, %v1143_v2  ;;  %v2426_v63 = vld [vmem:[%s10846_s0 + $0x10] sm:$0xff]  ;;  %v2427_v2 = vld [vmem:[%s10846_s0 + $0x18] sm:$0xff] }
 0x340   :  { %8924 = vpow2.f32 %v1164_v0 }
 0x341   :  { %v1178_v3 = vmul.f32 1.442695, %v1155_v56  ;;  %v2428_v56 = vld [vmem:[%s10846_s0 + $0x20] sm:$0xff] }
 0x342   :  { %v1241_v5 = vpop.permute.xlu1 %1240 }
 0x343   :  { %8926 = vpow2.f32 %v1178_v3  ;;  %8010 = vmatpush3.msra.mxu1 %v1241_v5  ;;  %v2430_v5 = vld [vmem:[%s10846_s0 + $0x30] sm:$0xff] }
 0x344   :  { %8019 = vmatprep.subr.mxu1 %v9068_v9  ;;  %8928 = vpow2.f32 %v1168_v4  ;;  %v2429_v4 = vld [vmem:[%s10846_s0 + $0x28] sm:$0xff] }
 0x346   :  { %v1393_v16 = vpop.permute.xlu1 %1392 }
 0x349   :  { %v9404_v8 = vpop.eup %8922 }
 0x34a   :  { %v1204_v6 = vsel %vm185_vm2, %v9404_v8, 0.0  ;;  %v9410_v12 = vpop.eup %8924  ;;  %v9425_v11 = vpop.permute.xlu1 %1544 }
 0x34b   :  { %1205 = vadd.xlane.f32.xlu1 %v1204_v6  ;;  %v1192_v22 = vsel %vm185_vm2, %v9410_v12, 0.0  ;;  %v2433_v6 = vld [vmem:[%s10846_s0 + $0x48] sm:$0xff] }
 0x34c   :  { %1187 = vadd.xlane.f32.xlu0 %v1186_v10  ;;  %v2434_v10 = vld [vmem:[%s10846_s0 + $0x50] sm:$0xff] }
 0x34d   :  { %v9412_v14 = vpop.eup %8926 }
 0x34e   :  { %v1213_v20 = vsel %vm185_vm2, %v9412_v14, 0.0  ;;  %v9418_v24 = vpop.eup %8928  ;;  %v9429_v13 = vpop.permute.xlu1 %1696 }
 0x34f   :  { %1214 = vadd.xlane.f32.xlu1 %v1213_v20  ;;  %v1198_v25 = vsel %vm185_vm2, %v9418_v24, 0.0 }
 0x350   :  { %1193 = vadd.xlane.f32.xlu0 %v1192_v22 }
 0x354   :  { %1199 = vadd.xlane.f32.xlu0 %v1198_v25  ;;  %v49_v25 = vld [vmem:[%s10847_s6] sm:$0xff] }
 0x36a   :  { %1848 = vrot.lane.b32.xlu0 %v9219_v18, %s9072_s24 }
 0x36b   :  { %v1140_v28 = vpop.xlane.xlu0 %1139 }
 0x36c   :  { %v1154_v29 = vsub.f32 %v9358_v30, %v1140_v28 }
 0x36e   :  { %v1176_v31 = vmul.f32 1.442695, %v1154_v29 }
 0x36f   :  { %v1925_v30 = vpop.permute.xlu0 %1924 }
 0x370   :  { %8930 = vpow2.f32 %v1176_v31 }
 0x37a   :  { %v9427_v32 = vpop.eup %8930 }
 0x37b   :  { %v1210_v33 = vsel %vm185_vm2, %v9427_v32, 0.0 }
 0x37c   :  { %1211 = vadd.xlane.f32.xlu1 %v1210_v33 }
 0x37f   :  { %v1185_v21 = vpop.xlane.xlu1 %1184 }
 0x380   :  { %8932 = vrcp.f32 %v1185_v21 }
 0x383   :  { %v1197_v39 = vpop.xlane.xlu1 %1196 }
 0x38a   :  { %v8933_v35 = vpop.eup %8932 }
 0x38b   :  { %v1229_v18 = vmul.f32 %v8933_v35, %v9362_v15 }
 0x38d   :  { %2000 = vrot.lane.b32.xlu1 %v9235_v23, %s9072_s24  ;;  %8017 = vmatmul.mubr.msk.f32.vlgmr.msra.gmra.mrb[16].mxu0 %vm185_vm2, %v1229_v18 }
 0x38e   :  { %8025 = vmatpush3.msra.mxu0 %v9372_v37  ;;  %8026 = vmatprep.mubr.msk.f32.mxu0 %vm9070_vm1, %v9068_v9 }
 0x38f   :  { %8034 = vmatprep.subr.mxu0 %v9068_v9 }
 0x3a0   :  { %v1182_v38 = vpop.xlane.xlu0 %1181 }
 0x3a1   :  { %8934 = vrcp.f32 %v1182_v38 }
 0x3a4   :  { %v1191_v41 = vpop.xlane.xlu0 %1190 }
 0x3a5   :  { %8936 = vrcp.f32 %v1191_v41 }
 0x3a6   :  { %8938 = vrcp.f32 %v1197_v39 }
 0x3a8   :  { %v2077_v36 = vpop.permute.xlu0 %2076 }
 0x3ab   :  { %v8935_v15 = vpop.eup %8934 }
 0x3ac   :  { %v1228_v42 = vmul.f32 %v8935_v15, %v9376_v44 }
 0x3ae   :  { %8012 = vmatmul.mubr.msk.f32.vlgmr.msra.gmra.mrb[14].mxu1 %vm185_vm2, %v1228_v42 }
 0x3af   :  { %v8937_v23 = vpop.eup %8936  ;;  %8020 = vmatpush3.msra.mxu1 %v1393_v16  ;;  %8021 = vmatprep.mubr.msk.f32.mxu1 %vm9070_vm1, %v9068_v9 }
 0x3b0   :  { %v1231_v37 = vmul.f32 %v8937_v23, %v9380_v45  ;;  %8029 = vmatprep.subr.mxu1 %v9068_v9  ;;  %v8939_v43 = vpop.eup %8938 }
 0x3b1   :  { %v1233_v44 = vmul.f32 %v8939_v43, %v9366_v34 }
 0x3b2   :  { %8027 = vmatmul.mubr.msk.f32.vlgmr.msra.gmra.mrb[18].mxu0 %vm185_vm2, %v1231_v37 }
 0x3b3   :  { %8035 = vmatpush3.msra.mxu0 %v9356_v27  ;;  %8036 = vmatprep.mubr.msk.f32.mxu0 %vm9070_vm1, %v9068_v9 }
 0x3b4   :  { %8044 = vmatprep.subr.mxu0 %v9068_v9 }
 0x3b6   :  { %8037 = vmatmul.mubr.msk.f32.vlgmr.msra.gmra.mrb[20].mxu0 %vm185_vm2, %v1233_v44 }
 0x3b7   :  { %8045 = vmatpush3.msra.mxu0 %v1773_v26  ;;  %8046 = vmatprep.mubr.msk.f32.mxu0 %vm9070_vm1, %v9068_v9  ;;  %v50_v26 = vld [vmem:[%s10847_s6 + $0x8] sm:$0xff] }
 0x3b8   :  { %8054 = vmatprep.subr.mxu0 %v9068_v9  ;;  %v8488_v28 = vpack.c.bf16 %v50_v26, %v49_v25 }
 0x3c7   :  { %v1203_v17 = vpop.xlane.xlu1 %1202 }
 0x3c8   :  { %8940 = vrcp.f32 %v1203_v17 }
 0x3cb   :  { %v1209_v45 = vpop.xlane.xlu1 %1208 }
 0x3cc   :  { %8942 = vrcp.f32 %v1209_v45 }
 0x3d2   :  { %v8941_v27 = vpop.eup %8940 }
 0x3d3   :  { %v1235_v46 = vmul.f32 %v8941_v27, %v9389_v55 }
 0x3d5   :  { %8047 = vmatmul.mubr.msk.f32.vlgmr.msra.gmra.mrb[22].mxu0 %vm185_vm2, %v1235_v46 }
 0x3d6   :  { %v8943_v47 = vpop.eup %8942  ;;  %8055 = vmatpush3.msra.mxu0 %v1925_v30  ;;  %8056 = vmatprep.mubr.msk.f32.mxu0 %vm9070_vm1, %v9068_v9 }
 0x3d7   :  { %8064 = vmatprep.subr.mxu0 %v9068_v9  ;;  %v1237_v34 = vmul.f32 %v8943_v47, %v9395_v62 }
 0x3d8   :  { %v1206_v48 = vpop.xlane.xlu1 %1205 }
 0x3d9   :  { %v1188_v49 = vpop.xlane.xlu0 %1187  ;;  %8057 = vmatmul.mubr.msk.f32.vlgmr.msra.gmra.mrb[24].mxu0 %vm185_vm2, %v1237_v34 }
 0x3da   :  { %8944 = vrcp.f32 %v1188_v49  ;;  %8065 = vmatpush3.msra.mxu0 %v2077_v36  ;;  %8066 = vmatprep.mubr.msk.f32.mxu0 %vm9070_vm1, %v9068_v9 }
 0x3db   :  { %8082 = vmatprep.subr.mxu0 %v2436_v40 }
 0x3dc   :  { %v1215_v50 = vpop.xlane.xlu1 %1214 }
 0x3dd   :  { %8946 = vrcp.f32 %v1215_v50  ;;  %v1194_v51 = vpop.xlane.xlu0 %1193 }
 0x3de   :  { %8948 = vrcp.f32 %v1194_v51 }
 0x3e1   :  { %v1200_v53 = vpop.xlane.xlu0 %1199 }
 0x3e2   :  { %8950 = vrcp.f32 %v1200_v53 }
 0x3e3   :  { %8952 = vrcp.f32 %v1206_v48 }
 0x3e4   :  { %v8945_v54 = vpop.eup %8944 }
 0x3e5   :  { %v1230_v55 = vmul.f32 %v8945_v54, %v9402_v7  ;;  %v1849_v1 = vpop.permute.xlu0 %1848  ;;  %v2431_v7 = vld [vmem:[%s10846_s0 + $0x38] sm:$0xff] }
 0x3e7   :  { %v8947_v57 = vpop.eup %8946  ;;  %8022 = vmatmul.mubr.msk.f32.vlgmr.msra.gmra.mrb[16].mxu1 %vm185_vm2, %v1230_v55 }
 0x3e8   :  { %v8949_v58 = vpop.eup %8948  ;;  %8030 = vmatpush3.msra.mxu1 %v9425_v11  ;;  %8031 = vmatprep.mubr.msk.f32.mxu1 %vm9070_vm1, %v9068_v9  ;;  %v1239_v59 = vmul.f32 %v8947_v57, %v9412_v14 }
 0x3e9   :  { %8039 = vmatprep.subr.mxu1 %v9068_v9  ;;  %v1232_v60 = vmul.f32 %v8949_v58, %v9410_v12  ;;  %v2435_v12 = vld [vmem:[%s10846_s0 + $0x58] sm:$0xff] }
 0x3ea   :  { %8067 = vmatmul.mubr.msk.f32.vlgmr.msra.gmra.mrb[26].mxu0 %vm185_vm2, %v1239_v59 }
 0x3eb   :  { %8032 = vmatmul.mubr.msk.f32.vlgmr.msra.gmra.mrb[18].mxu1 %vm185_vm2, %v1232_v60  ;;  %8083 = vmatpush3.msra.mxu0 %v2436_v40 }
 0x3ec   :  { %v8951_v62 = vpop.eup %8950  ;;  %8040 = vmatpush3.msra.mxu1 %v9429_v13  ;;  %8041 = vmatprep.mubr.msk.f32.mxu1 %vm9070_vm1, %v9068_v9 }
 0x3ed   :  { %8049 = vmatprep.subr.mxu1 %v9068_v9  ;;  %v1234_v52 = vmul.f32 %v8951_v62, %v9418_v24  ;;  %8084 = vmatprep.mubr.msk.f32.mxu0 %vm185_vm2, %v2424_v19  ;;  %v8953_v0 = vpop.eup %8952 }
 0x3ee   :  { %8085 = vmatmul.mubr.msk.f32.vlgmr.msra.gmra.mrb[28].mxu0 %vm185_vm2, %v2425_v61  ;;  %v1236_v3 = vmul.f32 %v8953_v0, %v9404_v8  ;;  %v2432_v8 = vld [vmem:[%s10846_s0 + $0x40] sm:$0xff]  ;;  %s9073_s0 = smov 8  }
 0x3ef   :  { %8042 = vmatmul.mubr.msk.f32.vlgmr.msra.gmra.mrb[20].mxu1 %vm185_vm2, %v1234_v52  ;;  %8087 = vmatprep.mubr.msk.f32.mxu0 %vm185_vm2, %v2426_v63 }
 0x3f0   :  { %8050 = vmatpush3.msra.mxu1 %v1849_v1  ;;  %8051 = vmatprep.mubr.msk.f32.mxu1 %vm9070_vm1, %v9068_v9 }
 0x3f1   :  { %8059 = vmatprep.subr.mxu1 %v9068_v9 }
 0x3f2   :  { %8088 = vmatmul.mubr.msk.f32.gmra.mrb[30].mxu0 %vm185_vm2, %v2427_v2  ;;  %v9583_v2 = vld [vmem:[%s10848_s3] sm:$0xff] }
 0x3f3   :  { %8052 = vmatmul.mubr.msk.f32.vlgmr.msra.gmra.mrb[22].mxu1 %vm185_vm2, %v1236_v3  ;;  %8090 = vmatprep.mubr.msk.f32.mxu0 %vm185_vm2, %v2428_v56 }
 0x3f4   :  { %8061 = vmatprep.mubr.msk.f32.mxu1 %vm9070_vm1, %v9068_v9 }
 0x3f6   :  { %8091 = vmatmul.mubr.msk.f32.gmra.mrb[32].mxu0 %vm185_vm2, %v2429_v4 }
 0x3f7   :  { %8093 = vmatprep.mubr.msk.f32.mxu0 %vm185_vm2, %v2430_v5 }
 0x3fa   :  { %8094 = vmatmul.mubr.msk.f32.gmra.mrb[34].mxu0 %vm185_vm2, %v2431_v7 }
 0x3fb   :  { %8096 = vmatprep.mubr.msk.f32.mxu0 %vm185_vm2, %v2432_v8 }
 0x3fe   :  { %8097 = vmatmul.mubr.msk.f32.gmra.mrb[36].mxu0 %vm185_vm2, %v2433_v6 }
 0x3ff   :  { %8099 = vmatprep.mubr.msk.f32.mxu0 %vm185_vm2, %v2434_v10 }
 0x402   :  { %8100 = vmatmul.mubr.msk.f32.gmra.mrb[38].mxu0 %vm185_vm2, %v2435_v12 }
 0x403   :  { %8144 = vmatprep.mubr.msk.f32.mxu0 %vm2413_vm3, %v9583_v2 }
 0x409   :  { %v1212_v14 = vpop.xlane.xlu1 %1211 }
 0x40a   :  { %8954 = vrcp.f32 %v1212_v14 }
 0x40d   :  { %v2001_v20 = vpop.permute.xlu1 %2000 }
 0x40e   :  { %8060 = vmatpush3.msra.mxu1 %v2001_v20 }
 0x40f   :  { %8489 = vmatprep.subr.bf16.mxu1 %v8488_v28 }
 0x414   :  { %v8955_v22 = vpop.eup %8954 }
 0x415   :  { %v1238_v24 = vmul.f32 %v8955_v22, %v9427_v32 }
 0x417   :  { %8062 = vmatmul.mubr.msk.f32.vlgmr.msra.gmra.mrb[24].mxu1 %vm185_vm2, %v1238_v24 }
 0x418   :  { %8491 = vmatpush3.bf16.msra.mxu1 %v8488_v28 }
 0x460   :  { %v9548_v29 = vpop.f32.mrb[16].mxu0 }
 0x461   :  { %v8018_v31 = vpop.f32.mrb[17].mxu0 }
 0x481   :  { %v9550_v16 = vpop.f32.mrb[14].mxu1 }
 0x482   :  { %v8013_v11 = vpop.f32.mrb[15].mxu1 }
 0x485   :  { %v9552_v32 = vpop.f32.mrb[18].mxu0 }
 0x486   :  { %v8028_v13 = vpop.f32.mrb[19].mxu0 }
 0x489   :  { %v9554_v33 = vpop.f32.mrb[20].mxu0 }
 0x48a   :  { %v8038_v21 = vpop.f32.mrb[21].mxu0 }
 0x4a8   :  { %v1844_v35 = vpop.f32.mrb[22].mxu0 }
 0x4a9   :  { %2160 = vrot.lane.b32.xlu1 %v1844_v35, %s9073_s0  ;;  %v8048_v18 = vpop.f32.mrb[23].mxu0 }
 0x4aa   :  { %v9617_v18 = vld [vmem:[%s10848_s3 + $0x8] sm:$0xff] }
 0x4ac   :  { %v1996_v30 = vpop.f32.mrb[24].mxu0 }
 0x4ad   :  { %v8058_v38 = vpop.f32.mrb[25].mxu0 }
 0x4ba   :  { %v9557_v39 = vpop.f32.mrb[16].mxu1 }
 0x4bb   :  { %v8023_v41 = vpop.f32.mrb[17].mxu1 }
 0x4bd   :  { %v2148_v15 = vpop.f32.mrb[26].mxu0 }
 0x4be   :  { %v9559_v42 = vpop.f32.mrb[18].mxu1  ;;  %v8068_v23 = vpop.f32.mrb[27].mxu0 }
 0x4bf   :  { %v8033_v37 = vpop.f32.mrb[19].mxu1 }
 0x4c1   :  { %v8086_v43 = vpop.f32.mrb[28].mxu0 }
 0x4c2   :  { %v1768_v44 = vpop.f32.mrb[20].mxu1  ;;  %v2539_v17 = vpop.f32.mrb[29].mxu0 }
 0x4c3   :  { %2158 = vrot.lane.b32.xlu0 %v1768_v44, %s9073_s0  ;;  %v8043_v45 = vpop.f32.mrb[21].mxu1  ;;  %v8733_v27 = vpack.i.bf16 %v8086_v43, %v2539_v17  ;;  %v8492_v46 = vpack.c.bf16 %v8086_v43, %v2539_v17 }
 0x4c5   :  { %8493 = vmatprep.subr.bf16.mxu1 %v8492_v46  ;;  %v8089_v36 = vpop.f32.mrb[30].mxu0 }
 0x4c6   :  { %v1920_v47 = vpop.f32.mrb[22].mxu1  ;;  %v2549_v34 = vpop.f32.mrb[31].mxu0 }
 0x4c7   :  { %v8053_v48 = vpop.f32.mrb[23].mxu1  ;;  %2162 = vrot.lane.b32.xlu1 %v1920_v47, %s9073_s0  ;;  %8729 = vrot.lane.b32.xlu0 %v8733_v27, %s9069_s23  ;;  %v8743_v40 = vpack.i.bf16 %v8089_v36, %v2549_v34  ;;  %v9564_v49 = vpack.c.bf16 %v8089_v36, %v2549_v34 }
 0x4c9   :  { %v8092_v50 = vpop.f32.mrb[32].mxu0 }
 0x4ca   :  { %v2559_v51 = vpop.f32.mrb[33].mxu0 }
 0x4cb   :  { %8734 = vrot.lane.b32.xlu1 %v8733_v27, %s9071_s1  ;;  %2164 = vrot.lane.b32.xlu0 %v1996_v30, %s9073_s0  ;;  %v8753_v53 = vpack.i.bf16 %v8092_v50, %v2559_v51  ;;  %v8516_v54 = vpack.c.bf16 %v8092_v50, %v2559_v51 }
 0x4cd   :  { %8517 = vmatprep.subr.bf16.mxu0 %v8516_v54  ;;  %v8095_v55 = vpop.f32.mrb[34].mxu0 }
 0x4ce   :  { %8519 = vmatpush3.bf16.msra.mxu0 %v8516_v54  ;;  %v2569_v57 = vpop.f32.mrb[35].mxu0 }
 0x4cf   :  { %2168 = vrot.lane.b32.xlu1 %v2148_v15, %s9073_s0  ;;  %v8763_v58 = vpack.i.bf16 %v8095_v55, %v2569_v57  ;;  %v9569_v59 = vpack.c.bf16 %v8095_v55, %v2569_v57 }
 0x4d1   :  { %v8098_v60 = vpop.f32.mrb[36].mxu0 }
 0x4d2   :  { %v2579_v19 = vpop.f32.mrb[37].mxu0 }
 0x4d3   :  { %8744 = vrot.lane.b32.xlu1 %v8743_v40, %s9071_s1  ;;  %v8773_v61 = vpack.i.bf16 %v8098_v60, %v2579_v19  ;;  %v9572_v62 = vpack.c.bf16 %v8098_v60, %v2579_v19 }
 0x4d5   :  { %v8101_v63 = vpop.f32.mrb[38].mxu0 }
 0x4d6   :  { %v2589_v52 = vpop.f32.mrb[39].mxu0 }
 0x4d7   :  { %8759 = vrot.lane.b32.xlu1 %v8763_v58, %s9069_s23  ;;  %v8783_v0 = vpack.i.bf16 %v8101_v63, %v2589_v52  ;;  %v9575_v1 = vpack.c.bf16 %v8101_v63, %v2589_v52 }
 0x4db   :  { %8764 = vrot.lane.b32.xlu1 %v8763_v58, %s9071_s1 }
 0x4df   :  { %8779 = vrot.lane.b32.xlu1 %v8783_v0, %s9069_s23 }
 0x4e3   :  { %8784 = vrot.lane.b32.xlu1 %v8783_v0, %s9071_s1 }
 0x4ea   :  { %v2072_v56 = vpop.f32.mrb[24].mxu1 }
 0x4eb   :  { %v8063_v3 = vpop.f32.mrb[25].mxu1  ;;  %2166 = vrot.lane.b32.xlu0 %v2072_v56, %s9073_s0 }
 0x4ef   :  { %8739 = vrot.lane.b32.xlu0 %v8743_v40, %s9069_s23 }
 0x4f3   :  { %8749 = vrot.lane.b32.xlu0 %v8753_v53, %s9069_s23 }
 0x4f7   :  { %8754 = vrot.lane.b32.xlu0 %v8753_v53, %s9071_s1 }
 0x4fb   :  { %8769 = vrot.lane.b32.xlu0 %v8773_v61, %s9069_s23 }
 0x4ff   :  { %8774 = vrot.lane.b32.xlu0 %v8773_v61, %s9071_s1 }
 0x51b   :  { %v2161_v4 = vpop.permute.xlu1 %2160 }
 0x51c   :  { %v2177_v8 = vsel %vm185_vm2, %v9548_v29, %v2161_v4  ;;  %v3152_v4 = vld [vmem:[%s10849_s7] sm:$0xff]  ;;  %s9077_s7 = smov 32  }
 0x535   :  { %v2159_v5 = vpop.permute.xlu0 %2158 }
 0x536   :  { %v2176_v7 = vsel %vm185_vm2, %v9550_v16, %v2159_v5 }
 0x537   :  { %8073 = vmatprep.mubr.msk.f32.mxu1 %vm51_vm0, %v2176_v7 }
 0x538   :  { %8074 = vmatmul.mubr.msk.f32.vlgmr.msra.gmra.mrb[26].mxu1 %vm51_vm0, %v2177_v8 }
 0x539   :  { %8495 = vmatpush3.bf16.msra.mxu1 %v8492_v46  ;;  %v2163_v6 = vpop.permute.xlu1 %2162  ;;  %v8730_v10 = vpop.permute.xlu0 %8729 }
 0x53a   :  { %v2178_v12 = vsel %vm185_vm2, %v9557_v39, %v2163_v6  ;;  %v8732_v14 = vunpack.i.h.bf16 %v8730_v10  ;;  %v8731_v20 = vunpack.i.l.bf16 %v8730_v10 }
 0x53b   :  { %8076 = vmatprep.mubr.msk.f32.mxu1 %vm51_vm0, %v2178_v12 }
 0x53c   :  { %v8496_v22 = vpack.c.bf16 %v8732_v14, %v8731_v20 }
 0x53d   :  { %v8735_v24 = vpop.permute.xlu1 %8734  ;;  %v2165_v25 = vpop.permute.xlu0 %2164 }
 0x53e   :  { %v8737_v26 = vunpack.i.h.bf16 %v8735_v24  ;;  %v8736_v28 = vunpack.i.l.bf16 %v8735_v24  ;;  %v2179_v29 = vsel %vm185_vm2, %v9552_v32, %v2165_v25  ;;  %8497 = vmatprep.subr.bf16.mxu1 %v8496_v22 }
 0x53f   :  { %8077 = vmatmul.mubr.msk.f32.gmra.mrb[28].mxu1 %vm51_vm0, %v2179_v29 }
 0x540   :  { %8499 = vmatpush3.bf16.msra.mxu1 %v8496_v22  ;;  %v8500_v31 = vpack.c.bf16 %v8737_v26, %v8736_v28 }
 0x541   :  { %v2169_v16 = vpop.permute.xlu1 %2168 }
 0x542   :  { %8501 = vmatprep.subr.bf16.mxu1 %v8500_v31  ;;  %v2181_v21 = vsel %vm185_vm2, %v9554_v33, %v2169_v16 }
 0x544   :  { %8503 = vmatpush3.bf16.msra.mxu1 %v8500_v31 }
 0x545   :  { %8505 = vmatprep.subr.bf16.mxu1 %v9564_v49  ;;  %v8745_v32 = vpop.permute.xlu1 %8744 }
 0x546   :  { %v8747_v39 = vunpack.i.h.bf16 %v8745_v32  ;;  %v8746_v41 = vunpack.i.l.bf16 %v8745_v32 }
 0x548   :  { %v8512_v43 = vpack.c.bf16 %v8747_v39, %v8746_v41 }
 0x549   :  { %v8760_v37 = vpop.permute.xlu1 %8759 }
 0x54a   :  { %v8762_v46 = vunpack.i.h.bf16 %v8760_v37  ;;  %v8761_v36 = vunpack.i.l.bf16 %v8760_v37 }
 0x54c   :  { %v8532_v50 = vpack.c.bf16 %v8762_v46, %v8761_v36 }
 0x54d   :  { %v8765_v34 = vpop.permute.xlu1 %8764 }
 0x54e   :  { %v8767_v51 = vunpack.i.h.bf16 %v8765_v34  ;;  %v8766_v53 = vunpack.i.l.bf16 %v8765_v34 }
 0x550   :  { %v8536_v19 = vpack.c.bf16 %v8767_v51, %v8766_v53 }
 0x551   :  { %v8780_v60 = vpop.permute.xlu1 %8779 }
 0x552   :  { %v8781_v63 = vunpack.i.l.bf16 %v8780_v60 }
 0x555   :  { %v8785_v52 = vpop.permute.xlu1 %8784 }
 0x556   :  { %v8786_v56 = vunpack.i.l.bf16 %v8785_v52 }
 0x55d   :  { %v2167_v11 = vpop.permute.xlu0 %2166 }
 0x55e   :  { %v2180_v13 = vsel %vm185_vm2, %v9559_v42, %v2167_v11 }
 0x55f   :  { %8079 = vmatprep.mubr.msk.f32.mxu1 %vm51_vm0, %v2180_v13 }
 0x560   :  { %8080 = vmatmul.mubr.msk.f32.gmra.mrb[30].mxu1 %vm51_vm0, %v2181_v21 }
 0x561   :  { %v8740_v35 = vpop.permute.xlu0 %8739  ;;  %8114 = vmatprep.mubr.msk.f32.mxu1 %vm2413_vm3, %v9583_v2 }
 0x562   :  { %v8742_v30 = vunpack.i.h.bf16 %v8740_v35  ;;  %v8741_v38 = vunpack.i.l.bf16 %v8740_v35 }
 0x564   :  { %8115 = vmatmul.mubr.msk.f32.vlgmr.msra.gmra.mrb[32].mxu1 %vm2413_vm3, %v9617_v18  ;;  %v8508_v33 = vpack.c.bf16 %v8742_v30, %v8741_v38 }
 0x565   :  { %8507 = vmatpush3.bf16.msra.mxu1 %v9564_v49  ;;  %v8750_v15 = vpop.permute.xlu0 %8749  ;;  %8129 = vmatprep.mubr.msk.f32.mxu1 %vm2413_vm3, %v9583_v2 }
 0x566   :  { %v8752_v42 = vunpack.i.h.bf16 %v8750_v15  ;;  %v8751_v23 = vunpack.i.l.bf16 %v8750_v15  ;;  %8509 = vmatprep.subr.bf16.mxu1 %v8508_v33 }
 0x568   :  { %v8520_v44 = vpack.c.bf16 %v8752_v42, %v8751_v23 }
 0x569   :  { %8511 = vmatpush3.bf16.msra.mxu1 %v8508_v33  ;;  %v8755_v17 = vpop.permute.xlu0 %8754 }
 0x56a   :  { %8513 = vmatprep.subr.bf16.mxu1 %v8512_v43  ;;  %v8757_v45 = vunpack.i.h.bf16 %v8755_v17  ;;  %v8756_v27 = vunpack.i.l.bf16 %v8755_v17  ;;  %8521 = vmatprep.subr.bf16.mxu0 %v8520_v44 }
 0x56b   :  { %8523 = vmatpush3.bf16.msra.mxu0 %v8520_v44 }
 0x56c   :  { %v8524_v47 = vpack.c.bf16 %v8757_v45, %v8756_v27 }
 0x56d   :  { %8515 = vmatpush3.bf16.msra.mxu1 %v8512_v43  ;;  %v8770_v48 = vpop.permute.xlu0 %8769 }
 0x56e   :  { %8529 = vmatprep.subr.bf16.mxu1 %v9569_v59  ;;  %8525 = vmatprep.subr.bf16.mxu0 %v8524_v47  ;;  %v8772_v40 = vunpack.i.h.bf16 %v8770_v48  ;;  %v8771_v49 = vunpack.i.l.bf16 %v8770_v48 }
 0x56f   :  { %8527 = vmatpush3.bf16.msra.mxu0 %v8524_v47 }
 0x570   :  { %8130 = vmatmul.mubr.msk.f32.vlgmr.msra.gmra.mrb[34].mxu1 %vm2413_vm3, %v9617_v18  ;;  %8541 = vmatprep.subr.bf16.mxu0 %v9572_v62  ;;  %v8544_v54 = vpack.c.bf16 %v8772_v40, %v8771_v49 }
 0x571   :  { %8531 = vmatpush3.bf16.msra.mxu1 %v9569_v59  ;;  %v8775_v55 = vpop.permute.xlu0 %8774  ;;  %8159 = vmatprep.mubr.msk.f32.mxu1 %vm2413_vm3, %v9583_v2  ;;  %v8782_v59 = vunpack.i.h.bf16 %v8780_v60 }
 0x572   :  { %8145 = vmatmul.mubr.msk.f32.vlgmr.msra.gmra.mrb[40].mxu0 %vm2413_vm3, %v9617_v18  ;;  %8533 = vmatprep.subr.bf16.mxu1 %v8532_v50  ;;  %v8777_v57 = vunpack.i.h.bf16 %v8775_v55  ;;  %v8776_v58 = vunpack.i.l.bf16 %v8775_v55 }
 0x573   :  { %8543 = vmatpush3.bf16.msra.mxu0 %v9572_v62  ;;  %8174 = vmatprep.mubr.msk.f32.mxu0 %vm2413_vm3, %v9583_v2  ;;  %v8556_v0 = vpack.c.bf16 %v8782_v59, %v8781_v63  ;;  %v8787_v62 = vunpack.i.h.bf16 %v8785_v52 }
 0x574   :  { %8545 = vmatprep.subr.bf16.mxu0 %v8544_v54  ;;  %v8548_v61 = vpack.c.bf16 %v8777_v57, %v8776_v58 }
 0x575   :  { %8535 = vmatpush3.bf16.msra.mxu1 %v8532_v50  ;;  %v8560_v3 = vpack.c.bf16 %v8787_v62, %v8786_v56 }
 0x576   :  { %8537 = vmatprep.subr.bf16.mxu1 %v8536_v19 }
 0x577   :  { %8547 = vmatpush3.bf16.msra.mxu0 %v8544_v54 }
 0x578   :  { %8549 = vmatprep.subr.bf16.mxu0 %v8548_v61 }
 0x579   :  { %8539 = vmatpush3.bf16.msra.mxu1 %v8536_v19 }
 0x57a   :  { %8553 = vmatprep.subr.bf16.mxu1 %v9575_v1 }
 0x57b   :  { %8551 = vmatpush3.bf16.msra.mxu0 %v8548_v61 }
 0x57c   :  { %8160 = vmatmul.mubr.msk.f32.vlgmr.msra.gmra.mrb[36].mxu1 %vm2413_vm3, %v9617_v18  ;;  %8192 = vmatprep.subr.mxu0 %v3152_v4 }
 0x57d   :  { %8555 = vmatpush3.bf16.msra.mxu1 %v9575_v1  ;;  %8189 = vmatprep.mubr.msk.f32.mxu1 %vm2413_vm3, %v9583_v2 }
 0x57e   :  { %8557 = vmatprep.subr.bf16.mxu1 %v8556_v0  ;;  %8175 = vmatmul.mubr.msk.f32.vlgmr.msra.gmra.mrb[42].mxu0 %vm2413_vm3, %v9617_v18 }
 0x57f   :  { %8193 = vmatpush3.msra.mxu0 %v3152_v4 }
 0x581   :  { %8559 = vmatpush3.bf16.msra.mxu1 %v8556_v0 }
 0x582   :  { %8561 = vmatprep.subr.bf16.mxu1 %v8560_v3 }
 0x585   :  { %8563 = vmatpush3.bf16.msra.mxu1 %v8560_v3 }
 0x588   :  { %8190 = vmatmul.mubr.msk.f32.vlgmr.msra.gmra.mrb[38].mxu1 %vm2413_vm3, %v9617_v18 }
 0x60b   :  { %v8075_v1 = vpop.f32.mrb[26].mxu1 }
 0x60c   :  { %v2266_v2 = vpop.f32.mrb[27].mxu1  ;;  %v2331_v5 = vrot.slane %v8075_v1, 1  ;;  %v2344_v7 = vrot.slane %v8075_v1, 2  ;;  %v2357_v8 = vrot.slane %v8075_v1, 3  ;;  %v2370_v6 = vrot.slane %v8075_v1, 4 }
 0x60d   :  { %v2317_v10 = vrot.slane %v2266_v2, 1  ;;  %v2330_v12 = vrot.slane %v2266_v2, 2  ;;  %v2343_v14 = vrot.slane %v2266_v2, 3  ;;  %v2356_v20 = vrot.slane %v2266_v2, 4 }
 0x60e   :  { %v2369_v22 = vrot.slane %v2266_v2, 5  ;;  %v2382_v24 = vrot.slane %v2266_v2, 6  ;;  %v2383_v25 = vrot.slane %v8075_v1, 5  ;;  %v2396_v26 = vrot.slane %v2266_v2, 7 }
 0x60f   :  { %v2318_v28 = vsel %vm2302_vm4, %v8075_v1, %v2317_v10  ;;  %v2332_v29 = vsel %vm2302_vm4, %v2331_v5, %v2330_v12  ;;  %v2345_v31 = vsel %vm2302_vm4, %v2344_v7, %v2343_v14  ;;  %v2358_v16 = vsel %vm2302_vm4, %v2357_v8, %v2356_v20 }
 0x610   :  { %v2371_v11 = vsel %vm2302_vm4, %v2370_v6, %v2369_v22  ;;  %v2384_v13 = vsel %vm2302_vm4, %v2383_v25, %v2382_v24  ;;  %v2397_v21 = vrot.slane %v8075_v1, 6  ;;  %v2301_v32 = vrot.slane %v8075_v1, 7 }
 0x612   :  { %v8078_v35 = vpop.f32.mrb[28].mxu1  ;;  %v2398_v18 = vsel %vm2302_vm4, %v2397_v21, %v2396_v26  ;;  %v2303_v30 = vsel %vm2302_vm4, %v2301_v32, %v2266_v2 }
 0x613   :  { %v2276_v38 = vpop.f32.mrb[29].mxu1  ;;  %v2321_v39 = vrot.slane %v8078_v35, 6  ;;  %v2334_v41 = vrot.slane %v8078_v35, 7  ;;  %v2361_v33 = vrot.slane %v8078_v35, 1  ;;  %v2374_v15 = vrot.slane %v8078_v35, 2 }
 0x614   :  { %v2319_v42 = vrot.slane %v2276_v38, 7  ;;  %v2333_v23 = vsel %vm2305_vm5, %v2276_v38, %v2332_v29  ;;  %v2346_v37 = vrot.slane %v2276_v38, 1  ;;  %v2359_v43 = vrot.slane %v2276_v38, 2 }
 0x615   :  { %v2335_v44 = vsel %vm2308_vm6, %v2334_v41, %v2333_v23  ;;  %v2372_v17 = vrot.slane %v2276_v38, 3  ;;  %v2385_v45 = vrot.slane %v2276_v38, 4  ;;  %v2387_v27 = vrot.slane %v8078_v35, 3 }
 0x616   :  { %v2320_v46 = vsel %vm2305_vm5, %v2319_v42, %v2318_v28  ;;  %v2347_v36 = vsel %vm2305_vm5, %v2346_v37, %v2345_v31  ;;  %v2360_v47 = vsel %vm2305_vm5, %v2359_v43, %v2358_v16  ;;  %v2399_v34 = vrot.slane %v2276_v38, 5 }
 0x617   :  { %v2322_v48 = vsel %vm2308_vm6, %v2321_v39, %v2320_v46  ;;  %v2348_v40 = vsel %vm2308_vm6, %v8078_v35, %v2347_v36  ;;  %v2362_v49 = vsel %vm2308_vm6, %v2361_v33, %v2360_v47  ;;  %v2373_v50 = vsel %vm2305_vm5, %v2372_v17, %v2371_v11 }
 0x618   :  { %v2375_v51 = vsel %vm2308_vm6, %v2374_v15, %v2373_v50  ;;  %v2386_v53 = vsel %vm2305_vm5, %v2385_v45, %v2384_v13  ;;  %v2400_v54 = vsel %vm2305_vm5, %v2399_v34, %v2398_v18  ;;  %v2401_v55 = vrot.slane %v8078_v35, 4 }
 0x619   :  { %v2388_v57 = vsel %vm2308_vm6, %v2387_v27, %v2386_v53  ;;  %v2304_v58 = vrot.slane %v2276_v38, 6  ;;  %v2307_v19 = vrot.slane %v8078_v35, 5 }
 0x61a   :  { %v2402_v60 = vsel %vm2308_vm6, %v2401_v55, %v2400_v54 }
 0x61b   :  { %v2306_v61 = vsel %vm2305_vm5, %v2304_v58, %v2303_v30 }
 0x61c   :  { %v2309_v59 = vsel %vm2308_vm6, %v2307_v19, %v2306_v61 }
 0x633   :  { %v8081_v63 = vpop.f32.mrb[30].mxu1 }
 0x634   :  { %v2286_v52 = vpop.f32.mrb[31].mxu1  ;;  %v2325_v0 = vrot.slane %v8081_v63, 4  ;;  %v2338_v62 = vrot.slane %v8081_v63, 5  ;;  %v2351_v56 = vrot.slane %v8081_v63, 6  ;;  %v2364_v3 = vrot.slane %v8081_v63, 7 }
 0x635   :  { %v2323_v4 = vrot.slane %v2286_v52, 5  ;;  %v2336_v1 = vrot.slane %v2286_v52, 6  ;;  %v2349_v2 = vrot.slane %v2286_v52, 7  ;;  %v2363_v5 = vsel %vm2311_vm7, %v2286_v52, %v2362_v49 }
 0x636   :  { %v9675_v7 = vsel %vm2314_vm8, %v2364_v3, %v2363_v5  ;;  %v2376_v8 = vrot.slane %v2286_v52, 1  ;;  %v2389_v6 = vrot.slane %v2286_v52, 2  ;;  %v2391_v10 = vrot.slane %v8081_v63, 1 }
 0x637   :  { %v8116_v12 = vpop.f32.mrb[32].mxu1  ;;  %v2324_v14 = vsel %vm2311_vm7, %v2323_v4, %v2322_v48  ;;  %v2337_v20 = vsel %vm2311_vm7, %v2336_v1, %v2335_v44  ;;  %v2350_v22 = vsel %vm2311_vm7, %v2349_v2, %v2348_v40  ;;  %v2403_v24 = vrot.slane %v2286_v52, 3 }
 0x638   :  { %v3141_v25 = vmax.f32 %v8116_v12, 0.0  ;;  %v2756_v26 = vpop.f32.mrb[33].mxu1  ;;  %v9681_v28 = vsel %vm2314_vm8, %v2325_v0, %v2324_v14  ;;  %v9684_v29 = vsel %vm2314_vm8, %v2338_v62, %v2337_v20  ;;  %v9687_v31 = vsel %vm2314_vm8, %v2351_v56, %v2350_v22 }
 0x639   :  { %v3140_v16 = vmax.f32 %v2756_v26, 0.0  ;;  %v2377_v11 = vsel %vm2311_vm7, %v2376_v8, %v2375_v51  ;;  %v2390_v13 = vsel %vm2311_vm7, %v2389_v6, %v2388_v57  ;;  %v2404_v21 = vsel %vm2311_vm7, %v2403_v24, %v2402_v60 }
 0x63a   :  { %v9693_v32 = vsel %vm2314_vm8, %v8081_v63, %v2377_v11  ;;  %v9696_v35 = vsel %vm2314_vm8, %v2391_v10, %v2390_v13  ;;  %v2405_v18 = vrot.slane %v8081_v63, 2  ;;  %v2310_v30 = vrot.slane %v2286_v52, 4 }
 0x63b   :  { %8194 = vmatprep.mubr.msk.f32.mxu0 %vm185_vm2, %v3140_v16  ;;  %v2313_v38 = vrot.slane %v8081_v63, 3 }
 0x63c   :  { %8195 = vmatmul.mubr.msk.f32.vlgmr.msra.gmra.mrb[44].mxu0 %vm185_vm2, %v3141_v25  ;;  %v9701_v39 = vsel %vm2314_vm8, %v2405_v18, %v2404_v21  ;;  %v2312_v41 = vsel %vm2311_vm7, %v2310_v30, %v2309_v59 }
 0x63d   :  { %v9705_v33 = vsel %vm2314_vm8, %v2313_v38, %v2312_v41 }
 0x643   :  { %v8131_v15 = vpop.f32.mrb[34].mxu1 }
 0x644   :  { %v3143_v42 = vmax.f32 %v8131_v15, 0.0  ;;  %v2831_v23 = vpop.f32.mrb[35].mxu1 }
 0x645   :  { %v3142_v37 = vmax.f32 %v2831_v23, 0.0  ;;  %v8146_v43 = vpop.f32.mrb[40].mxu0 }
 0x646   :  { %v2906_v44 = vpop.f32.mrb[41].mxu0  ;;  %v3145_v45 = vmax.f32 %v8146_v43, 0.0 }
 0x647   :  { %8197 = vmatprep.mubr.msk.f32.mxu0 %vm185_vm2, %v3142_v37  ;;  %v3144_v17 = vmax.f32 %v2906_v44, 0.0 }
 0x648   :  { %8198 = vmatmul.mubr.msk.f32.gmra.mrb[46].mxu0 %vm185_vm2, %v3143_v42 }
 0x649   :  { %8200 = vmatprep.mubr.msk.f32.mxu0 %vm185_vm2, %v3144_v17 }
 0x64c   :  { %8201 = vmatmul.mubr.msk.f32.gmra.mrb[48].mxu0 %vm185_vm2, %v3145_v45 }
 0x64f   :  { %v8161_v27 = vpop.f32.mrb[36].mxu1 }
 0x650   :  { %v3147_v46 = vmax.f32 %v8161_v27, 0.0  ;;  %v2981_v36 = vpop.f32.mrb[37].mxu1 }
 0x651   :  { %v3146_v47 = vmax.f32 %v2981_v36, 0.0  ;;  %v8176_v34 = vpop.f32.mrb[42].mxu0 }
 0x652   :  { %v3056_v48 = vpop.f32.mrb[43].mxu0  ;;  %v3149_v49 = vmax.f32 %v8176_v34, 0.0 }
 0x653   :  { %8203 = vmatprep.mubr.msk.f32.mxu0 %vm185_vm2, %v3146_v47  ;;  %v3148_v40 = vmax.f32 %v3056_v48, 0.0 }
 0x654   :  { %8204 = vmatmul.mubr.msk.f32.gmra.mrb[50].mxu0 %vm185_vm2, %v3147_v46 }
 0x655   :  { %8206 = vmatprep.mubr.msk.f32.mxu0 %vm185_vm2, %v3148_v40 }
 0x658   :  { %8207 = vmatmul.mubr.msk.f32.gmra.mrb[52].mxu0 %vm185_vm2, %v3149_v49 }
 0x65b   :  { %v8191_v50 = vpop.f32.mrb[38].mxu1 }
 0x65c   :  { %v3131_v51 = vpop.f32.mrb[39].mxu1  ;;  %v3151_v54 = vmax.f32 %v8191_v50, 0.0 }
 0x65d   :  { %v3150_v53 = vmax.f32 %v3131_v51, 0.0 }
 0x65f   :  { %8209 = vmatprep.mubr.msk.f32.mxu0 %vm185_vm2, %v3150_v53 }
 0x660   :  { %8210 = vmatmul.mubr.msk.f32.gmra.mrb[54].mxu0 %vm185_vm2, %v3151_v54 }
 0x70f   :  { %v9717_v55 = vpop.f32.mrb[44].mxu0 }
 0x710   :  { %v3257_v57 = vpop.f32.mrb[45].mxu0 }
 0x711   :  { %v9720_v58 = vpack.i.bf16 %v9717_v55, %v3257_v57  ;;  %8216 = vmatprep.mubr.msk.f32.mxu1 %vm185_vm2, %v3257_v57 }
 0x71b   :  { %v9723_v60 = vpop.f32.mrb[46].mxu0 }
 0x71c   :  { %v9725_v19 = vpop.f32.mrb[47].mxu0  ;;  %3334 = vrot.lane.b32.xlu1 %v9723_v60, %s9069_s23 }
 0x71d   :  { %v9731_v61 = vpack.i.bf16 %v9723_v60, %v9725_v19  ;;  %3332 = vrot.lane.b32.xlu0 %v9725_v19, %s9069_s23 }
 0x71f   :  { %v9735_v59 = vpop.f32.mrb[48].mxu0 }
 0x720   :  { %v3277_v63 = vpop.f32.mrb[49].mxu0 }
 0x721   :  { %v9738_v52 = vpack.i.bf16 %v9735_v59, %v3277_v63  ;;  %8230 = vmatprep.mubr.msk.f32.mxu0 %vm185_vm2, %v3277_v63 }
 0x727   :  { %v9741_v0 = vpop.f32.mrb[50].mxu0 }
 0x728   :  { %v3287_v62 = vpop.f32.mrb[51].mxu0  ;;  %3342 = vrot.lane.b32.xlu1 %v9741_v0, %s9069_s23 }
 0x729   :  { %v9746_v56 = vpack.i.bf16 %v9741_v0, %v3287_v62  ;;  %3340 = vrot.lane.b32.xlu0 %v3287_v62, %s9069_s23 }
 0x72b   :  { %v9749_v3 = vpop.f32.mrb[52].mxu0 }
 0x72c   :  { %v9751_v4 = vpop.f32.mrb[53].mxu0 }
 0x72d   :  { %v9755_v1 = vpack.i.bf16 %v9749_v3, %v9751_v4 }
 0x733   :  { %v8211_v2 = vpop.f32.mrb[54].mxu0 }
 0x734   :  { %3350 = vrot.lane.b32.xlu1 %v8211_v2, %s9069_s23  ;;  %v3307_v5 = vpop.f32.mrb[55].mxu0 }
 0x735   :  { %v9758_v8 = vpack.i.bf16 %v8211_v2, %v3307_v5  ;;  %3348 = vrot.lane.b32.xlu0 %v3307_v5, %s9069_s23 }
 0x738   :  { %8794 = vrot.lane.b32.xlu1 %v9731_v61, %s9071_s1 }
 0x739   :  { %8789 = vrot.lane.b32.xlu0 %v9720_v58, %s9071_s1 }
 0x73c   :  { %8804 = vrot.lane.b32.xlu1 %v9758_v8, %s9071_s1 }
 0x73d   :  { %8799 = vrot.lane.b32.xlu0 %v9746_v56, %s9071_s1 }
 0x78e   :  { %v3335_v6 = vpop.permute.xlu1 %3334 }
 0x78f   :  { %v3333_v10 = vpop.permute.xlu0 %3332 }
 0x790   :  { %v9769_v12 = vpack.i.bf16 %v3335_v6, %v3333_v10 }
 0x792   :  { %8809 = vrot.lane.b32.xlu0 %v9769_v12, %s9071_s1 }
 0x79a   :  { %v9773_v14 = vpop.permute.xlu1 %3342 }
 0x79b   :  { %v3341_v20 = vpop.permute.xlu0 %3340 }
 0x79c   :  { %v9776_v22 = vpack.i.bf16 %v9773_v14, %v3341_v20 }
 0x79e   :  { %8814 = vrot.lane.b32.xlu1 %v9776_v22, %s9071_s1 }
 0x7a2   :  { %3328 = vrot.lane.b32.xlu1 %v3257_v57, %s9069_s23 }
 0x7a6   :  { %v9781_v24 = vpop.permute.xlu1 %3350  ;;  %3336 = vrot.lane.b32.xlu1 %v3277_v63, %s9069_s23 }
 0x7a7   :  { %v9784_v25 = vpop.permute.xlu0 %3348 }
 0x7a8   :  { %v9788_v26 = vpack.i.bf16 %v9781_v24, %v9784_v25 }
 0x7aa   :  { %v8795_v16 = vpop.permute.xlu1 %8794  ;;  %3344 = vrot.lane.b32.xlu1 %v9751_v4, %s9069_s23  ;;  %8819 = vrot.lane.b32.xlu0 %v9788_v26, %s9071_s1 }
 0x7ab   :  { %v8790_v11 = vpop.permute.xlu0 %8789  ;;  %v8797_v13 = vunpack.i.h.bf16 %v8795_v16  ;;  %v8796_v21 = vunpack.i.l.bf16 %v8795_v16 }
 0x7ac   :  { %v8792_v18 = vunpack.i.h.bf16 %v8790_v11  ;;  %v8791_v30 = vunpack.i.l.bf16 %v8790_v11 }
 0x7ad   :  { %v8570_v15 = vpack.c.bf16 %v8797_v13, %v8796_v21 }
 0x7ae   :  { %v8564_v41 = vpack.c.bf16 %v8792_v18, %v8791_v30  ;;  %8824 = vrot.lane.b32.xlu1 %v9738_v52, %s9071_s1  ;;  %3330 = vrot.lane.b32.xlu0 %v9717_v55, %s9069_s23  ;;  %v8805_v44 = vpop.permute.xlu1 %8804 }
 0x7af   :  { %v8800_v42 = vpop.permute.xlu0 %8799  ;;  %v8807_v17 = vunpack.i.h.bf16 %v8805_v44  ;;  %v8806_v45 = vunpack.i.l.bf16 %v8805_v44 }
 0x7b0   :  { %8566 = vmatprep.subr.msk.bf16.mxu1 %vm9796_vm9, %v8564_v41  ;;  %v8802_v23 = vunpack.i.h.bf16 %v8800_v42  ;;  %v8801_v37 = vunpack.i.l.bf16 %v8800_v42 }
 0x7b1   :  { %8569 = vmatpush3.bf16.xpose.msk.msra.mxu1 %vm9796_vm9, %v8564_v41  ;;  %v8594_v27 = vpack.c.bf16 %v8807_v17, %v8806_v45 }
 0x7b2   :  { %3338 = vrot.lane.b32.xlu0 %v9735_v59, %s9069_s23  ;;  %8572 = vmatprep.subr.msk.bf16.mxu1 %vm9796_vm9, %v8570_v15  ;;  %v8582_v43 = vpack.c.bf16 %v8802_v23, %v8801_v37 }
 0x7b6   :  { %3346 = vrot.lane.b32.xlu0 %v9749_v3, %s9069_s23 }
 0x7b8   :  { %8217 = vmatmul.mubr.msk.f32.vlgmr.msra.gmra.mrb[40].mxu1 %vm185_vm2, %v9717_v55 }
 0x7b9   :  { %8575 = vmatpush3.bf16.xpose.msk.msra.mxu1 %vm9796_vm9, %v8570_v15  ;;  %8223 = vmatprep.mubr.msk.f32.mxu1 %vm185_vm2, %v9725_v19 }
 0x7ba   :  { %8829 = vrot.lane.b32.xlu0 %v9755_v1, %s9071_s1  ;;  %8584 = vmatprep.subr.msk.bf16.mxu1 %vm9796_vm9, %v8582_v43 }
 0x7c0   :  { %8224 = vmatmul.mubr.msk.f32.vlgmr.msra.gmra.mrb[42].mxu1 %vm185_vm2, %v9723_v60 }
 0x7c1   :  { %8587 = vmatpush3.bf16.xpose.msk.msra.mxu1 %vm9796_vm9, %v8582_v43  ;;  %8237 = vmatprep.mubr.msk.f32.mxu1 %vm185_vm2, %v3287_v62 }
 0x7c2   :  { %8596 = vmatprep.subr.msk.bf16.mxu1 %vm9796_vm9, %v8594_v27 }
 0x7c8   :  { %8238 = vmatmul.mubr.msk.f32.vlgmr.msra.gmra.mrb[44].mxu1 %vm185_vm2, %v9741_v0 }
 0x7c9   :  { %8599 = vmatpush3.bf16.xpose.msk.msra.mxu1 %vm9796_vm9, %v8594_v27  ;;  %8251 = vmatprep.mubr.msk.f32.mxu1 %vm185_vm2, %v3307_v5 }
 0x7d0   :  { %8252 = vmatmul.mubr.msk.f32.vlgmr.msra.gmra.mrb[46].mxu1 %vm185_vm2, %v8211_v2 }
 0x7d1   :  { %8265 = vmatprep.mubr.msk.f32.mxu1 %vm185_vm2, %v3333_v10 }
 0x804   :  { %v8810_v46 = vpop.permute.xlu0 %8809 }
 0x805   :  { %v8812_v36 = vunpack.i.h.bf16 %v8810_v46  ;;  %v8811_v47 = vunpack.i.l.bf16 %v8810_v46 }
 0x807   :  { %v8606_v34 = vpack.c.bf16 %v8812_v36, %v8811_v47 }
 0x809   :  { %8608 = vmatprep.subr.msk.bf16.mxu1 %vm9796_vm9, %v8606_v34 }
 0x80a   :  { %8611 = vmatpush3.bf16.xpose.msk.msra.mxu1 %vm9796_vm9, %v8606_v34 }
 0x810   :  { %v8815_v48 = vpop.permute.xlu1 %8814 }
 0x811   :  { %v8817_v40 = vunpack.i.h.bf16 %v8815_v48  ;;  %v8816_v49 = vunpack.i.l.bf16 %v8815_v48  ;;  %8266 = vmatmul.mubr.msk.f32.vlgmr.msra.gmra.mrb[48].mxu1 %vm185_vm2, %v3335_v6 }
 0x812   :  { %8279 = vmatprep.mubr.msk.f32.mxu1 %vm185_vm2, %v3341_v20 }
 0x813   :  { %v8618_v50 = vpack.c.bf16 %v8817_v40, %v8816_v49 }
 0x814   :  { %v3329_v51 = vpop.permute.xlu1 %3328 }
 0x815   :  { %8620 = vmatprep.subr.msk.bf16.mxu1 %vm9796_vm9, %v8618_v50 }
 0x816   :  { %8623 = vmatpush3.bf16.xpose.msk.msra.mxu1 %vm9796_vm9, %v8618_v50 }
 0x818   :  { %v9848_v53 = vpop.permute.xlu1 %3336 }
 0x81c   :  { %v9850_v54 = vpop.permute.xlu1 %3344  ;;  %v8820_v55 = vpop.permute.xlu0 %8819 }
 0x81d   :  { %v8822_v57 = vunpack.i.h.bf16 %v8820_v55  ;;  %v8821_v60 = vunpack.i.l.bf16 %v8820_v55  ;;  %8280 = vmatmul.mubr.msk.f32.vlgmr.msra.gmra.mrb[50].mxu1 %vm185_vm2, %v9773_v14 }
 0x81e   :  { %8293 = vmatprep.mubr.msk.f32.mxu1 %vm185_vm2, %v9784_v25 }
 0x81f   :  { %v8630_v19 = vpack.c.bf16 %v8822_v57, %v8821_v60 }
 0x820   :  { %v8825_v63 = vpop.permute.xlu1 %8824  ;;  %v9856_v0 = vpop.permute.xlu0 %3330 }
 0x821   :  { %v8827_v62 = vunpack.i.h.bf16 %v8825_v63  ;;  %v8826_v2 = vunpack.i.l.bf16 %v8825_v63  ;;  %8632 = vmatprep.subr.msk.bf16.mxu1 %vm9796_vm9, %v8630_v19  ;;  %v9861_v5 = vpack.i.bf16 %v9856_v0, %v3329_v51 }
 0x822   :  { %8635 = vmatpush3.bf16.xpose.msk.msra.mxu1 %vm9796_vm9, %v8630_v19 }
 0x823   :  { %v8576_v6 = vpack.c.bf16 %v8827_v62, %v8826_v2  ;;  %8834 = vrot.lane.b32.xlu1 %v9861_v5, %s9071_s1 }
 0x824   :  { %v9867_v10 = vpop.permute.xlu0 %3338 }
 0x825   :  { %8578 = vmatprep.subr.msk.bf16.mxu0 %vm9796_vm9, %v8576_v6  ;;  %v9873_v14 = vpack.i.bf16 %v9867_v10, %v9848_v53 }
 0x826   :  { %8581 = vmatpush3.bf16.xpose.msk.msra.mxu0 %vm9796_vm9, %v8576_v6 }
 0x827   :  { %8839 = vrot.lane.b32.xlu0 %v9873_v14, %s9071_s1 }
 0x828   :  { %v9879_v20 = vpop.permute.xlu0 %3346 }
 0x829   :  { %8294 = vmatmul.mubr.msk.f32.vlgmr.msra.gmra.mrb[52].mxu1 %vm185_vm2, %v9781_v24  ;;  %v9885_v25 = vpack.i.bf16 %v9879_v20, %v9850_v54 }
 0x82b   :  { %8844 = vrot.lane.b32.xlu1 %v9885_v25, %s9071_s1 }
 0x82c   :  { %v8830_v16 = vpop.permute.xlu0 %8829 }
 0x82d   :  { %v8832_v11 = vunpack.i.h.bf16 %v8830_v16  ;;  %v8831_v13 = vunpack.i.l.bf16 %v8830_v16  ;;  %8231 = vmatmul.mubr.msk.f32.vlgmr.msra.gmra.mrb[56].mxu0 %vm185_vm2, %v9735_v59 }
 0x82e   :  { %8244 = vmatprep.mubr.msk.f32.mxu0 %vm185_vm2, %v9751_v4 }
 0x82f   :  { %v8588_v21 = vpack.c.bf16 %v8832_v11, %v8831_v13 }
 0x831   :  { %8590 = vmatprep.subr.msk.bf16.mxu0 %vm9796_vm9, %v8588_v21 }
 0x832   :  { %8593 = vmatpush3.bf16.xpose.msk.msra.mxu0 %vm9796_vm9, %v8588_v21 }
 0x839   :  { %8245 = vmatmul.mubr.msk.f32.vlgmr.msra.gmra.mrb[58].mxu0 %vm185_vm2, %v9749_v3 }
 0x83a   :  { %8258 = vmatprep.mubr.msk.f32.mxu0 %vm185_vm2, %v3329_v51 }
 0x88b   :  { %v8218_v24 = vpop.f32.mrb[40].mxu1 }
 0x88c   :  { %v9900_v18 = vmul.f32 0.35355338, %v8218_v24  ;;  %v3430_v30 = vpop.f32.mrb[41].mxu1 }
 0x88d   :  { %v9902_v59 = vmul.f32 0.35355338, %v3430_v30 }
 0x88e   :  { %v4423_v4 = vsel %vm51_vm0, %v9900_v18, -inf }
 0x88f   :  { %4424 = vmax.xlane.f32.xlu1 %v4423_v4  ;;  %v4420_v41 = vsel %vm51_vm0, %v9902_v59, -inf }
 0x890   :  { %4421 = vmax.xlane.f32.xlu0 %v4420_v41 }
 0x893   :  { %v8225_v15 = vpop.f32.mrb[42].mxu1 }
 0x894   :  { %v3517_v42 = vpop.f32.mrb[43].mxu1  ;;  %v9910_v44 = vmul.f32 0.35355338, %v8225_v15 }
 0x895   :  { %v9908_v23 = vmul.f32 0.35355338, %v3517_v42  ;;  %v8835_v3 = vpop.permute.xlu1 %8834 }
 0x896   :  { %v8837_v37 = vunpack.i.h.bf16 %v8835_v3  ;;  %v8836_v43 = vunpack.i.l.bf16 %v8835_v3  ;;  %v4429_v34 = vsel %vm51_vm0, %v9910_v44, -inf }
 0x897   :  { %v4426_v17 = vsel %vm51_vm0, %v9908_v23, -inf }
 0x898   :  { %v8600_v45 = vpack.c.bf16 %v8837_v37, %v8836_v43  ;;  %4427 = vmax.xlane.f32.xlu0 %v4426_v17 }
 0x899   :  { %v8840_v27 = vpop.permute.xlu0 %8839 }
 0x89a   :  { %v8842_v46 = vunpack.i.h.bf16 %v8840_v27  ;;  %v8841_v36 = vunpack.i.l.bf16 %v8840_v27  ;;  %8602 = vmatprep.subr.msk.bf16.mxu0 %vm9796_vm9, %v8600_v45 }
 0x89b   :  { %v8239_v47 = vpop.f32.mrb[44].mxu1  ;;  %8605 = vmatpush3.bf16.xpose.msk.msra.mxu0 %vm9796_vm9, %v8600_v45 }
 0x89c   :  { %v8612_v48 = vpack.c.bf16 %v8842_v46, %v8841_v36  ;;  %v9920_v40 = vmul.f32 0.35355338, %v8239_v47  ;;  %4430 = vmax.xlane.f32.xlu0 %v4429_v34  ;;  %v3691_v49 = vpop.f32.mrb[45].mxu1 }
 0x89d   :  { %v9922_v50 = vmul.f32 0.35355338, %v3691_v49  ;;  %v8845_v51 = vpop.permute.xlu1 %8844 }
 0x89e   :  { %v8847_v55 = vunpack.i.h.bf16 %v8845_v51  ;;  %v8846_v57 = vunpack.i.l.bf16 %v8845_v51  ;;  %8614 = vmatprep.subr.msk.bf16.mxu0 %vm9796_vm9, %v8612_v48  ;;  %v4441_v60 = vsel %vm51_vm0, %v9920_v40, -inf }
 0x89f   :  { %v4438_v19 = vsel %vm51_vm0, %v9922_v50, -inf }
 0x8a0   :  { %4442 = vmax.xlane.f32.xlu0 %v4441_v60  ;;  %4439 = vmax.xlane.f32.xlu1 %v4438_v19  ;;  %v8624_v63 = vpack.c.bf16 %v8847_v55, %v8846_v57 }
 0x8a2   :  { %8259 = vmatmul.mubr.msk.f32.vlgmr.msra.gmra.mrb[60].mxu0 %vm185_vm2, %v9856_v0 }
 0x8a3   :  { %v8253_v62 = vpop.f32.mrb[46].mxu1  ;;  %8617 = vmatpush3.bf16.xpose.msk.msra.mxu0 %vm9796_vm9, %v8612_v48  ;;  %8272 = vmatprep.mubr.msk.f32.mxu0 %vm185_vm2, %v9848_v53 }
 0x8a4   :  { %v9936_v2 = vmul.f32 0.35355338, %v8253_v62  ;;  %v3865_v6 = vpop.f32.mrb[47].mxu1  ;;  %8626 = vmatprep.subr.msk.bf16.mxu0 %vm9796_vm9, %v8624_v63 }
 0x8a5   :  { %v9940_v16 = vmul.f32 0.35355338, %v3865_v6 }
 0x8a6   :  { %v4453_v11 = vsel %vm51_vm0, %v9936_v2, -inf }
 0x8a7   :  { %4454 = vmax.xlane.f32.xlu0 %v4453_v11  ;;  %v4450_v0 = vsel %vm51_vm0, %v9940_v16, -inf }
 0x8a8   :  { %4451 = vmax.xlane.f32.xlu1 %v4450_v0 }
 0x8aa   :  { %8273 = vmatmul.mubr.msk.f32.vlgmr.msra.gmra.mrb[62].mxu0 %vm185_vm2, %v9867_v10 }
 0x8ab   :  { %8629 = vmatpush3.bf16.xpose.msk.msra.mxu0 %vm9796_vm9, %v8624_v63  ;;  %8286 = vmatprep.mubr.msk.f32.mxu0 %vm185_vm2, %v9850_v54 }
 0x8b2   :  { %8287 = vmatmul.mubr.msk.f32.vlgmr.msra.gmra.mrb[64].mxu0 %vm185_vm2, %v9879_v20 }
 0x8e4   :  { %v8267_v53 = vpop.f32.mrb[48].mxu1 }
 0x8e5   :  { %v9954_v13 = vmul.f32 0.35355338, %v8267_v53  ;;  %v4039_v21 = vpop.f32.mrb[49].mxu1 }
 0x8e6   :  { %v9956_v24 = vmul.f32 0.35355338, %v4039_v21 }
 0x8e7   :  { %v4465_v30 = vsel %vm51_vm0, %v9954_v13, -inf }
 0x8e8   :  { %4466 = vmax.xlane.f32.xlu0 %v4465_v30  ;;  %v4462_v38 = vsel %vm51_vm0, %v9956_v24, -inf }
 0x8e9   :  { %4463 = vmax.xlane.f32.xlu1 %v4462_v38 }
 0x8f0   :  { %v8281_v10 = vpop.f32.mrb[50].mxu1 }
 0x8f1   :  { %v9962_v4 = vmul.f32 0.35355338, %v8281_v10  ;;  %v4213_v54 = vpop.f32.mrb[51].mxu1 }
 0x8f2   :  { %v9964_v41 = vmul.f32 0.35355338, %v4213_v54 }
 0x8f3   :  { %v4477_v20 = vsel %vm51_vm0, %v9962_v4, -inf }
 0x8f4   :  { %4478 = vmax.xlane.f32.xlu0 %v4477_v20  ;;  %v4474_v15 = vsel %vm51_vm0, %v9964_v41, -inf }
 0x8f5   :  { %4475 = vmax.xlane.f32.xlu1 %v4474_v15 }
 0x8fc   :  { %v8295_v42 = vpop.f32.mrb[52].mxu1 }
 0x8fd   :  { %v9970_v3 = vmul.f32 0.35355338, %v8295_v42  ;;  %v9972_v37 = vpop.f32.mrb[53].mxu1 }
 0x8ff   :  { %v4489_v43 = vsel %vm51_vm0, %v9970_v3, -inf }
 0x900   :  { %v8232_v17 = vpop.f32.mrb[56].mxu0  ;;  %4490 = vmax.xlane.f32.xlu0 %v4489_v43 }
 0x901   :  { %v9976_v45 = vmul.f32 0.35355338, %v8232_v17  ;;  %v3604_v27 = vpop.f32.mrb[57].mxu0 }
 0x902   :  { %v9978_v46 = vmul.f32 0.35355338, %v3604_v27 }
 0x903   :  { %v4435_v36 = vsel %vm51_vm0, %v9976_v45, -inf }
 0x904   :  { %4436 = vmax.xlane.f32.xlu0 %v4435_v36  ;;  %v4432_v47 = vsel %vm51_vm0, %v9978_v46, -inf }
 0x905   :  { %4433 = vmax.xlane.f32.xlu1 %v4432_v47 }
 0x90c   :  { %v8246_v34 = vpop.f32.mrb[58].mxu0 }
 0x90d   :  { %v9984_v48 = vmul.f32 0.35355338, %v8246_v34  ;;  %v3778_v49 = vpop.f32.mrb[59].mxu0 }
 0x90e   :  { %v9986_v51 = vmul.f32 0.35355338, %v3778_v49 }
 0x90f   :  { %v4447_v55 = vsel %vm51_vm0, %v9984_v48, -inf }
 0x910   :  { %4448 = vmax.xlane.f32.xlu0 %v4447_v55  ;;  %v4444_v57 = vsel %vm51_vm0, %v9986_v51, -inf }
 0x911   :  { %4445 = vmax.xlane.f32.xlu1 %v4444_v57 }
 0x91c   :  { %v4425_v53 = vpop.xlane.xlu1 %4424 }
 0x91d   :  { %v9992_v60 = vpop.xlane.xlu0 %4421  ;;  %v4493_v38 = vsub.f32 %v9900_v18, %v4425_v53 }
 0x91f   :  { %v4518_v42 = vmul.f32 1.442695, %v4493_v38 }
 0x921   :  { %8956 = vpow2.f32 %v4518_v42 }
 0x925   :  { %v9994_v19 = vpop.xlane.xlu0 %4427 }
 0x929   :  { %v4431_v30 = vpop.xlane.xlu0 %4430 }
 0x92a   :  { %v4495_v43 = vsub.f32 %v9910_v44, %v4431_v30 }
 0x92c   :  { %v4522_v18 = vmul.f32 1.442695, %v4495_v43 }
 0x92d   :  { %v4443_v27 = vpop.xlane.xlu0 %4442 }
 0x92e   :  { %v4499_v47 = vsub.f32 %v9920_v40, %v4443_v27  ;;  %8958 = vpow2.f32 %v4522_v18 }
 0x930   :  { %v4530_v44 = vmul.f32 1.442695, %v4499_v47 }
 0x932   :  { %8960 = vpow2.f32 %v4530_v44 }
 0x934   :  { %v4455_v34 = vpop.xlane.xlu0 %4454 }
 0x975   :  { %v8260_v63 = vpop.f32.mrb[60].mxu0 }
 0x976   :  { %v9996_v62 = vmul.f32 0.35355338, %v8260_v63  ;;  %v3952_v6 = vpop.f32.mrb[61].mxu0  ;;  %v4503_v63 = vsub.f32 %v9936_v2, %v4455_v34 }
 0x977   :  { %v9998_v11 = vmul.f32 0.35355338, %v3952_v6  ;;  %v4467_v6 = vpop.xlane.xlu0 %4466 }
 0x978   :  { %v4459_v0 = vsel %vm51_vm0, %v9996_v62, -inf  ;;  %v4507_v40 = vsub.f32 %v9954_v13, %v4467_v6 }
 0x979   :  { %4460 = vmax.xlane.f32.xlu0 %v4459_v0  ;;  %v4456_v21 = vsel %vm51_vm0, %v9998_v11, -inf }
 0x97a   :  { %4457 = vmax.xlane.f32.xlu1 %v4456_v21  ;;  %v4538_v21 = vmul.f32 1.442695, %v4503_v63  ;;  %v4546_v2 = vmul.f32 1.442695, %v4507_v40  ;;  %v4492_v40 = vsub.f32 %v9902_v59, %v9992_v60 }
 0x97c   :  { %8962 = vpow2.f32 %v4538_v21 }
 0x97d   :  { %v8274_v10 = vpop.f32.mrb[62].mxu0  ;;  %8964 = vpow2.f32 %v4546_v2  ;;  %v4440_v2 = vpop.xlane.xlu1 %4439 }
 0x97e   :  { %v10005_v54 = vmul.f32 0.35355338, %v8274_v10  ;;  %v4126_v20 = vpop.f32.mrb[63].mxu0  ;;  %v10025_v10 = vpop.eup %8956 }
 0x97f   :  { %v10007_v15 = vmul.f32 0.35355338, %v4126_v20  ;;  %v4567_v43 = vsel %vm51_vm0, %v10025_v10, 0.0 }
 0x980   :  { %v4471_v17 = vsel %vm51_vm0, %v10005_v54, -inf }
 0x981   :  { %4472 = vmax.xlane.f32.xlu0 %v4471_v17  ;;  %v4468_v36 = vsel %vm51_vm0, %v10007_v15, -inf  ;;  %v4479_v30 = vpop.xlane.xlu0 %4478  ;;  %v10030_v17 = vpop.eup %8958 }
 0x982   :  { %4469 = vmax.xlane.f32.xlu1 %v4468_v36  ;;  %v4511_v20 = vsub.f32 %v9962_v4, %v4479_v30  ;;  %v4573_v36 = vsel %vm51_vm0, %v10030_v17, 0.0  ;;  %v10037_v18 = vpop.eup %8960  ;;  %v4516_v30 = vmul.f32 1.442695, %v4492_v40 }
 0x983   :  { %v4585_v47 = vsel %vm51_vm0, %v10037_v18, 0.0 }
 0x984   :  { %v4554_v13 = vmul.f32 1.442695, %v4511_v20 }
 0x985   :  { %v8288_v49 = vpop.f32.mrb[64].mxu0 }
 0x986   :  { %v4300_v55 = vpop.f32.mrb[65].mxu0  ;;  %v10018_v0 = vmul.f32 0.35355338, %v8288_v49  ;;  %8966 = vpow2.f32 %v4554_v13  ;;  %v10041_v34 = vpop.eup %8962 }
 0x987   :  { %v10015_v57 = vmul.f32 0.35355338, %v4300_v55  ;;  %v10045_v49 = vpop.eup %8964 }
 0x988   :  { %v4483_v38 = vsel %vm51_vm0, %v10018_v0, -inf }
 0x989   :  { %v4480_v53 = vsel %vm51_vm0, %v10015_v57, -inf }
 0x98a   :  { %4481 = vmax.xlane.f32.xlu0 %v4480_v53  ;;  %v10058_v53 = vmul.f32 0.35355338, %v9972_v37  ;;  %v4498_v37 = vsub.f32 %v9922_v50, %v4440_v2 }
 0x98c   :  { %v4486_v21 = vsel %vm51_vm0, %v10058_v53, -inf }
 0x98d   :  { %v4491_v42 = vpop.xlane.xlu0 %4490 }
 0x98e   :  { %4484 = vmax.xlane.f32.xlu0 %v4483_v38  ;;  %v4515_v27 = vsub.f32 %v9970_v3, %v4491_v42  ;;  %v4609_v3 = vsel %vm51_vm0, %v10045_v49, 0.0  ;;  %v4494_v38 = vsub.f32 %v9908_v23, %v9994_v19  ;;  %v4452_v42 = vpop.xlane.xlu1 %4451 }
 0x98f   :  { %v4502_v13 = vsub.f32 %v9940_v16, %v4452_v42 }
 0x990   :  { %v4562_v4 = vmul.f32 1.442695, %v4515_v27  ;;  %v10049_v55 = vpop.eup %8966  ;;  %v4520_v20 = vmul.f32 1.442695, %v4494_v38 }
 0x991   :  { %v4621_v44 = vsel %vm51_vm0, %v10049_v55, 0.0 }
 0x992   :  { %4568 = vadd.xlane.f32.xlu0 %v4567_v43  ;;  %8968 = vpow2.f32 %v4562_v4  ;;  %v4528_v43 = vmul.f32 1.442695, %v4498_v37  ;;  %v4464_v27 = vpop.xlane.xlu1 %4463 }
 0x993   :  { %8849 = vrot.lane.b32.xlu1 %v9720_v58, %s9072_s24  ;;  %v4597_v58 = vsel %vm51_vm0, %v10041_v34, 0.0  ;;  %8970 = vpow2.f32 %v4516_v30 }
 0x994   :  { %8972 = vpow2.f32 %v4520_v20 }
 0x995   :  { %8974 = vpow2.f32 %v4528_v43 }
 0x996   :  { %4574 = vadd.xlane.f32.xlu0 %v4573_v36  ;;  %v4506_v36 = vsub.f32 %v9956_v24, %v4464_v27  ;;  %v4476_v59 = vpop.xlane.xlu1 %4475  ;;  %v4437_v27 = vpop.xlane.xlu0 %4436 }
 0x997   :  { %v4510_v19 = vsub.f32 %v9964_v41, %v4476_v59 }
 0x998   :  { %v4544_v23 = vmul.f32 1.442695, %v4506_v36 }
 0x999   :  { %v4552_v16 = vmul.f32 1.442695, %v4510_v19 }
 0x99a   :  { %4586 = vadd.xlane.f32.xlu0 %v4585_v47  ;;  %v4434_v30 = vpop.xlane.xlu1 %4433 }
 0x99b   :  { %v4496_v36 = vsub.f32 %v9978_v46, %v4434_v30 }
 0x99c   :  { %v10053_v63 = vpop.eup %8968 }
 0x99d   :  { %v4633_v6 = vsel %vm51_vm0, %v10053_v63, 0.0  ;;  %v10071_v60 = vpop.eup %8970  ;;  %v4524_v59 = vmul.f32 1.442695, %v4496_v36 }
 0x99e   :  { %4598 = vadd.xlane.f32.xlu0 %v4597_v58  ;;  %v4564_v50 = vsel %vm51_vm0, %v10071_v60, 0.0  ;;  %v10076_v4 = vpop.eup %8972  ;;  %v10096_v38 = vpop.xlane.xlu1 %4445 }
 0x99f   :  { %v4570_v47 = vsel %vm51_vm0, %v10076_v4, 0.0  ;;  %v10080_v58 = vpop.eup %8974 }
 0x9a0   :  { %v4582_v24 = vsel %vm51_vm0, %v10080_v58, 0.0 }
 0x9a2   :  { %4610 = vadd.xlane.f32.xlu0 %v4609_v3 }
 0x9a6   :  { %4622 = vadd.xlane.f32.xlu0 %v4621_v44 }
 0x9aa   :  { %4634 = vadd.xlane.f32.xlu0 %v4633_v6 }
 0x9b7   :  { %4487 = vmax.xlane.f32.xlu1 %v4486_v21 }
 0x9c8   :  { %8854 = vrot.lane.b32.xlu1 %v9731_v61, %s9072_s24  ;;  %v4536_v61 = vmul.f32 1.442695, %v4502_v13 }
 0x9ca   :  { %8976 = vpow2.f32 %v4536_v61  ;;  %v4449_v61 = vpop.xlane.xlu0 %4448 }
 0x9cb   :  { %8978 = vpow2.f32 %v4544_v23  ;;  %v4501_v23 = vsub.f32 %v9984_v48, %v4449_v61 }
 0x9cc   :  { %8980 = vpow2.f32 %v4552_v16 }
 0x9cd   :  { %8982 = vpow2.f32 %v4524_v59 }
 0x9d4   :  { %v10084_v3 = vpop.eup %8976 }
 0x9d5   :  { %v4594_v41 = vsel %vm51_vm0, %v10084_v3, 0.0  ;;  %v10088_v44 = vpop.eup %8978 }
 0x9d6   :  { %v4606_v6 = vsel %vm51_vm0, %v10088_v44, 0.0  ;;  %v10092_v21 = vpop.eup %8980 }
 0x9d7   :  { %v4618_v40 = vsel %vm51_vm0, %v10092_v21, 0.0  ;;  %v10115_v46 = vpop.eup %8982 }
 0x9ec   :  { %4565 = vadd.xlane.f32.xlu1 %v4564_v50 }
 0x9f0   :  { %4571 = vadd.xlane.f32.xlu1 %v4570_v47 }
 0x9f4   :  { %4583 = vadd.xlane.f32.xlu1 %v4582_v24 }
 0x9f8   :  { %4595 = vadd.xlane.f32.xlu1 %v4594_v41 }
 0x9fc   :  { %4607 = vadd.xlane.f32.xlu1 %v4606_v6 }
 0xa00   :  { %4619 = vadd.xlane.f32.xlu1 %v4618_v40  ;;  %v4576_v40 = vsel %vm51_vm0, %v10115_v46, 0.0 }
 0xa07   :  { %v10098_v2 = vpop.xlane.xlu1 %4457 }
 0xa0f   :  { %v10100_v20 = vpop.xlane.xlu1 %4469 }
 0xa11   :  { %8864 = vrot.lane.b32.xlu1 %v9758_v8, %s9072_s24  ;;  %v4461_v8 = vpop.xlane.xlu0 %4460 }
 0xa12   :  { %v4505_v50 = vsub.f32 %v9996_v62, %v4461_v8 }
 0xa13   :  { %v8850_v37 = vpop.permute.xlu1 %8849 }
 0xa14   :  { %v8852_v42 = vunpack.i.h.bf16 %v8850_v37  ;;  %v8851_v43 = vunpack.i.l.bf16 %v8850_v37  ;;  %v4542_v47 = vmul.f32 1.442695, %v4505_v50 }
 0xa15   :  { %8869 = vrot.lane.b32.xlu1 %v9769_v12, %s9072_s24  ;;  %v4473_v19 = vpop.xlane.xlu0 %4472  ;;  %v4534_v12 = vmul.f32 1.442695, %v4501_v23 }
 0xa16   :  { %v8636_v13 = vpack.c.bf16 %v8852_v42, %v8851_v43 }
 0xa17   :  { %8984 = vpow2.f32 %v4534_v12 }
 0xa18   :  { %8637 = vmatprep.subr.bf16.mxu0 %v8636_v13  ;;  %8986 = vpow2.f32 %v4542_v47 }
 0xa19   :  { %8639 = vmatpush3.bf16.msra.mxu0 %v8636_v13  ;;  %8874 = vrot.lane.b32.xlu1 %v9776_v22, %s9072_s24  ;;  %v4482_v16 = vpop.xlane.xlu0 %4481  ;;  %v4509_v22 = vsub.f32 %v10005_v54, %v4473_v19 }
 0xa1a   :  { %v4512_v24 = vsub.f32 %v10015_v57, %v4482_v16 }
 0xa1c   :  { %v4556_v6 = vmul.f32 1.442695, %v4512_v24 }
 0xa1d   :  { %8879 = vrot.lane.b32.xlu1 %v9788_v26, %s9072_s24  ;;  %v4550_v26 = vmul.f32 1.442695, %v4509_v22  ;;  %v4485_v41 = vpop.xlane.xlu0 %4484  ;;  %v4497_v22 = vsub.f32 %v9976_v45, %v4437_v27  ;;  %v4508_v45 = vsub.f32 %v10007_v15, %v10100_v20 }
 0xa1e   :  { %v4513_v48 = vsub.f32 %v10018_v0, %v4485_v41  ;;  %v4500_v41 = vsub.f32 %v9986_v51, %v10096_v38 }
 0xa1f   :  { %8988 = vpow2.f32 %v4550_v26  ;;  %v4526_v24 = vmul.f32 1.442695, %v4497_v22 }
 0xa20   :  { %8990 = vpow2.f32 %v4556_v6  ;;  %v4558_v30 = vmul.f32 1.442695, %v4513_v48 }
 0xa21   :  { %v10120_v62 = vpop.eup %8984  ;;  %v4569_v26 = vpop.xlane.xlu0 %4568 }
 0xa22   :  { %v4591_v37 = vsel %vm51_vm0, %v10120_v62, 0.0  ;;  %v10124_v57 = vpop.eup %8986  ;;  %8992 = vpow2.f32 %v4558_v30  ;;  %v4548_v30 = vmul.f32 1.442695, %v4508_v45 }
 0xa23   :  { %v4603_v13 = vsel %vm51_vm0, %v10124_v57, 0.0 }
 0xa25   :  { %v4575_v48 = vpop.xlane.xlu0 %4574 }
 0xa29   :  { %v10129_v61 = vpop.eup %8988  ;;  %v4587_v22 = vpop.xlane.xlu0 %4586 }
 0xa2a   :  { %v4615_v23 = vsel %vm51_vm0, %v10129_v61, 0.0  ;;  %v10133_v19 = vpop.eup %8990 }
 0xa2c   :  { %v10137_v12 = vpop.eup %8992 }
 0xa2d   :  { %v4627_v16 = vsel %vm51_vm0, %v10137_v12, 0.0 }
 0xa41   :  { %4577 = vadd.xlane.f32.xlu1 %v4576_v40  ;;  %v4532_v40 = vmul.f32 1.442695, %v4500_v41 }
 0xa44   :  { %v4488_v54 = vpop.xlane.xlu1 %4487 }
 0xa45   :  { %v4514_v42 = vsub.f32 %v10058_v53, %v4488_v54  ;;  %4592 = vadd.xlane.f32.xlu1 %v4591_v37  ;;  %v4624_v53 = vsel %vm51_vm0, %v10133_v19, 0.0 }
 0xa47   :  { %v4560_v43 = vmul.f32 1.442695, %v4514_v42 }
 0xa48   :  { %v8855_v0 = vpop.permute.xlu1 %8854 }
 0xa49   :  { %8994 = vpow2.f32 %v4560_v43  ;;  %v8857_v36 = vunpack.i.h.bf16 %v8855_v0  ;;  %v8856_v8 = vunpack.i.l.bf16 %v8855_v0  ;;  %4604 = vadd.xlane.f32.xlu1 %v4603_v13 }
 0xa4a   :  { %8996 = vrcp.f32 %v4569_v26 }
 0xa4b   :  { %v8640_v59 = vpack.c.bf16 %v8857_v36, %v8856_v8 }
 0xa4d   :  { %4616 = vadd.xlane.f32.xlu1 %v4615_v23  ;;  %8641 = vmatprep.subr.bf16.mxu0 %v8640_v59 }
 0xa51   :  { %4625 = vadd.xlane.f32.xlu1 %v4624_v53 }
 0xa53   :  { %v10139_v50 = vpop.eup %8994 }
 0xa54   :  { %v4630_v47 = vsel %vm51_vm0, %v10139_v50, 0.0  ;;  %v8997_v51 = vpop.eup %8996 }
 0xa55   :  { %4628 = vadd.xlane.f32.xlu1 %v4627_v16  ;;  %4631 = vadd.xlane.f32.xlu0 %v4630_v47 }
 0xa66   :  { %8889 = vrot.lane.b32.xlu1 %v9755_v1, %s9072_s24  ;;  %v4504_v1 = vsub.f32 %v9998_v11, %v10098_v2  ;;  %v4661_v11 = vmul.f32 %v8997_v51, %v10025_v10 }
 0xa6a   :  { %8904 = vrot.lane.b32.xlu1 %v9885_v25, %s9072_s24 }
 0xa6b   :  { %8859 = vrot.lane.b32.xlu0 %v9746_v56, %s9072_s24  ;;  %v4540_v56 = vmul.f32 1.442695, %v4504_v1 }
 0xa79   :  { %v4566_v6 = vpop.xlane.xlu1 %4565 }
 0xa7a   :  { %8998 = vrcp.f32 %v4566_v6 }
 0xa7b   :  { %9000 = vpow2.f32 %v4526_v24  ;;  %v4599_v24 = vpop.xlane.xlu0 %4598 }
 0xa7c   :  { %9002 = vrcp.f32 %v4575_v48 }
 0xa7d   :  { %v4572_v25 = vpop.xlane.xlu1 %4571 }
 0xa7e   :  { %9004 = vrcp.f32 %v4572_v25 }
 0xa7f   :  { %9006 = vpow2.f32 %v4532_v40  ;;  %v4611_v6 = vpop.xlane.xlu0 %4610 }
 0xa81   :  { %v4584_v27 = vpop.xlane.xlu1 %4583 }
 0xa82   :  { %9008 = vrcp.f32 %v4584_v27 }
 0xa83   :  { %9010 = vpow2.f32 %v4540_v56  ;;  %v4623_v48 = vpop.xlane.xlu0 %4622 }
 0xa84   :  { %v8999_v38 = vpop.eup %8998  ;;  %9012 = vpow2.f32 %v4548_v30 }
 0xa85   :  { %v4660_v54 = vmul.f32 %v8999_v38, %v10071_v60  ;;  %v10159_v37 = vpop.eup %9000 }
 0xa86   :  { %v9003_v2 = vpop.eup %9002  ;;  %v4579_v15 = vsel %vm51_vm0, %v10159_v37, 0.0 }
 0xa87   :  { %8300 = vmatprep.mubr.msk.f32.mxu0 %vm51_vm0, %v4660_v54  ;;  %v4663_v60 = vmul.f32 %v9003_v2, %v10030_v17 }
 0xa88   :  { %v9005_v42 = vpop.eup %9004  ;;  %8301 = vmatmul.mubr.msk.f32.vlgmr.msra.gmra.mrb[66].mxu0 %vm51_vm0, %v4661_v11 }
 0xa89   :  { %8643 = vmatpush3.bf16.msra.mxu0 %v8640_v59  ;;  %v4662_v20 = vmul.f32 %v9005_v42, %v10076_v4  ;;  %v10167_v43 = vpop.eup %9006  ;;  %v4596_v59 = vpop.xlane.xlu1 %4595 }
 0xa8a   :  { %4580 = vadd.xlane.f32.xlu0 %v4579_v15  ;;  %v4588_v0 = vsel %vm51_vm0, %v10167_v43, 0.0 }
 0xa8b   :  { %8307 = vmatprep.mubr.msk.f32.mxu0 %vm51_vm0, %v4662_v20 }
 0xa8c   :  { %v9009_v10 = vpop.eup %9008  ;;  %8308 = vmatmul.mubr.msk.f32.vlgmr.msra.gmra.mrb[68].mxu0 %vm51_vm0, %v4663_v60 }
 0xa8d   :  { %v4666_v13 = vmul.f32 %v9009_v10, %v10080_v58  ;;  %v10175_v36 = vpop.eup %9010  ;;  %v4608_v23 = vpop.xlane.xlu1 %4607 }
 0xa8e   :  { %4589 = vadd.xlane.f32.xlu0 %v4588_v0  ;;  %v4600_v4 = vsel %vm51_vm0, %v10175_v36, 0.0  ;;  %v10180_v17 = vpop.eup %9012 }
 0xa8f   :  { %8321 = vmatprep.mubr.msk.f32.mxu0 %vm51_vm0, %v4666_v13  ;;  %v4612_v8 = vsel %vm51_vm0, %v10180_v17, 0.0 }
 0xa91   :  { %v4620_v58 = vpop.xlane.xlu1 %4619 }
 0xa92   :  { %4601 = vadd.xlane.f32.xlu0 %v4600_v4 }
 0xa95   :  { %v8865_v53 = vpop.permute.xlu1 %8864 }
 0xa96   :  { %4613 = vadd.xlane.f32.xlu0 %v4612_v8  ;;  %v8867_v25 = vunpack.i.h.bf16 %v8865_v53  ;;  %v8866_v56 = vunpack.i.l.bf16 %v8865_v53 }
 0xa98   :  { %v8656_v54 = vpack.c.bf16 %v8867_v25, %v8866_v56  ;;  %v6191_v56 = vld [vmem:[%s10850_s9 + $0x20] sm:$0xff] }
 0xa99   :  { %v8870_v16 = vpop.permute.xlu1 %8869 }
 0xa9a   :  { %v8871_v11 = vunpack.i.l.bf16 %v8870_v16 }
 0xa9d   :  { %v8875_v47 = vpop.permute.xlu1 %8874 }
 0xa9e   :  { %v8877_v10 = vunpack.i.h.bf16 %v8875_v47  ;;  %v8876_v0 = vunpack.i.l.bf16 %v8875_v47 }
 0xaa1   :  { %v8880_v26 = vpop.permute.xlu1 %8879 }
 0xaac   :  { %8884 = vrot.lane.b32.xlu0 %v9738_v52, %s9072_s24 }
 0xab0   :  { %8894 = vrot.lane.b32.xlu0 %v9861_v5, %s9072_s24  ;;  %v4635_v5 = vpop.xlane.xlu0 %4634 }
 0xab4   :  { %8899 = vrot.lane.b32.xlu0 %v9873_v14, %s9072_s24 }
 0xace   :  { %v4578_v41 = vpop.xlane.xlu1 %4577 }
 0xacf   :  { %9014 = vrcp.f32 %v4578_v41 }
 0xad0   :  { %9016 = vrcp.f32 %v4587_v22 }
 0xad1   :  { %9018 = vrcp.f32 %v4596_v59  ;;  %v8672_v59 = vpack.c.bf16 %v8877_v10, %v8876_v0  ;;  %v6195_v10 = vld [vmem:[%s10850_s9 + $0x40] sm:$0xff]  ;;  %v6196_v0 = vld [vmem:[%s10850_s9 + $0x48] sm:$0xff] }
 0xad2   :  { %9020 = vrcp.f32 %v4599_v24  ;;  %v6218_v24 = vlaneseq }
 0xad3   :  { %9022 = vrcp.f32 %v4608_v23  ;;  %v8882_v23 = vunpack.i.h.bf16 %v8880_v26 }
 0xad4   :  { %9024 = vrcp.f32 %v4611_v6 }
 0xad5   :  { %9026 = vrcp.f32 %v4620_v58 }
 0xad6   :  { %9028 = vrcp.f32 %v4623_v48 }
 0xad9   :  { %v9015_v40 = vpop.eup %9014 }
 0xada   :  { %v4664_v52 = vmul.f32 %v9015_v40, %v10115_v46  ;;  %v9017_v38 = vpop.eup %9016  ;;  %v8872_v46 = vunpack.i.h.bf16 %v8870_v16  ;;  %v6219_v40 = vshrl.u32 %v6218_v24, 7 }
 0xadb   :  { %v9019_v30 = vpop.eup %9018  ;;  %v4667_v2 = vmul.f32 %v9017_v38, %v10037_v18 }
 0xadc   :  { %8314 = vmatprep.mubr.msk.f32.mxu1 %vm51_vm0, %v4664_v52  ;;  %v9021_v42 = vpop.eup %9020  ;;  %v4670_v15 = vmul.f32 %v9019_v30, %v10084_v3  ;;  %v8664_v60 = vpack.c.bf16 %v8872_v46, %v8871_v11  ;;  %v8881_v3 = vunpack.i.l.bf16 %v8880_v26  ;;  %v7634_v30 = vld.sshfl [vmem:[%s10851_s2 + $0x4] sm:$0x13 pattern:$0x75316420]  ;;  %v6194_v46 = vld [vmem:[%s10850_s9 + $0x38] sm:$0xff]  ;;  %v4593_v11 = vpop.xlane.xlu1 %4592 }
 0xadd   :  { %v9023_v20 = vpop.eup %9022  ;;  %v4671_v13 = vmul.f32 %v9021_v42, %v10041_v34 }
 0xade   :  { %v9025_v4 = vpop.eup %9024  ;;  %v4674_v18 = vmul.f32 %v9023_v20, %v10088_v44  ;;  %v8680_v47 = vpack.c.bf16 %v8882_v23, %v8881_v3  ;;  %v9074_v44 = vmov 1966171168   ;;  %v6197_v3 = vld [vmem:[%s10850_s9 + $0x50] sm:$0xff] }
 0xadf   :  { %v9027_v8 = vpop.eup %9026  ;;  %v4675_v58 = vmul.f32 %v9025_v4, %v10045_v49  ;;  %v6216_v22 = vunpack.c.l.s4 %v9074_v44  ;;  %v6187_v49 = vld [vmem:[%s10850_s9] sm:$0xff] }
 0xae0   :  { %v9029_v53 = vpop.eup %9028  ;;  %v4678_v16 = vmul.f32 %v9027_v8, %v10092_v21  ;;  %v6188_v21 = vld [vmem:[%s10850_s9 + $0x8] sm:$0xff]  ;;  %v4605_v23 = vpop.xlane.xlu1 %4604  ;;  %v6199_v44 = vld [vmem:[%s10850_s9 + $0x60] sm:$0xff] }
 0xae1   :  { %v4679_v26 = vmul.f32 %v9029_v53, %v10049_v55  ;;  %v6217_v48 = vunpack.c.0.s8 %v6216_v22  ;;  %v8689_v55 = vpack.c.bf16 %v6188_v21, %v6187_v49  ;;  %v6200_v22 = vld [vmem:[%s10850_s9 + $0x68] sm:$0xff] }
 0xae2   :  { %v4632_v1 = vpop.xlane.xlu0 %4631  ;;  %v8707_v21 = vpack.c.bf16 %v6200_v22, %v6199_v44 }
 0xae3   :  { %9030 = vrcp.f32 %v4632_v1  ;;  %v6189_v1 = vld [vmem:[%s10850_s9 + $0x10] sm:$0xff] }
 0xae4   :  { %9032 = vrcp.f32 %v4635_v5  ;;  %v9075_v5 = vmov 0.0|0.0   ;;  %v4617_v24 = vpop.xlane.xlu1 %4616 }
 0xae6   :  { %v8860_v14 = vpop.permute.xlu0 %8859 }
 0xae7   :  { %v8862_v45 = vunpack.i.h.bf16 %v8860_v14  ;;  %v8861_v27 = vunpack.i.l.bf16 %v8860_v14  ;;  %v10223_v14 = vsub.s32 %v6217_v48, %v6219_v40 }
 0xae9   :  { %v8648_v51 = vpack.c.bf16 %v8862_v45, %v8861_v27  ;;  %v6192_v45 = vld [vmem:[%s10850_s9 + $0x28] sm:$0xff]  ;;  %v6244_v20 = vrot.slane %v7634_v30, %v10223_v14 }
 0xaea   :  { %v8695_v38 = vpack.c.bf16 %v6192_v45, %v6191_v56 }
 0xaeb   :  { %8649 = vmatprep.subr.bf16.mxu0 %v8648_v51  ;;  %v6252_v4 = vcombine.high %v6244_v20, %v6244_v20 }
 0xaec   :  { %8651 = vmatpush3.bf16.msra.mxu0 %v8648_v51 }
 0xaed   :  { %8657 = vmatprep.subr.bf16.mxu0 %v8656_v54  ;;  %v9031_v34 = vpop.eup %9030 }
 0xaee   :  { %v9033_v41 = vpop.eup %9032  ;;  %v4682_v6 = vmul.f32 %v9031_v34, %v10139_v50  ;;  %v6190_v50 = vld [vmem:[%s10850_s9 + $0x18] sm:$0xff] }
 0xaef   :  { %8322 = vmatmul.mubr.msk.f32.vlgmr.msra.gmra.mrb[70].mxu0 %vm51_vm0, %v4667_v2  ;;  %v4683_v52 = vmul.f32 %v9033_v41, %v10053_v63  ;;  %v8692_v25 = vpack.c.bf16 %v6190_v50, %v6189_v1  ;;  %v7633_v63 = vld.sshfl [vmem:[%s10851_s2] sm:$0x13 pattern:$0x75316420]  ;;  %v6201_v41 = vld [vmem:[%s10850_s9 + $0x70] sm:$0xff]  ;;  %v4626_v1 = vpop.xlane.xlu1 %4625 }
 0xaf0   :  { %8659 = vmatpush3.bf16.msra.mxu0 %v8656_v54  ;;  %8335 = vmatprep.mubr.msk.f32.mxu0 %vm51_vm0, %v4670_v15  ;;  %v6214_v27 = vcombine.high %v7633_v63, %v7633_v63  ;;  %v6221_v51 = vrot.slane %v7633_v63, %v10223_v14  ;;  %v6193_v54 = vld [vmem:[%s10850_s9 + $0x30] sm:$0xff]  ;;  %v6237_v15 = vcombine.high %v7634_v30, %v7634_v30 }
 0xaf1   :  { %8665 = vmatprep.subr.bf16.mxu0 %v8664_v60 }
 0xaf2   :  { %v6228_v2 = vrot.slane %v6214_v27, %v10223_v14  ;;  %v6229_v42 = vcombine.high %v6221_v51, %v6221_v51 }
 0xaf3   :  { %8336 = vmatmul.mubr.msk.f32.vlgmr.msra.gmra.mrb[72].mxu0 %vm51_vm0, %v4671_v13  ;;  %v6251_v13 = vrot.slane %v6237_v15, %v10223_v14  ;;  %v4629_v63 = vpop.xlane.xlu1 %4628 }
 0xaf4   :  { %8667 = vmatpush3.bf16.msra.mxu0 %v8664_v60  ;;  %8349 = vmatprep.mubr.msk.f32.mxu0 %vm51_vm0, %v4674_v18  ;;  %v8698_v60 = vpack.c.bf16 %v6194_v46, %v6193_v54  ;;  %v6253_v18 = vcombine.low %v6221_v51, %v6228_v2  ;;  %v6254_v8 = vcombine.low %v6229_v42, %v6244_v20 }
 0xaf5   :  { %8673 = vmatprep.subr.bf16.mxu0 %v8672_v59  ;;  %v6255_v53 = vcombine.low %v6251_v13, %v6252_v4 }
 0xaf6   :  { %v6269_v34 = vrot.slane %v6254_v8, %v10223_v14 }
 0xaf7   :  { %8350 = vmatmul.mubr.msk.f32.vlgmr.msra.gmra.mrb[74].mxu0 %vm51_vm0, %v4675_v58  ;;  %v6198_v58 = vld [vmem:[%s10850_s9 + $0x58] sm:$0xff]  ;;  %v8890_v27 = vpop.permute.xlu1 %8889 }
 0xaf8   :  { %8675 = vmatpush3.bf16.msra.mxu0 %v8672_v59  ;;  %8363 = vmatprep.mubr.msk.f32.mxu0 %vm51_vm0, %v4678_v16  ;;  %v8701_v59 = vpack.c.bf16 %v6196_v0, %v6195_v10  ;;  %v6262_v16 = vrot.slane %v6253_v18, %v10223_v14  ;;  %v8891_v30 = vunpack.i.l.bf16 %v8890_v27 }
 0xaf9   :  { %8681 = vmatprep.subr.bf16.mxu0 %v8680_v47 }
 0xafa   :  { %v6277_v49 = vcombine.low %v6262_v16, %v6269_v34 }
 0xafb   :  { %8364 = vmatmul.mubr.msk.f32.vlgmr.msra.gmra.mrb[76].mxu0 %vm51_vm0, %v4679_v26  ;;  %v6276_v26 = vrot.slane %v6255_v53, %v10223_v14 }
 0xafc   :  { %8683 = vmatpush3.bf16.msra.mxu0 %v8680_v47  ;;  %8377 = vmatprep.mubr.msk.f32.mxu0 %vm51_vm0, %v4682_v6  ;;  %v8704_v47 = vpack.c.bf16 %v6198_v58, %v6197_v3  ;;  %v6202_v6 = vld [vmem:[%s10850_s9 + $0x78] sm:$0xff]  ;;  %v6284_v40 = vrot.slane %v6277_v49, %v10223_v14  ;;  %v8905_v58 = vpop.permute.xlu1 %8904 }
 0xafd   :  { %8688 = vmatprep.subr.bf16.mxu0 %v9075_v5 }
 0xaff   :  { %8378 = vmatmul.mubr.msk.f32.vlgmr.msra.gmra.mrb[78].mxu0 %vm51_vm0, %v4683_v52  ;;  %v8710_v52 = vpack.c.bf16 %v6202_v6, %v6201_v41 }
 0xb00   :  { %8690 = vmatpush3.bf16.msra.mxu0 %v8689_v55  ;;  %8434 = vmatprep.mubr.msk.f32.mxu0 %vm9070_vm1, %v9068_v9  ;;  %v6291_v55 = vrot.slane %v6276_v26, %v10223_v14 }
 0xb01   :  { %8691 = vmatprep.subr.bf16.mxu0 %v9075_v5 }
 0xb04   :  { %8693 = vmatpush3.bf16.msra.mxu0 %v8692_v25  ;;  %v6292_v25 = vcombine.low %v6284_v40, %v6291_v55 }
 0xb05   :  { %8694 = vmatprep.subr.bf16.mxu0 %v9075_v5 }
 0xb08   :  { %8696 = vmatpush3.bf16.msra.mxu0 %v8695_v38  ;;  %v8892_v38 = vunpack.i.h.bf16 %v8890_v27 }
 0xb09   :  { %8697 = vmatprep.subr.bf16.mxu0 %v9075_v5 }
 0xb0c   :  { %8699 = vmatpush3.bf16.msra.mxu0 %v8698_v60  ;;  %v8652_v60 = vpack.c.bf16 %v8892_v38, %v8891_v30 }
 0xb0d   :  { %8700 = vmatprep.subr.bf16.mxu0 %v9075_v5 }
 0xb10   :  { %8702 = vmatpush3.bf16.msra.mxu0 %v8701_v59 }
 0xb11   :  { %8703 = vmatprep.subr.bf16.mxu0 %v9075_v5 }
 0xb14   :  { %8705 = vmatpush3.bf16.msra.mxu0 %v8704_v47  ;;  %v8907_v47 = vunpack.i.h.bf16 %v8905_v58 }
 0xb15   :  { %8706 = vmatprep.subr.bf16.mxu0 %v9075_v5 }
 0xb17   :  { %v4581_v48 = vpop.xlane.xlu0 %4580 }
 0xb18   :  { %8708 = vmatpush3.bf16.msra.mxu0 %v8707_v21  ;;  %9034 = vrcp.f32 %v4581_v48 }
 0xb19   :  { %8709 = vmatprep.subr.bf16.mxu0 %v9075_v5 }
 0xb1b   :  { %v4590_v50 = vpop.xlane.xlu0 %4589 }
 0xb1c   :  { %8711 = vmatpush3.bf16.msra.mxu0 %v8710_v52  ;;  %9036 = vrcp.f32 %v4590_v50 }
 0xb1d   :  { %8452 = vmatprep.subr.mxu0 %v9068_v9  ;;  %9038 = vrcp.f32 %v4593_v11 }
 0xb1f   :  { %v4602_v56 = vpop.xlane.xlu0 %4601  ;;  %8435 = vmatmul.mubr.f32.vlgmr.msra.gmra.mrb[80].mxu0 %v6292_v25 }
 0xb20   :  { %8454 = vmatprep.mubr.msk.f32.mxu0 %vm9070_vm1, %v9068_v9  ;;  %9040 = vrcp.f32 %v4602_v56 }
 0xb21   :  { %9042 = vrcp.f32 %v4605_v23 }
 0xb22   :  { %v9035_v42 = vpop.eup %9034 }
 0xb23   :  { %v4614_v45 = vpop.xlane.xlu0 %4613  ;;  %v4665_v11 = vmul.f32 %v9035_v42, %v10159_v37 }
 0xb24   :  { %9044 = vrcp.f32 %v4614_v45 }
 0xb25   :  { %9046 = vrcp.f32 %v4617_v24 }
 0xb26   :  { %v9037_v20 = vpop.eup %9036  ;;  %9048 = vrcp.f32 %v4626_v1 }
 0xb27   :  { %v8885_v51 = vpop.permute.xlu0 %8884  ;;  %v9039_v13 = vpop.eup %9038  ;;  %v4668_v18 = vmul.f32 %v9037_v20, %v10167_v43  ;;  %9050 = vrcp.f32 %v4629_v63  ;;  %v8906_v43 = vunpack.i.l.bf16 %v8905_v58 }
 0xb28   :  { %v8887_v54 = vunpack.i.h.bf16 %v8885_v51  ;;  %v8886_v46 = vunpack.i.l.bf16 %v8885_v51  ;;  %v4669_v53 = vmul.f32 %v9039_v13, %v10120_v62 }
 0xb29   :  { %v8676_v49 = vpack.c.bf16 %v8907_v47, %v8906_v43 }
 0xb2a   :  { %v8644_v2 = vpack.c.bf16 %v8887_v54, %v8886_v46  ;;  %v9041_v8 = vpop.eup %9040 }
 0xb2b   :  { %v8895_v15 = vpop.permute.xlu0 %8894  ;;  %v9043_v37 = vpop.eup %9042  ;;  %v4672_v16 = vmul.f32 %v9041_v8, %v10175_v36 }
 0xb2c   :  { %v8897_v10 = vunpack.i.h.bf16 %v8895_v15  ;;  %v8896_v0 = vunpack.i.l.bf16 %v8895_v15  ;;  %8645 = vmatprep.subr.bf16.mxu1 %v8644_v2  ;;  %v4673_v22 = vmul.f32 %v9043_v37, %v10124_v57 }
 0xb2d   :  { %8647 = vmatpush3.bf16.msra.mxu1 %v8644_v2 }
 0xb2e   :  { %8653 = vmatprep.subr.bf16.mxu1 %v8652_v60  ;;  %v8660_v59 = vpack.c.bf16 %v8897_v10, %v8896_v0  ;;  %v9045_v34 = vpop.eup %9044  ;;  %v3154_v10 = vld [vmem:[%s10852_s8 + $0x8] sm:$0xff] }
 0xb2f   :  { %v8900_v4 = vpop.permute.xlu0 %8899  ;;  %v9047_v24 = vpop.eup %9046  ;;  %v4676_v26 = vmul.f32 %v9045_v34, %v10180_v17 }
 0xb30   :  { %v8902_v23 = vunpack.i.h.bf16 %v8900_v4  ;;  %v8901_v3 = vunpack.i.l.bf16 %v8900_v4  ;;  %8315 = vmatmul.mubr.msk.f32.vlgmr.msra.gmra.mrb[54].mxu1 %vm51_vm0, %v4665_v11  ;;  %v9049_v62 = vpop.eup %9048  ;;  %v4677_v36 = vmul.f32 %v9047_v24, %v10129_v61 }
 0xb31   :  { %8655 = vmatpush3.bf16.msra.mxu1 %v8652_v60  ;;  %8328 = vmatprep.mubr.msk.f32.mxu1 %vm51_vm0, %v4668_v18  ;;  %v9051_v21 = vpop.eup %9050  ;;  %v4680_v41 = vmul.f32 %v9049_v62, %v10133_v19  ;;  %v3153_v60 = vld [vmem:[%s10852_s8] sm:$0xff]  ;;  %s9076_s8 = smov 16  }
 0xb32   :  { %8661 = vmatprep.subr.bf16.mxu1 %v8660_v59  ;;  %v8668_v44 = vpack.c.bf16 %v8902_v23, %v8901_v3  ;;  %v4681_v57 = vmul.f32 %v9051_v21, %v10137_v12  ;;  %v8684_v0 = vpack.c.bf16 %v3154_v10, %v3153_v60 }
 0xb34   :  { %8329 = vmatmul.mubr.msk.f32.vlgmr.msra.gmra.mrb[56].mxu1 %vm51_vm0, %v4669_v53 }
 0xb35   :  { %8663 = vmatpush3.bf16.msra.mxu1 %v8660_v59  ;;  %8342 = vmatprep.mubr.msk.f32.mxu1 %vm51_vm0, %v4672_v16 }
 0xb36   :  { %8669 = vmatprep.subr.bf16.mxu1 %v8668_v44 }
 0xb38   :  { %8343 = vmatmul.mubr.msk.f32.vlgmr.msra.gmra.mrb[58].mxu1 %vm51_vm0, %v4673_v22 }
 0xb39   :  { %8671 = vmatpush3.bf16.msra.mxu1 %v8668_v44  ;;  %8356 = vmatprep.mubr.msk.f32.mxu1 %vm51_vm0, %v4676_v26 }
 0xb3a   :  { %8677 = vmatprep.subr.bf16.mxu1 %v8676_v49 }
 0xb3c   :  { %8357 = vmatmul.mubr.msk.f32.vlgmr.msra.gmra.mrb[60].mxu1 %vm51_vm0, %v4677_v36 }
 0xb3d   :  { %8679 = vmatpush3.bf16.msra.mxu1 %v8676_v49  ;;  %8370 = vmatprep.mubr.msk.f32.mxu1 %vm51_vm0, %v4680_v41 }
 0xb3e   :  { %8685 = vmatprep.subr.bf16.mxu1 %v8684_v0 }
 0xb40   :  { %8371 = vmatmul.mubr.msk.f32.vlgmr.msra.gmra.mrb[62].mxu1 %vm51_vm0, %v4681_v57 }
 0xb41   :  { %8687 = vmatpush3.bf16.msra.mxu1 %v8684_v0 }
 0xb42   :  { %8437 = vmatprep.subr.mxu1 %v9068_v9 }
 0xb5b   :  { %v10306_v17 = vpop.f32.mrb[66].mxu0 }
 0xb5c   :  { %v10308_v6 = vpop.f32.mrb[67].mxu0 }
 0xb5f   :  { %v10310_v48 = vpop.f32.mrb[68].mxu0 }
 0xb60   :  { %v10312_v61 = vpop.f32.mrb[69].mxu0 }
 0xbc2   :  { %v10314_v40 = vpop.f32.mrb[70].mxu0 }
 0xbc3   :  { %v10316_v19 = vpop.f32.mrb[71].mxu0 }
 0xbc6   :  { %v10318_v55 = vpop.f32.mrb[72].mxu0 }
 0xbc7   :  { %v10320_v52 = vpop.f32.mrb[73].mxu0 }
 0xbca   :  { %v8351_v1 = vpop.f32.mrb[74].mxu0 }
 0xbcb   :  { %v5371_v12 = vpop.f32.mrb[75].mxu0 }
 0xbce   :  { %v8365_v50 = vpop.f32.mrb[76].mxu0 }
 0xbcf   :  { %v5545_v25 = vpop.f32.mrb[77].mxu0 }
 0xbd2   :  { %v8379_v63 = vpop.f32.mrb[78].mxu0 }
 0xbd3   :  { %v5719_v56 = vpop.f32.mrb[79].mxu0 }
 0xbf2   :  { %v6360_v45 = vpop.f32.mrb[80].mxu0 }
 0xbf3   :  { %v6365_v27 = vcombine.high %v6360_v45, %v6360_v45  ;;  %v6372_v51 = vrot.slane %v6360_v45, %v10223_v14  ;;  %v8436_v38 = vpop.f32.mrb[81].mxu0 }
 0xbf5   :  { %v6380_v30 = vcombine.high %v6372_v51, %v6372_v51  ;;  %v6388_v54 = vrot.slane %v6372_v51, %v10223_v14  ;;  %v6379_v46 = vrot.slane %v6365_v27, %v10223_v14 }
 0xbf7   :  { %v6402_v2 = vrot.slane %v6380_v30, %v10223_v14  ;;  %6412 = vrot.lane.b32.xlu0 %v6388_v54, %s9069_s23  ;;  %v6410_v42 = vcombine.high %v6388_v54, %v6388_v54  ;;  %v6381_v15 = vcombine.high %v6379_v46, %v6379_v46  ;;  %v6395_v11 = vrot.slane %v6379_v46, %v10223_v14 }
 0xbf9   :  { %6414 = vrot.lane.b32.xlu1 %v6402_v2, %s9069_s23  ;;  %v6411_v20 = vcombine.high %v6402_v2, %v6402_v2  ;;  %v6409_v13 = vrot.slane %v6381_v15, %v10223_v14  ;;  %v6424_v47 = vcombine.low %v6388_v54, %v6402_v2  ;;  %v6438_v24 = vrot.slane %v6410_v42, %v10223_v14 }
 0xbfb   :  { %6416 = vrot.lane.b32.xlu0 %v6410_v42, %s9069_s23  ;;  %v6523_v34 = vcombine.low %v6411_v20, %v6395_v11  ;;  %v6431_v44 = vrot.slane %v6424_v47, %v10223_v14  ;;  %v6537_v22 = vrot.slane %v6409_v13, %v10223_v14 }
 0xbfd   :  { %6418 = vrot.lane.b32.xlu1 %v6411_v20, %s9069_s23  ;;  %v6530_v43 = vrot.slane %v6523_v34, %v10223_v14  ;;  %v6439_v62 = vcombine.low %v6431_v44, %v6438_v24 }
 0xbff   :  { %6420 = vrot.lane.b32.xlu0 %v6395_v11, %s9069_s23  ;;  %v6538_v26 = vcombine.low %v6530_v43, %v6537_v22  ;;  %v10369_v36 = vrot.slane %v6439_v62, %v10223_v14 }
 0xc01   :  { %6422 = vrot.lane.b32.xlu1 %v6409_v13, %s9069_s23  ;;  %v10366_v49 = vrot.slane %v6538_v26, %v10223_v14 }
 0xc03   :  { %v10341_v4 = vpop.f32.mrb[54].mxu1 }
 0xc04   :  { %v10343_v18 = vpop.f32.mrb[55].mxu1 }
 0xc07   :  { %v10345_v8 = vpop.f32.mrb[56].mxu1 }
 0xc08   :  { %v10347_v59 = vpop.f32.mrb[57].mxu1 }
 0xc0b   :  { %v8344_v23 = vpop.f32.mrb[58].mxu1 }
 0xc0c   :  { %v5284_v3 = vpop.f32.mrb[59].mxu1  ;;  %5742 = vrot.lane.b32.xlu1 %v8344_v23, %s9073_s0 }
 0xc0d   :  { %5740 = vrot.lane.b32.xlu0 %v5284_v3, %s9073_s0 }
 0xc0f   :  { %v8358_v58 = vpop.f32.mrb[60].mxu1 }
 0xc10   :  { %v5458_v53 = vpop.f32.mrb[61].mxu1  ;;  %5746 = vrot.lane.b32.xlu1 %v8351_v1, %s9073_s0 }
 0xc11   :  { %5744 = vrot.lane.b32.xlu0 %v5371_v12, %s9073_s0 }
 0xc13   :  { %v8372_v37 = vpop.f32.mrb[62].mxu1 }
 0xc14   :  { %v5632_v16 = vpop.f32.mrb[63].mxu1  ;;  %5750 = vrot.lane.b32.xlu1 %v8358_v58, %s9073_s0 }
 0xc15   :  { %5748 = vrot.lane.b32.xlu0 %v5458_v53, %s9073_s0 }
 0xc18   :  { %5754 = vrot.lane.b32.xlu1 %v8365_v50, %s9073_s0 }
 0xc19   :  { %5752 = vrot.lane.b32.xlu0 %v5545_v25, %s9073_s0 }
 0xc1c   :  { %5758 = vrot.lane.b32.xlu1 %v8372_v37, %s9073_s0 }
 0xc1d   :  { %5756 = vrot.lane.b32.xlu0 %v5632_v16, %s9073_s0 }
 0xc20   :  { %5762 = vrot.lane.b32.xlu1 %v8379_v63, %s9073_s0 }
 0xc21   :  { %5760 = vrot.lane.b32.xlu0 %v5719_v56, %s9073_s0 }
 0xc24   :  { %6546 = vrot.lane.b32.xlu1 %v10366_v49, %s9071_s1 }
 0xc25   :  { %6447 = vrot.lane.b32.xlu0 %v10369_v36, %s9071_s1 }
 0xc69   :  { %v6413_v21 = vpop.permute.xlu0 %6412 }
 0xc6b   :  { %v6415_v41 = vpop.permute.xlu1 %6414 }
 0xc6c   :  { %v6622_v57 = vcombine.low %v6413_v21, %v6415_v41 }
 0xc6d   :  { %v6417_v1 = vpop.permute.xlu0 %6416 }
 0xc6e   :  { %v6629_v12 = vrot.slane %v6622_v57, %v10223_v14  ;;  %v6636_v50 = vrot.slane %v6417_v1, %v10223_v14 }
 0xc6f   :  { %v6419_v25 = vpop.permute.xlu1 %6418 }
 0xc70   :  { %v6637_v63 = vcombine.low %v6629_v12, %v6636_v50 }
 0xc71   :  { %v6421_v56 = vpop.permute.xlu0 %6420 }
 0xc72   :  { %v10378_v45 = vrot.slane %v6637_v63, %v10223_v14  ;;  %v6721_v27 = vcombine.low %v6419_v25, %v6421_v56 }
 0xc73   :  { %v6423_v51 = vpop.permute.xlu1 %6422 }
 0xc74   :  { %v6728_v38 = vrot.slane %v6721_v27, %v10223_v14  ;;  %v6735_v30 = vrot.slane %v6423_v51, %v10223_v14  ;;  %6645 = vrot.lane.b32.xlu0 %v10378_v45, %s9071_s1 }
 0xc76   :  { %v6736_v54 = vcombine.low %v6728_v38, %v6735_v30 }
 0xc78   :  { %v10385_v46 = vrot.slane %v6736_v54, %v10223_v14 }
 0xc7a   :  { %6744 = vrot.lane.b32.xlu1 %v10385_v46, %s9071_s1 }
 0xc7e   :  { %v5743_v2 = vpop.permute.xlu1 %5742 }
 0xc7f   :  { %v5741_v42 = vpop.permute.xlu0 %5740  ;;  %v5777_v20 = vsel %vm185_vm2, %v10306_v17, %v5743_v2 }
 0xc80   :  { %v5776_v15 = vsel %vm185_vm2, %v10308_v6, %v5741_v42 }
 0xc81   :  { %8384 = vmatprep.mubr.msk.f32.mxu1 %vm51_vm0, %v5776_v15 }
 0xc82   :  { %8385 = vmatmul.mubr.msk.f32.vlgmr.msra.gmra.mrb[64].mxu1 %vm51_vm0, %v5777_v20  ;;  %v5747_v60 = vpop.permute.xlu1 %5746 }
 0xc83   :  { %v5745_v10 = vpop.permute.xlu0 %5744  ;;  %v5779_v11 = vsel %vm185_vm2, %v10310_v48, %v5747_v60 }
 0xc84   :  { %v5778_v0 = vsel %vm185_vm2, %v10312_v61, %v5745_v10 }
 0xc85   :  { %8387 = vmatprep.mubr.msk.f32.mxu1 %vm51_vm0, %v5778_v0 }
 0xc86   :  { %8388 = vmatmul.mubr.msk.f32.gmra.mrb[66].mxu1 %vm51_vm0, %v5779_v11  ;;  %v5751_v6 = vpop.permute.xlu1 %5750 }
 0xc87   :  { %v5749_v13 = vpop.permute.xlu0 %5748  ;;  %v5781_v23 = vsel %vm185_vm2, %v10341_v4, %v5751_v6 }
 0xc88   :  { %v5780_v17 = vsel %vm185_vm2, %v10343_v18, %v5749_v13 }
 0xc89   :  { %8390 = vmatprep.mubr.msk.f32.mxu1 %vm51_vm0, %v5780_v17 }
 0xc8a   :  { %8391 = vmatmul.mubr.msk.f32.gmra.mrb[68].mxu1 %vm51_vm0, %v5781_v23  ;;  %v5755_v61 = vpop.permute.xlu1 %5754 }
 0xc8b   :  { %v5753_v3 = vpop.permute.xlu0 %5752  ;;  %v5783_v58 = vsel %vm185_vm2, %v10314_v40, %v5755_v61 }
 0xc8c   :  { %v5782_v48 = vsel %vm185_vm2, %v10316_v19, %v5753_v3 }
 0xc8d   :  { %8393 = vmatprep.mubr.msk.f32.mxu1 %vm51_vm0, %v5782_v48 }
 0xc8e   :  { %8394 = vmatmul.mubr.msk.f32.gmra.mrb[70].mxu1 %vm51_vm0, %v5783_v58  ;;  %v5759_v18 = vpop.permute.xlu1 %5758 }
 0xc8f   :  { %v5757_v53 = vpop.permute.xlu0 %5756  ;;  %v5785_v37 = vsel %vm185_vm2, %v10345_v8, %v5759_v18 }
 0xc90   :  { %v5784_v4 = vsel %vm185_vm2, %v10347_v59, %v5757_v53 }
 0xc91   :  { %8396 = vmatprep.mubr.msk.f32.mxu1 %vm51_vm0, %v5784_v4 }
 0xc92   :  { %8397 = vmatmul.mubr.msk.f32.gmra.mrb[72].mxu1 %vm51_vm0, %v5785_v37  ;;  %v5763_v19 = vpop.permute.xlu1 %5762 }
 0xc93   :  { %v5761_v16 = vpop.permute.xlu0 %5760  ;;  %v5787_v34 = vsel %vm185_vm2, %v10318_v55, %v5763_v19 }
 0xc94   :  { %v5786_v40 = vsel %vm185_vm2, %v10320_v52, %v5761_v16 }
 0xc95   :  { %8399 = vmatprep.mubr.msk.f32.mxu1 %vm51_vm0, %v5786_v40 }
 0xc96   :  { %8400 = vmatmul.mubr.msk.f32.gmra.mrb[74].mxu1 %vm51_vm0, %v5787_v34  ;;  %v6547_v8 = vpop.permute.xlu1 %6546 }
 0xc97   :  { %v6448_v59 = vpop.permute.xlu0 %6447  ;;  %8439 = vmatprep.mubr.msk.f32.mxu1 %vm9070_vm1, %v9068_v9 }
 0xc98   :  { %8438 = vmatpush3.xpose.msk.msra.mxu1 %vm185_vm2, %v6448_v59 }
 0xc99   :  { %8442 = vmatprep.subr.mxu1 %v9068_v9 }
 0xc9b   :  { %8440 = vmatmul.mubr.msk.f32.vlgmr.msra.gmra.mrb[76].mxu1 %vm185_vm2, %v10369_v36 }
 0xc9c   :  { %8443 = vmatpush3.xpose.msk.msra.mxu1 %vm185_vm2, %v6547_v8  ;;  %8444 = vmatprep.mubr.msk.f32.mxu1 %vm9070_vm1, %v9068_v9 }
 0xc9d   :  { %8447 = vmatprep.subr.mxu1 %v9068_v9 }
 0xc9f   :  { %8445 = vmatmul.mubr.msk.f32.vlgmr.msra.gmra.mrb[78].mxu1 %vm185_vm2, %v10366_v49 }
 0xca0   :  { %8449 = vmatprep.mubr.msk.f32.mxu1 %vm9070_vm1, %v9068_v9 }
 0xce6   :  { %v6646_v55 = vpop.permute.xlu0 %6645 }
 0xce7   :  { %8448 = vmatpush3.xpose.msk.msra.mxu1 %vm185_vm2, %v6646_v55 }
 0xce8   :  { %8457 = vmatprep.subr.mxu1 %v9068_v9 }
 0xcea   :  { %8450 = vmatmul.mubr.msk.f32.vlgmr.msra.gmra.mrb[80].mxu1 %vm185_vm2, %v10378_v45 }
 0xceb   :  { %8459 = vmatprep.mubr.msk.f32.mxu1 %vm9070_vm1, %v9068_v9 }
 0xcec   :  { %v6745_v52 = vpop.permute.xlu1 %6744 }
 0xced   :  { %8453 = vmatpush3.xpose.msk.msra.mxu0 %vm185_vm2, %v6745_v52 }
 0xcee   :  { %8462 = vmatprep.subr.mxu0 %v9068_v9 }
 0xcf0   :  { %8455 = vmatmul.mubr.msk.f32.vlgmr.msra.gmra.mrb[82].mxu0 %vm185_vm2, %v10385_v46 }
 0xcf1   :  { %8464 = vmatprep.mubr.msk.f32.mxu0 %vm9070_vm1, %v9068_v9 }
 0xd55   :  { %v10451_v47 = vpop.f32.mrb[64].mxu1 }
 0xd56   :  { %v10453_v43 = vpop.f32.mrb[65].mxu1  ;;  %v6076_v44 = vrot.slane %v10451_v47, 1  ;;  %v6089_v22 = vrot.slane %v10451_v47, 2  ;;  %v6102_v62 = vrot.slane %v10451_v47, 3  ;;  %v6115_v21 = vrot.slane %v10451_v47, 4 }
 0xd57   :  { %v5966_v24 = vrot.slane %v10453_v43, 1  ;;  %v5979_v26 = vrot.slane %v10453_v43, 2  ;;  %v5992_v41 = vrot.slane %v10453_v43, 3  ;;  %v6005_v57 = vrot.slane %v10453_v43, 4 }
 0xd58   :  { %v6128_v1 = vrot.slane %v10451_v47, 5  ;;  %v6018_v12 = vrot.slane %v10453_v43, 5  ;;  %v6031_v25 = vrot.slane %v10453_v43, 6  ;;  %v6045_v63 = vrot.slane %v10453_v43, 7 }
 0xd59   :  { %v10465_v50 = vpop.f32.mrb[66].mxu1  ;;  %v6141_v56 = vrot.slane %v10451_v47, 6  ;;  %v6155_v27 = vrot.slane %v10451_v47, 7 }
 0xd5a   :  { %v10471_v51 = vpop.f32.mrb[67].mxu1  ;;  %v6077_v38 = vsel %vm2302_vm4, %v10465_v50, %v6076_v44  ;;  %v6090_v30 = vrot.slane %v10465_v50, 1  ;;  %v6103_v54 = vrot.slane %v10465_v50, 2  ;;  %v6116_v2 = vrot.slane %v10465_v50, 3 }
 0xd5b   :  { %v5967_v42 = vsel %vm2302_vm4, %v10471_v51, %v5966_v24  ;;  %v5980_v15 = vrot.slane %v10471_v51, 1  ;;  %v5993_v20 = vrot.slane %v10471_v51, 2  ;;  %v6006_v60 = vrot.slane %v10471_v51, 3 }
 0xd5c   :  { %v6091_v10 = vsel %vm2302_vm4, %v6090_v30, %v6089_v22  ;;  %v6104_v0 = vsel %vm2302_vm4, %v6103_v54, %v6102_v62  ;;  %v6117_v11 = vsel %vm2302_vm4, %v6116_v2, %v6115_v21  ;;  %v6129_v6 = vrot.slane %v10465_v50, 4 }
 0xd5d   :  { %v10487_v13 = vpop.f32.mrb[68].mxu1  ;;  %v5981_v17 = vsel %vm2302_vm4, %v5980_v15, %v5979_v26  ;;  %v5994_v23 = vsel %vm2302_vm4, %v5993_v20, %v5992_v41  ;;  %v6007_v61 = vsel %vm2302_vm4, %v6006_v60, %v6005_v57  ;;  %v6019_v3 = vrot.slane %v10471_v51, 4 }
 0xd5e   :  { %v10493_v48 = vpop.f32.mrb[69].mxu1  ;;  %v6078_v58 = vrot.slane %v10487_v13, 7  ;;  %v6092_v18 = vsel %vm2305_vm5, %v10487_v13, %v6091_v10  ;;  %v6105_v53 = vrot.slane %v10487_v13, 1  ;;  %v6118_v4 = vrot.slane %v10487_v13, 2 }
 0xd5f   :  { %v5968_v37 = vrot.slane %v10493_v48, 7  ;;  %v5982_v19 = vsel %vm2305_vm5, %v10493_v48, %v5981_v17  ;;  %v5995_v16 = vrot.slane %v10493_v48, 1  ;;  %v6008_v40 = vrot.slane %v10493_v48, 2 }
 0xd60   :  { %v6079_v34 = vsel %vm2305_vm5, %v6078_v58, %v6077_v38  ;;  %v6106_v59 = vsel %vm2305_vm5, %v6105_v53, %v6104_v0  ;;  %v6119_v8 = vsel %vm2305_vm5, %v6118_v4, %v6117_v11  ;;  %v6130_v55 = vsel %vm2302_vm4, %v6129_v6, %v6128_v1 }
 0xd61   :  { %v10509_v52 = vpop.f32.mrb[70].mxu1  ;;  %v5969_v44 = vsel %vm2305_vm5, %v5968_v37, %v5967_v42  ;;  %v5996_v22 = vsel %vm2305_vm5, %v5995_v16, %v5994_v23  ;;  %v6009_v24 = vsel %vm2305_vm5, %v6008_v40, %v6007_v61  ;;  %v6131_v26 = vrot.slane %v10487_v13, 3 }
 0xd62   :  { %v10515_v62 = vpop.f32.mrb[71].mxu1  ;;  %v6080_v21 = vrot.slane %v10509_v52, 6  ;;  %v6093_v41 = vrot.slane %v10509_v52, 7  ;;  %v6107_v57 = vsel %vm2308_vm6, %v10509_v52, %v6106_v59  ;;  %v6120_v1 = vrot.slane %v10509_v52, 1 }
 0xd63   :  { %v5970_v38 = vrot.slane %v10515_v62, 6  ;;  %v5983_v30 = vrot.slane %v10515_v62, 7  ;;  %v5997_v54 = vsel %vm2308_vm6, %v10515_v62, %v5996_v22  ;;  %v6010_v2 = vrot.slane %v10515_v62, 1 }
 0xd64   :  { %v6081_v42 = vsel %vm2308_vm6, %v6080_v21, %v6079_v34  ;;  %v6094_v15 = vsel %vm2308_vm6, %v6093_v41, %v6092_v18  ;;  %v6121_v20 = vsel %vm2308_vm6, %v6120_v1, %v6119_v8  ;;  %v6132_v60 = vsel %vm2305_vm5, %v6131_v26, %v6130_v55 }
 0xd65   :  { %v10531_v10 = vpop.f32.mrb[72].mxu1  ;;  %v5971_v0 = vsel %vm2308_vm6, %v5970_v38, %v5969_v44  ;;  %v5984_v11 = vsel %vm2308_vm6, %v5983_v30, %v5982_v19  ;;  %v6011_v6 = vsel %vm2308_vm6, %v6010_v2, %v6009_v24  ;;  %v6133_v17 = vrot.slane %v10509_v52, 2 }
 0xd66   :  { %v10537_v23 = vpop.f32.mrb[73].mxu1  ;;  %v6082_v61 = vrot.slane %v10531_v10, 5  ;;  %v6095_v58 = vrot.slane %v10531_v10, 6  ;;  %v6108_v18 = vrot.slane %v10531_v10, 7  ;;  %v6122_v53 = vsel %vm2311_vm7, %v10531_v10, %v6121_v20 }
 0xd67   :  { %v5972_v4 = vrot.slane %v10537_v23, 5  ;;  %v5985_v37 = vrot.slane %v10537_v23, 6  ;;  %v5998_v19 = vrot.slane %v10537_v23, 7  ;;  %v6012_v16 = vsel %vm2311_vm7, %v10537_v23, %v6011_v6 }
 0xd68   :  { %v6083_v40 = vsel %vm2311_vm7, %v6082_v61, %v6081_v42  ;;  %v6096_v34 = vsel %vm2311_vm7, %v6095_v58, %v6094_v15  ;;  %v6109_v59 = vsel %vm2311_vm7, %v6108_v18, %v6107_v57  ;;  %v6134_v8 = vsel %vm2308_vm6, %v6133_v17, %v6132_v60 }
 0xd69   :  { %v10553_v55 = vpop.f32.mrb[74].mxu1  ;;  %v5973_v44 = vsel %vm2311_vm7, %v5972_v4, %v5971_v0  ;;  %v5986_v22 = vsel %vm2311_vm7, %v5985_v37, %v5984_v11  ;;  %v5999_v24 = vsel %vm2311_vm7, %v5998_v19, %v5997_v54  ;;  %v6135_v26 = vrot.slane %v10531_v10, 1 }
 0xd6a   :  { %v10559_v21 = vpop.f32.mrb[75].mxu1  ;;  %v6084_v41 = vrot.slane %v10553_v55, 4  ;;  %v6097_v1 = vrot.slane %v10553_v55, 5  ;;  %v6110_v57 = vrot.slane %v10553_v55, 6  ;;  %v6123_v38 = vrot.slane %v10553_v55, 7 }
 0xd6b   :  { %v5974_v30 = vrot.slane %v10559_v21, 4  ;;  %v5987_v2 = vrot.slane %v10559_v21, 5  ;;  %v6000_v42 = vrot.slane %v10559_v21, 6  ;;  %v6013_v54 = vrot.slane %v10559_v21, 7 }
 0xd6c   :  { %v10570_v15 = vsel %vm2314_vm8, %v6084_v41, %v6083_v40  ;;  %v10573_v20 = vsel %vm2314_vm8, %v6097_v1, %v6096_v34  ;;  %v10576_v60 = vsel %vm2314_vm8, %v6110_v57, %v6109_v59  ;;  %v10579_v0 = vsel %vm2314_vm8, %v6123_v38, %v6122_v53 }
 0xd6d   :  { %v10582_v11 = vsel %vm2314_vm8, %v5974_v30, %v5973_v44  ;;  %v10585_v6 = vsel %vm2314_vm8, %v5987_v2, %v5986_v22  ;;  %v10588_v17 = vsel %vm2314_vm8, %v6000_v42, %v5999_v24  ;;  %v10591_v61 = vsel %vm2314_vm8, %v6013_v54, %v6012_v16 }
 0xd6e   :  { %v6519_v58 = vpop.f32.mrb[76].mxu1  ;;  %v6136_v18 = vsel %vm2311_vm7, %v6135_v26, %v6134_v8  ;;  %v6020_v53 = vsel %vm2302_vm4, %v6019_v3, %v6018_v12  ;;  %v6021_v4 = vrot.slane %v10493_v48, 3  ;;  %v6023_v37 = vrot.slane %v10515_v62, 2 }
 0xd6f   :  { %v10601_v19 = vmul.f32 0.35355338, %v6519_v58  ;;  %v8441_v40 = vpop.f32.mrb[77].mxu1  ;;  %v10605_v16 = vsel %vm2314_vm8, %v10553_v55, %v6136_v18  ;;  %v6025_v34 = vrot.slane %v10537_v23, 1  ;;  %v6032_v59 = vrot.slane %v10471_v51, 5 }
 0xd70   :  { %v6022_v8 = vsel %vm2305_vm5, %v6021_v4, %v6020_v53  ;;  %v6034_v44 = vrot.slane %v10493_v48, 4  ;;  %v6036_v12 = vrot.slane %v10515_v62, 3  ;;  %v6038_v3 = vrot.slane %v10537_v23, 2 }
 0xd71   :  { %v6825_v22 = vsel %vm6824_vm10, %v10601_v19, -inf  ;;  %v6024_v24 = vsel %vm2308_vm6, %v6023_v37, %v6022_v8  ;;  %v6033_v26 = vsel %vm2302_vm4, %v6032_v59, %v6031_v25  ;;  %v6040_v41 = vrot.slane %v10559_v21, 1 }
 0xd72   :  { %6826 = vmax.xlane.f32.xlu0 %v6825_v22  ;;  %v6618_v1 = vpop.f32.mrb[78].mxu1  ;;  %v6026_v57 = vsel %vm2311_vm7, %v6025_v34, %v6024_v24  ;;  %v6035_v38 = vsel %vm2305_vm5, %v6034_v44, %v6033_v26  ;;  %v6046_v30 = vrot.slane %v10471_v51, 6  ;;  %v6048_v2 = vrot.slane %v10493_v48, 5 }
 0xd73   :  { %v10624_v42 = vmul.f32 0.35355338, %v6618_v1  ;;  %v8446_v54 = vpop.f32.mrb[79].mxu1  ;;  %v10628_v58 = vsel %vm2314_vm8, %v10559_v21, %v6026_v57  ;;  %v6037_v25 = vsel %vm2308_vm6, %v6036_v12, %v6035_v38  ;;  %v6050_v18 = vrot.slane %v10515_v62, 4 }
 0xd74   :  { %v6039_v53 = vsel %vm2311_vm7, %v6038_v3, %v6037_v25  ;;  %v6047_v4 = vsel %vm2302_vm4, %v6046_v30, %v6045_v63  ;;  %v6052_v37 = vrot.slane %v10537_v23, 3  ;;  %v6054_v40 = vrot.slane %v10559_v21, 2 }
 0xd75   :  { %v6828_v34 = vsel %vm6824_vm10, %v10624_v42, -inf  ;;  %v10641_v59 = vsel %vm2314_vm8, %v6040_v41, %v6039_v53  ;;  %v6049_v8 = vsel %vm2305_vm5, %v6048_v2, %v6047_v4  ;;  %v6142_v44 = vrot.slane %v10465_v50, 5 }
 0xd76   :  { %6829 = vmax.xlane.f32.xlu1 %v6828_v34  ;;  %v6051_v12 = vsel %vm2308_vm6, %v6050_v18, %v6049_v8  ;;  %v6144_v3 = vrot.slane %v10487_v13, 4  ;;  %v6146_v63 = vrot.slane %v10509_v52, 3  ;;  %v6148_v22 = vrot.slane %v10531_v10, 2 }
 0xd77   :  { %v6053_v24 = vsel %vm2311_vm7, %v6052_v37, %v6051_v12  ;;  %v6143_v26 = vsel %vm2302_vm4, %v6142_v44, %v6141_v56  ;;  %v6150_v41 = vrot.slane %v10553_v55, 1  ;;  %v6156_v1 = vrot.slane %v10465_v50, 6 }
 0xd78   :  { %v10656_v57 = vsel %vm2314_vm8, %v6054_v40, %v6053_v24  ;;  %v6145_v38 = vsel %vm2305_vm5, %v6144_v3, %v6143_v26  ;;  %v6158_v30 = vrot.slane %v10487_v13, 5  ;;  %v6160_v2 = vrot.slane %v10509_v52, 4 }
 0xd79   :  { %v6147_v54 = vsel %vm2308_vm6, %v6146_v63, %v6145_v38  ;;  %v6157_v25 = vsel %vm2302_vm4, %v6156_v1, %v6155_v27  ;;  %v6162_v56 = vrot.slane %v10531_v10, 3  ;;  %v6164_v18 = vrot.slane %v10553_v55, 2 }
 0xd7a   :  { %v6149_v53 = vsel %vm2311_vm7, %v6148_v22, %v6147_v54  ;;  %v6159_v4 = vsel %vm2305_vm5, %v6158_v30, %v6157_v25  ;;  %v6065_v37 = vrot.slane %v10465_v50, 7  ;;  %v6067_v40 = vrot.slane %v10487_v13, 6 }
 0xd7b   :  { %v10672_v34 = vsel %vm2314_vm8, %v6150_v41, %v6149_v53  ;;  %v6161_v8 = vsel %vm2308_vm6, %v6160_v2, %v6159_v4  ;;  %v6069_v44 = vrot.slane %v10509_v52, 5  ;;  %v6071_v27 = vrot.slane %v10531_v10, 4 }
 0xd7c   :  { %v6163_v12 = vsel %vm2311_vm7, %v6162_v56, %v6161_v8  ;;  %v6066_v3 = vsel %vm2302_vm4, %v6065_v37, %v10451_v47  ;;  %v6073_v63 = vrot.slane %v10553_v55, 3  ;;  %v5955_v50 = vrot.slane %v10471_v51, 7 }
 0xd7d   :  { %v10683_v13 = vsel %vm2314_vm8, %v6164_v18, %v6163_v12  ;;  %v6068_v22 = vsel %vm2305_vm5, %v6067_v40, %v6066_v3  ;;  %v5957_v24 = vrot.slane %v10493_v48, 6  ;;  %v5959_v52 = vrot.slane %v10515_v62, 5 }
 0xd7e   :  { %v6070_v10 = vsel %vm2308_vm6, %v6069_v44, %v6068_v22  ;;  %v5956_v26 = vsel %vm2302_vm4, %v5955_v50, %v10453_v43  ;;  %v5961_v47 = vrot.slane %v10537_v23, 4  ;;  %v5963_v55 = vrot.slane %v10559_v21, 3 }
 0xd7f   :  { %v6072_v51 = vsel %vm2311_vm7, %v6071_v27, %v6070_v10  ;;  %v5958_v41 = vsel %vm2305_vm5, %v5957_v24, %v5956_v26 }
 0xd80   :  { %v10696_v1 = vsel %vm2314_vm8, %v6073_v63, %v6072_v51  ;;  %v5960_v48 = vsel %vm2308_vm6, %v5959_v52, %v5958_v41 }
 0xd81   :  { %v5962_v62 = vsel %vm2311_vm7, %v5961_v47, %v5960_v48 }
 0xd82   :  { %v10701_v38 = vsel %vm2314_vm8, %v5963_v55, %v5962_v62 }
 0xd87   :  { %6869 = vrot.lane.b32.xlu1 %v10369_v36, %s9072_s24 }
 0xdbd   :  { %v6717_v43 = vpop.f32.mrb[80].mxu1 }
 0xdbe   :  { %v6822_v23 = vmul.f32 0.35355338, %v6717_v43  ;;  %v8451_v21 = vpop.f32.mrb[81].mxu1 }
 0xdc0   :  { %v6831_v30 = vsel %vm6824_vm10, %v6822_v23, -inf }
 0xdc1   :  { %6832 = vmax.xlane.f32.xlu0 %v6831_v30 }
 0xdc3   :  { %v6816_v2 = vpop.f32.mrb[82].mxu0 }
 0xdc4   :  { %v6823_v54 = vmul.f32 0.35355338, %v6816_v2  ;;  %v8456_v25 = vpop.f32.mrb[83].mxu0 }
 0xdc6   :  { %v6834_v56 = vsel %vm6824_vm10, %v6823_v54, -inf }
 0xdc7   :  { %6835 = vmax.xlane.f32.xlu0 %v6834_v56 }
 0xdff   :  { %v6827_v18 = vpop.xlane.xlu0 %6826 }
 0xe00   :  { %v6837_v53 = vsub.f32 %v10601_v19, %v6827_v18 }
 0xe02   :  { %v6841_v4 = vmul.f32 1.442695, %v6837_v53 }
 0xe03   :  { %v6830_v37 = vpop.xlane.xlu1 %6829 }
 0xe04   :  { %9052 = vpow2.f32 %v6841_v4  ;;  %v6838_v36 = vsub.f32 %v10624_v42, %v6830_v37 }
 0xe06   :  { %v6843_v40 = vmul.f32 1.442695, %v6838_v36 }
 0xe07   :  { %v6870_v8 = vpop.permute.xlu1 %6869 }
 0xe08   :  { %9054 = vpow2.f32 %v6843_v40  ;;  %8458 = vmatpush3.msk.msra.mxu1 %vm6875_vm11, %v6870_v8  ;;  %v6203_v40 = vld [vmem:[%s10853_s10] sm:$0xff]  ;;  %v6204_v8 = vld [vmem:[%s10853_s10 + $0x8] sm:$0xff]  ;;  %s9079_s10 = smov 64  }
 0xe09   :  { %8467 = vmatprep.subr.mxu1 %v9068_v9 }
 0xe0e   :  { %v9053_v44 = vpop.eup %9052 }
 0xe0f   :  { %v6849_v27 = vsel %vm6824_vm10, %v9053_v44, 0.0 }
 0xe10   :  { %6850 = vadd.xlane.f32.xlu1 %v6849_v27 }
 0xe12   :  { %v9055_v12 = vpop.eup %9054 }
 0xe13   :  { %v6852_v19 = vsel %vm6824_vm10, %v9055_v12, 0.0 }
 0xe14   :  { %6853 = vadd.xlane.f32.xlu0 %v6852_v19 }
 0xe4e   :  { %v6833_v3 = vpop.xlane.xlu0 %6832 }
 0xe4f   :  { %v6839_v63 = vsub.f32 %v6822_v23, %v6833_v3 }
 0xe51   :  { %v6845_v50 = vmul.f32 1.442695, %v6839_v63 }
 0xe53   :  { %9056 = vpow2.f32 %v6845_v50 }
 0xe54   :  { %v6836_v42 = vpop.xlane.xlu0 %6835 }
 0xe55   :  { %v6840_v22 = vsub.f32 %v6823_v54, %v6836_v42 }
 0xe57   :  { %v6847_v24 = vmul.f32 1.442695, %v6840_v22 }
 0xe59   :  { %9058 = vpow2.f32 %v6847_v24 }
 0xe5d   :  { %v9057_v52 = vpop.eup %9056 }
 0xe5e   :  { %v6855_v10 = vsel %vm6824_vm10, %v9057_v52, 0.0 }
 0xe5f   :  { %6856 = vadd.xlane.f32.xlu1 %v6855_v10 }
 0xe63   :  { %v9059_v26 = vpop.eup %9058 }
 0xe64   :  { %v6858_v47 = vsel %vm6824_vm10, %v9059_v26, 0.0 }
 0xe65   :  { %6859 = vadd.xlane.f32.xlu0 %v6858_v47 }
 0xe70   :  { %7025 = vrot.lane.b32.xlu1 %v10378_v45, %s9072_s24 }
 0xe74   :  { %7102 = vrot.lane.b32.xlu1 %v10385_v46, %s9072_s24 }
 0xe7b   :  { %6948 = vrot.lane.b32.xlu0 %v10366_v49, %s9072_s24 }
 0xe9d   :  { %v6851_v55 = vpop.xlane.xlu1 %6850 }
 0xe9e   :  { %9060 = vrcp.f32 %v6851_v55 }
 0xea1   :  { %v6854_v48 = vpop.xlane.xlu0 %6853 }
 0xea2   :  { %9062 = vrcp.f32 %v6854_v48 }
 0xea8   :  { %v9061_v51 = vpop.eup %9060 }
 0xea9   :  { %v6865_v41 = vmul.f32 %v9061_v51, %v9053_v44  ;;  %v8713_v44 = vpack.c.bf16 %v6204_v8, %v6203_v40 }
 0xeab   :  { %8460 = vmatmul.mubr.msk.f32.vlgmr.msra.gmra.mrb[82].mxu1 %vm6871_vm12, %v6865_v41 }
 0xeac   :  { %8469 = vmatprep.mubr.msk.f32.mxu1 %vm9070_vm1, %v9068_v9  ;;  %v9063_v49 = vpop.eup %9062 }
 0xead   :  { %v6866_v43 = vmul.f32 %v9063_v49, %v9055_v12 }
 0xeec   :  { %v6857_v62 = vpop.xlane.xlu1 %6856 }
 0xeed   :  { %9064 = vrcp.f32 %v6857_v62 }
 0xef0   :  { %v7026_v45 = vpop.permute.xlu1 %7025 }
 0xef1   :  { %8468 = vmatpush3.msk.msra.mxu1 %vm6875_vm11, %v7026_v45 }
 0xef2   :  { %v6860_v46 = vpop.xlane.xlu0 %6859  ;;  %8712 = vmatprep.subr.bf16.mxu1 %v9075_v5 }
 0xef3   :  { %9066 = vrcp.f32 %v6860_v46 }
 0xef4   :  { %v7103_v2 = vpop.permute.xlu1 %7102 }
 0xef6   :  { %v6949_v23 = vpop.permute.xlu0 %6948 }
 0xef7   :  { %v9065_v21 = vpop.eup %9064  ;;  %8463 = vmatpush3.msk.msra.mxu0 %vm6875_vm11, %v6949_v23 }
 0xef8   :  { %v6867_v30 = vmul.f32 %v9065_v21, %v9057_v52  ;;  %8465 = vmatmul.mubr.msk.f32.vlgmr.msra.gmra.mrb[84].mxu0 %vm6871_vm12, %v6866_v43  ;;  %8472 = vmatprep.subr.mxu0 %v9068_v9 }
 0xef9   :  { %8473 = vmatpush3.msk.msra.mxu0 %vm6875_vm11, %v7103_v2  ;;  %8474 = vmatprep.mubr.msk.f32.mxu0 %vm9070_vm1, %v9068_v9 }
 0xefa   :  { %8470 = vmatmul.mubr.msk.f32.vlgmr.msra.gmra.mrb[84].mxu1 %vm6871_vm12, %v6867_v30 }
 0xefb   :  { %8481 = vmatprep.mubr.msk.f32.mxu1 %vm9070_vm1, %v9068_v9  ;;  %8714 = vmatpush3.bf16.msra.mxu1 %v8713_v44  ;;  %vm2419_vm1 = vcmask 785408  }
 0xefd   :  { %v9067_v5 = vpop.eup %9066 }
 0xefe   :  { %v6868_v54 = vmul.f32 %v9067_v5, %v9059_v26 }
 0xf00   :  { %8475 = vmatmul.mubr.msk.f32.vlgmr.msra.gmra.mrb[86].mxu0 %vm6871_vm12, %v6868_v54 }
 0xf7e   :  { %v6944_v25 = vpop.f32.mrb[82].mxu1 }
 0xf7f   :  { %v8461_v56 = vpop.f32.mrb[83].mxu1 }
 0xfcb   :  { %v7021_v18 = vpop.f32.mrb[84].mxu0 }
 0xfcc   :  { %v8466_v53 = vpop.f32.mrb[85].mxu0 }
 0xfcd   :  { %v7098_v4 = vpop.f32.mrb[84].mxu1 }
 0xfce   :  { %v8471_v37 = vpop.f32.mrb[85].mxu1  ;;  %7181 = vrot.lane.b32.xlu0 %v7098_v4, %s9073_s0 }
 0xfd2   :  { %2327 = vrot.lane.b32.xlu0 %v9681_v28, %s9076_s8 }
 0xfd3   :  { %v7175_v36 = vpop.f32.mrb[86].mxu0 }
 0xfd4   :  { %7183 = vrot.lane.b32.xlu1 %v7175_v36, %s9073_s0  ;;  %v8476_v9 = vpop.f32.mrb[87].mxu0  ;;  %s9078_s0 = smov 48  }
 0xfd6   :  { %6086 = vrot.lane.b32.xlu0 %v10570_v15, %s9076_s8 }
 0xfd8   :  { %5976 = vrot.lane.b32.xlu1 %v10582_v11, %s9076_s8 }
 0xfda   :  { %5989 = vrot.lane.b32.xlu0 %v10585_v6, %s9077_s7 }
 0xfdc   :  { %2340 = vrot.lane.b32.xlu1 %v9684_v29, %s9077_s7 }
 0xfde   :  { %2353 = vrot.lane.b32.xlu0 %v9687_v31, %s9078_s0 }
 0xfe0   :  { %6099 = vrot.lane.b32.xlu1 %v10573_v20, %s9077_s7 }
 0xfe2   :  { %6112 = vrot.lane.b32.xlu0 %v10576_v60, %s9078_s0 }
 0xfe4   :  { %6002 = vrot.lane.b32.xlu1 %v10588_v17, %s9078_s0 }
 0xfe6   :  { %6015 = vrot.lane.b32.xlu0 %v10591_v61, %s9079_s10 }
 0xfe8   :  { %2366 = vrot.lane.b32.xlu1 %v9675_v7, %s9079_s10 }
 0xfea   :  { %2379 = vrot.lane.b32.xlu0 %v9693_v32, %s9080_s25 }
 0xfec   :  { %6125 = vrot.lane.b32.xlu1 %v10579_v0, %s9079_s10 }
 0xfee   :  { %6138 = vrot.lane.b32.xlu0 %v10605_v16, %s9080_s25 }
 0xff0   :  { %6028 = vrot.lane.b32.xlu1 %v10628_v58, %s9080_s25 }
 0xff2   :  { %6042 = vrot.lane.b32.xlu0 %v10641_v59, %s9072_s24 }
 0xff4   :  { %2393 = vrot.lane.b32.xlu1 %v9696_v35, %s9072_s24 }
 0xff6   :  { %6056 = vrot.lane.b32.xlu0 %v10656_v57, %s9071_s1 }
 0xff8   :  { %6152 = vrot.lane.b32.xlu1 %v10672_v34, %s9072_s24 }
 0xffc   :  { %2407 = vrot.lane.b32.xlu1 %v9701_v39, %s9071_s1 }
0x1000   :  { %6166 = vrot.lane.b32.xlu1 %v10683_v13, %s9071_s1 }
0x1040   :  { %v7182_v7 = vpop.permute.xlu0 %7181 }
0x1041   :  { %v7187_v28 = vsel %vm185_vm2, %v6944_v25, %v7182_v7 }
0x1042   :  { %v7197_v29 = vrot.slane %v7187_v28, %v10223_v14 }
0x1044   :  { %v7198_v31 = vcombine.high %v7197_v29, %v7197_v29  ;;  %v2328_v32 = vpop.permute.xlu0 %2327  ;;  %v7205_v35 = vrot.slane %v7197_v29, %v10223_v14 }
0x1045   :  { %v2410_v21 = vsel %vm51_vm0, %v9705_v33, %v2328_v32 }
0x1046   :  { %v7212_v15 = vrot.slane %v7198_v31, %v10223_v14  ;;  %v7184_v20 = vpop.permute.xlu1 %7183  ;;  %v7213_v11 = vcombine.high %v7205_v35, %v7205_v35 }
0x1047   :  { %v7188_v60 = vsel %vm185_vm2, %v7021_v18, %v7184_v20  ;;  %vm2421_vm2 = vcmask 916480  }
0x1048   :  { %v7220_v0 = vrot.slane %v7188_v60, %v10223_v14  ;;  %v6087_v39 = vpop.permute.xlu0 %6086  ;;  %v7237_v6 = vcombine.low %v7205_v35, %v7212_v15 }
0x1049   :  { %v6176_v25 = vsel %vm51_vm0, %v10696_v1, %v6087_v39 }
0x104a   :  { %v7221_v17 = vcombine.high %v7220_v0, %v7220_v0  ;;  %v7228_v61 = vrot.slane %v7220_v0, %v10223_v14  ;;  %v5977_v16 = vpop.permute.xlu1 %5976  ;;  %v7246_v13 = vrot.slane %v7237_v6, %v10223_v14 }
0x104b   :  { %v6169_v41 = vsel %vm51_vm0, %v10701_v38, %v5977_v16 }
0x104c   :  { %v7235_v58 = vrot.slane %v7221_v17, %v10223_v14  ;;  %v7236_v59 = vcombine.high %v7228_v61, %v7228_v61  ;;  %v7238_v57 = vcombine.low %v7213_v11, %v7228_v61  ;;  %v5990_v34 = vpop.permute.xlu0 %5989 }
0x104d   :  { %v6170_v62 = vsel %vm2411_vm13, %v6169_v41, %v5990_v34 }
0x104e   :  { %v7239_v27 = vcombine.low %v7235_v58, %v7236_v59  ;;  %v7253_v12 = vrot.slane %v7238_v57, %v10223_v14  ;;  %v2341_v19 = vpop.permute.xlu1 %2340 }
0x104f   :  { %v2412_v38 = vsel %vm2411_vm13, %v2410_v21, %v2341_v19 }
0x1050   :  { %v7260_v3 = vrot.slane %v7239_v27, %v10223_v14  ;;  %v7261_v63 = vcombine.low %v7246_v13, %v7253_v12  ;;  %v2354_v50 = vpop.permute.xlu0 %2353 }
0x1051   :  { %v2414_v56 = vsel %vm2413_vm3, %v2412_v38, %v2354_v50 }
0x1052   :  { %v7268_v42 = vrot.slane %v7261_v63, %v10223_v14  ;;  %v7275_v22 = vrot.slane %v7260_v3, %v10223_v14  ;;  %v6100_v24 = vpop.permute.xlu1 %6099 }
0x1053   :  { %v6177_v53 = vsel %vm2411_vm13, %v6176_v25, %v6100_v24 }
0x1054   :  { %v6113_v52 = vpop.permute.xlu0 %6112  ;;  %v7276_v10 = vcombine.low %v7268_v42, %v7275_v22 }
0x1055   :  { %v6178_v37 = vsel %vm2413_vm3, %v6177_v53, %v6113_v52 }
0x1056   :  { %8482 = vmatmul.mubr.msk.f32.vlgmr.msra.gmra.mrb[86].mxu1 %vm51_vm0, %v7276_v10  ;;  %v6003_v26 = vpop.permute.xlu1 %6002 }
0x1057   :  { %v6171_v46 = vsel %vm2413_vm3, %v6170_v62, %v6003_v26  ;;  %vm7451_vm3 = vcmask 386048  }
0x1058   :  { %v6016_v47 = vpop.permute.xlu0 %6015 }
0x1059   :  { %v6172_v43 = vsel %vm2415_vm14, %v6171_v46, %v6016_v47 }
0x105a   :  { %v2367_v55 = vpop.permute.xlu1 %2366 }
0x105b   :  { %v2416_v33 = vsel %vm2415_vm14, %v2414_v56, %v2367_v55 }
0x105c   :  { %v2380_v51 = vpop.permute.xlu0 %2379 }
0x105d   :  { %v2418_v36 = vsel %vm2417_vm15, %v2416_v33, %v2380_v51 }
0x105e   :  { %v6126_v48 = vpop.permute.xlu1 %6125 }
0x105f   :  { %v6179_v9 = vsel %vm2415_vm14, %v6178_v37, %v6126_v48 }
0x1060   :  { %v6139_v45 = vpop.permute.xlu0 %6138 }
0x1061   :  { %v6180_v44 = vsel %vm2417_vm15, %v6179_v9, %v6139_v45 }
0x1062   :  { %v6029_v49 = vpop.permute.xlu1 %6028 }
0x1063   :  { %v6173_v30 = vsel %vm2417_vm15, %v6172_v43, %v6029_v49 }
0x1064   :  { %v6043_v23 = vpop.permute.xlu0 %6042 }
0x1065   :  { %v6174_v5 = vsel %vm2419_vm1, %v6173_v30, %v6043_v23 }
0x1066   :  { %v2394_v2 = vpop.permute.xlu1 %2393 }
0x1067   :  { %v2420_v1 = vsel %vm2419_vm1, %v2418_v36, %v2394_v2 }
0x1068   :  { %v6057_v54 = vpop.permute.xlu0 %6056 }
0x1069   :  { %v6175_v18 = vsel %vm2421_vm2, %v6174_v5, %v6057_v54 }
0x106a   :  { %6183 = vst [vmem:[%s10854_s12] sm:$0x3f] %v6175_v18  ;;  %v6153_v4 = vpop.permute.xlu1 %6152 }
0x106b   :  { %v6181_v7 = vsel %vm2419_vm1, %v6180_v44, %v6153_v4 }
0x106e   :  { %v2408_v40 = vpop.permute.xlu1 %2407 }
0x106f   :  { %v2422_v8 = vsel %vm2421_vm2, %v2420_v1, %v2408_v40 }
0x1070   :  { %2423 = vst [vmem:[%s10855_s11] sm:$0x3f] %v2422_v8 }
0x1072   :  { %v6167_v28 = vpop.permute.xlu1 %6166 }
0x1073   :  { %v6182_v29 = vsel %vm2421_vm2, %v6181_v7, %v6167_v28 }
0x1074   :  { %6184 = vst [vmem:[%s10854_s12 + $0x8] sm:$0x3f] %v6182_v29 }
0x1129   :  { %v7345_v31 = vpop.f32.mrb[86].mxu1 }
0x112a   :  { %v7350_v32 = vcombine.high %v7345_v31, %v7345_v31  ;;  %v7357_v35 = vrot.slane %v7345_v31, %v10223_v14  ;;  %v8483_v15 = vpop.f32.mrb[87].mxu1 }
0x112c   :  { %v7364_v20 = vrot.slane %v7350_v32, %v10223_v14  ;;  %v7365_v60 = vcombine.high %v7357_v35, %v7357_v35  ;;  %v7373_v0 = vrot.slane %v7357_v35, %v10223_v14 }
0x112e   :  { %v7366_v39 = vcombine.high %v7364_v20, %v7364_v20  ;;  %v7380_v11 = vrot.slane %v7364_v20, %v10223_v14  ;;  %v7387_v6 = vrot.slane %v7365_v60, %v10223_v14  ;;  %v7395_v61 = vcombine.high %v7373_v0, %v7373_v0 }
0x1130   :  { %v7394_v17 = vrot.slane %v7366_v39, %v10223_v14  ;;  %v7396_v16 = vcombine.high %v7387_v6, %v7387_v6  ;;  %v7413_v58 = vcombine.low %v7387_v6, %v7380_v11 }
0x1132   :  { %v7397_v59 = vcombine.low %v7373_v0, %v7396_v16  ;;  %v7431_v57 = vcombine.low %v7395_v61, %v7394_v17  ;;  %v7420_v34 = vrot.slane %v7413_v58, %v10223_v14 }
0x1134   :  { %v7427_v13 = vrot.slane %v7420_v34, %v10223_v14  ;;  %v7438_v27 = vrot.slane %v7431_v57, %v10223_v14  ;;  %v7404_v19 = vrot.slane %v7397_v59, %v10223_v14 }
0x1136   :  { %7428 = vrot.lane.b32.xlu0 %v7427_v13, %s9076_s8  ;;  %v7445_v12 = vrot.slane %v7438_v27, %v10223_v14  ;;  %v7411_v63 = vrot.slane %v7404_v19, %v10223_v14 }
0x113a   :  { %7446 = vrot.lane.b32.xlu0 %v7445_v12, %s9077_s7 }
0x11a8   :  { %v7429_v3 = vpop.permute.xlu0 %7428 }
0x11a9   :  { %v7449_v50 = vsel %vm51_vm0, %v7411_v63, %v7429_v3 }
0x11ac   :  { %v7447_v42 = vpop.permute.xlu0 %7446 }
0x11ad   :  { %v7450_v22 = vsel %vm2411_vm13, %v7449_v50, %v7447_v42 }
0x11ae   :  { %7452 = vst.msk [vmem:[%s10856_s13] sm:$0x3] %vm7451_vm3, %v7450_v22 }

</bundles_post_ra>
